<compile_context>
chip_gen: v6e
topology: v6e:2x2x1
jax: 0.10.0
libtpu: 0.0.40
codegen_flags: <defaults>
</compile_context>

<pallas_src>
import numpy as np
import jax
import jax.numpy as jnp
from jax.experimental import pallas as pl
from jax.experimental.pallas import tpu as pltpu

# ----------------- config (small, consistent with the module) ----------------
SEQ_LEN = 16
PRED_LEN = 8          # unused by forward()
TOP_K = 2
D_MODEL = 32
D_FF = 64
N_HEADS = 4
HEAD_DIM = D_MODEL // N_HEADS
C_OUT = 8             # number of graph nodes
CONV_CHANNEL = 8
SKIP_CHANNEL = 8
GCN_DEPTH = 2
PROP_ALPHA = 0.3
NODE_DIM = 10
GRID_SIZE = 5
SPLINE_ORDER = 3
N_BASIS = GRID_SIZE + SPLINE_ORDER            # 8 spline bases per feature
KNOTS = GRID_SIZE + 2 * SPLINE_ORDER + 1      # 12 knots per feature

# Maximum padded length FFT_for_Period can force for SEQ_LEN (static).
_PERIODS = sorted({SEQ_LEN // j for j in range(1, SEQ_LEN // 2 + 1)})
LPAD = max(-(-SEQ_LEN // p) * p for p in _PERIODS)    # = 20 for SEQ_LEN=16

_F32 = jnp.float32


# ------------------------------ in-kernel helpers ------------------------------
def _ln(v, g, b):
    mu = jnp.mean(v, axis=-1, keepdims=True)
    var = jnp.mean((v - mu) ** 2, axis=-1, keepdims=True)   # biased, like torch LN
    return (v - mu) * jax.lax.rsqrt(var + 1e-5) * g + b


def _gelu(v):
    # exact (erf-based) GELU, matching torch.nn.GELU()
    return 0.5 * v * (1.0 + jax.lax.erf(v * 0.7071067811865476))


# ------------------------------ Pallas kernels --------------------------------
def _graph_front_kernel(x_ref, ws_ref, bs_ref, prop_ref, wm_ref, bm_ref, y_ref):
    """GraphBlock front: start_conv -> mixprop(gcn_depth) -> 1x1 mlp -> gelu.

    Everything is a lane-dense (rows = B*T) matmul over pre-unfolded weights;
    all intermediates stay in vregs (no lane-sparse HBM stores).
    """
    x = x_ref[...]                                                     # (B*T, D)
    h0 = jnp.dot(x, ws_ref[0], preferred_element_type=_F32) + bs_ref[0]   # (B*T, n*CC)
    prop = prop_ref[0]                                                 # (n*CC, n*CC) = kron(A^T, I)
    outs = [h0]
    h = h0
    for _ in range(GCN_DEPTH):
        h = PROP_ALPHA * h0 + (1.0 - PROP_ALPHA) * jnp.dot(
            h, prop, preferred_element_type=_F32)
        outs.append(h)
    wm = wm_ref[0]                                                     # (3*n*CC, n*SC)
    blk = C_OUT * CONV_CHANNEL
    y = bm_ref[0]
    for l in range(GCN_DEPTH + 1):                                     # concat folded into matmul
        y = y + jnp.dot(outs[l], wm[l * blk:(l + 1) * blk, :],
                        preferred_element_type=_F32)
    y_ref[0] = _gelu(y)                                                # (B*T, n*SC)


def _branch_kernel(scale_sref, len_sref,
                   yt_ref, x_ref,
                   endw_ref, endb_ref, linw_ref, linb_ref, glng_ref, glnb_ref,
                   wqkv_ref, bqkv_ref, wo_ref, bo_ref,
                   w1_ref, b1_ref, w2_ref, b2_ref,
                   ln1g_ref, ln1b_ref, ln2g_ref, ln2b_ref,
                   nrmg_ref, nrmb_ref,
                   kanw_ref, kans_ref, kgrid_ref,
                   o_ref):
    """Per (scale, batch): GraphBlock tail + Attention_Block + norm + gelu + KAN."""
    i = pl.program_id(0)
    length = len_sref[i]                         # ceil(T/scale)*scale (int32, SMEM)
    scale_f = scale_sref[i].astype(_F32)         # period / chunk length

    # ---- GraphBlock tail: end_conv (full-time conv as matmul) -> linear -> +x -> LN ----
    x_b = x_ref[...]                                                          # (T, D)
    zt = jnp.dot(endw_ref[0], yt_ref[0], preferred_element_type=_F32) + endb_ref[0]  # (T, n)
    g = jnp.dot(zt, linw_ref[0], preferred_element_type=_F32) + linb_ref[0]   # (T, D)
    g = _ln(x_b + g, glng_ref[0], glnb_ref[0])

    # ---- zero-pad rows T..LPAD-1 (matches reference torch.cat with zeros) ----
    sel = (jax.lax.broadcasted_iota(jnp.int32, (LPAD, SEQ_LEN), 0)
           == jax.lax.broadcasted_iota(jnp.int32, (LPAD, SEQ_LEN), 1)).astype(_F32)
    h = jnp.dot(sel, g, preferred_element_type=_F32)                          # (LPAD, D)

    # ---- fused Attention_Block: one QKV matmul, per-head masked softmax, out proj ----
    qkv = jnp.dot(h, wqkv_ref[...], preferred_element_type=_F32) + bqkv_ref[...]  # (LPAD, 3D)
    row = jax.lax.broadcasted_iota(jnp.int32, (LPAD, LPAD), 0)
    col = jax.lax.broadcasted_iota(jnp.int32, (LPAD, LPAD), 1)
    chunk_r = jnp.floor((row.astype(_F32) + 0.5) / scale_f)
    chunk_c = jnp.floor((col.astype(_F32) + 0.5) / scale_f)
    # Block-diagonal mask == reference reshape into (length//scale, scale) chunks.
    allowed = (chunk_r == chunk_c) & (col < length)
    # TODO(synk): reference FullAttention may apply a causal mask by default;
    # non-causal chunked attention is used here.
    wo = wo_ref[...]
    att = bo_ref[...]
    sm_scale = 1.0 / float(np.sqrt(HEAD_DIM))
    for hh in range(N_HEADS):
        lo, hi = hh * HEAD_DIM, (hh + 1) * HEAD_DIM
        qh = qkv[:, lo:hi]
        kh = qkv[:, D_MODEL + lo:D_MODEL + hi]
        vh = qkv[:, 2 * D_MODEL + lo:2 * D_MODEL + hi]
        s = jnp.dot(qh, kh.T, preferred_element_type=_F32) * sm_scale
        s = jnp.where(allowed, s, -1e30)        # finite mask: dead (pad) rows stay finite
        s = s - jnp.max(s, axis=-1, keepdims=True)
        p = jnp.exp(s)
        p = p / jnp.sum(p, axis=-1, keepdims=True)
        oh = jnp.dot(p, vh, preferred_element_type=_F32)
        att = att + jnp.dot(oh, wo[lo:hi, :], preferred_element_type=_F32)

    xn = _ln(h + att, ln1g_ref[...], ln1b_ref[...])
    ff = _gelu(jnp.dot(xn, w1_ref[...], preferred_element_type=_F32) + b1_ref[...])
    ff = jnp.dot(ff, w2_ref[...], preferred_element_type=_F32) + b2_ref[...]
    y = _ln(xn + ff, ln2g_ref[...], ln2b_ref[...])

    # ---- outer LayerNorm + GELU ----
    y = _gelu(_ln(y, nrmg_ref[...], nrmb_ref[...]))

    # ---- KANLinear (efficient-KAN): SiLU base branch + in-kernel B-spline branch ----
    out = jnp.dot(y * jax.nn.sigmoid(y), kanw_ref[...], preferred_element_type=_F32)
    kg = kgrid_ref[...]                                          # (KNOTS, D)
    knots = [kg[j:j + 1, :] for j in range(KNOTS)]
    basis = [((y >= knots[j]) & (y < knots[j + 1])).astype(_F32)
             for j in range(KNOTS - 1)]
    for k in range(1, SPLINE_ORDER + 1):                         # Cox-de Boor recursion
        basis = [
            (y - knots[j]) / (knots[j + k] - knots[j]) * basis[j]
            + (knots[j + k + 1] - y) / (knots[j + k + 1] - knots[j + 1]) * basis[j + 1]
            for j in range(KNOTS - 1 - k)
        ]
    # inputs outside the [-1, 1] grid range get zero bases, matching efficient-KAN.
    ws = kans_ref[...]                                           # (N_BASIS*D, D)
    for c in range(N_BASIS):
        out = out + jnp.dot(basis[c], ws[c * D_MODEL:(c + 1) * D_MODEL, :],
                            preferred_element_type=_F32)

    o_ref[0] = out[:SEQ_LEN, :]                                  # drop padded rows


def _combine_kernel(res_ref, w_ref, x_ref, o_ref):
    acc = x_ref[...]
    for kk in range(TOP_K):
        acc = acc + res_ref[kk] * w_ref[kk]
    o_ref[...] = acc


# ------------------------------ parameter setup -------------------------------
def init_params(key):
    keys = iter(jax.random.split(key, 64))
    nk = lambda: next(keys)

    def nrm(shape, scale=0.05):
        return np.asarray(scale * jax.random.normal(nk(), shape, dtype=_F32))

    n, CC, SC, D, T = C_OUT, CONV_CHANNEL, SKIP_CHANNEL, D_MODEL, SEQ_LEN
    p = {}

    # --- Attention_Block (QKV concatenated into one matmul) ---
    p["att"] = {
        "wqkv": jnp.asarray(nrm((D, 3 * D))), "bqkv": jnp.zeros((1, 3 * D), _F32),
        "wo": jnp.asarray(nrm((D, D))),       "bo": jnp.zeros((1, D), _F32),
        "w1": jnp.asarray(nrm((D, D_FF))),    "b1": jnp.zeros((1, D_FF), _F32),
        "w2": jnp.asarray(nrm((D_FF, D))),    "b2": jnp.zeros((1, D), _F32),
        "ln1_g": jnp.ones((1, D), _F32), "ln1_b": jnp.zeros((1, D), _F32),
        "ln2_g": jnp.ones((1, D), _F32), "ln2_b": jnp.zeros((1, D), _F32),
    }
    p["norm_g"] = jnp.ones((1, D), _F32)
    p["norm_b"] = jnp.zeros((1, D), _F32)

    # --- k GraphBlocks, conv weights pre-unfolded into lane-dense matmul weights ---
    KH = D - n + 1                       # start_conv kernel height
    nv1, nv2, sw_unf, mlp_unf, endw, lin = [], [], [], [], [], []
    for _ in range(TOP_K):
        nv1.append(np.asarray(jax.random.normal(nk(), (n, NODE_DIM), dtype=_F32)))
        nv2.append(np.asarray(jax.random.normal(nk(), (NODE_DIM, n), dtype=_F32)))
        # start_conv = Conv2d(1, CC, (KH, 1)) -> (D, n*CC) unfolded matrix (node-major cols)
        start_w = nrm((CC, KH))
        wfull = np.zeros((D, n * CC), np.float32)
        for node in range(n):
            for kk in range(KH):
                wfull[node + kk, node * CC:(node + 1) * CC] = start_w[:, kk]
        sw_unf.append(wfull)
        # mixprop 1x1 conv (gdep+1)*CC -> SC, unfolded per node: (3*n*CC, n*SC)
        mlp_w = nrm(((GCN_DEPTH + 1) * CC, SC))
        w_unf = np.zeros(((GCN_DEPTH + 1) * n * CC, n * SC), np.float32)
        for l in range(GCN_DEPTH + 1):
            for node in range(n):
                w_unf[l * n * CC + node * CC:l * n * CC + (node + 1) * CC,
                      node * SC:(node + 1) * SC] = mlp_w[l * CC:(l + 1) * CC, :]
        mlp_unf.append(w_unf)
        # end_conv = Conv2d(SC, T, (1, T)) stored pre-transposed: (T_out, T*SC), (t,s)-ordered
        endw.append(nrm((T, T * SC)))
        lin.append(nrm((n, D)))
    p["nodevec1"] = jnp.asarray(np.stack(nv1))
    p["nodevec2"] = jnp.asarray(np.stack(nv2))
    p["start_w_unf"] = jnp.asarray(np.stack(sw_unf))
    p["start_b_unf"] = jnp.zeros((TOP_K, 1, n * CC), _F32)
    p["mlp_w_unf"] = jnp.asarray(np.stack(mlp_unf))
    p["mlp_b_unf"] = jnp.zeros((TOP_K, 1, n * SC), _F32)
    p["end_w_t"] = jnp.asarray(np.stack(endw))
    p["end_b"] = jnp.zeros((TOP_K, T, 1), _F32)
    p["lin_w"] = jnp.asarray(np.stack(lin))
    p["lin_b"] = jnp.zeros((TOP_K, 1, D), _F32)
    p["gln_g"] = jnp.ones((TOP_K, 1, D), _F32)
    p["gln_b"] = jnp.zeros((TOP_K, 1, D), _F32)

    # --- KANLinear (efficient-KAN parameterization, no bias) ---
    h = 2.0 / GRID_SIZE
    grid1d = np.arange(-SPLINE_ORDER, GRID_SIZE + SPLINE_ORDER + 1,
                       dtype=np.float32) * h - 1.0
    p["kan_grid_t"] = jnp.asarray(np.broadcast_to(grid1d[:, None], (KNOTS, D)).copy())
    p["kan_base_w"] = jnp.asarray(nrm((D, D)))                       # (in, out)
    spline_w = nrm((D, D, N_BASIS), 0.1)                             # (out, in, coeff)
    spline_scaler = 1.0 + nrm((D, D), 0.1)                           # (out, in)
    scaled = spline_w * spline_scaler[..., None]
    p["kan_spline_w"] = jnp.asarray(
        np.transpose(scaled, (2, 1, 0)).reshape(N_BASIS * D, D))     # rows = (coeff, in)
    return p


# ------------------------------ ScaleGraphBlock --------------------------------
def _forward(params, x):
    B, T, N = x.shape
    nCC = C_OUT * CONV_CHANNEL
    nSC = C_OUT * SKIP_CHANNEL

    # --- FFT_for_Period, fully traced (no device->host sync) ---
    xfft = jnp.fft.rfft(x, axis=1)
    amp = jnp.abs(xfft)
    freq = amp.mean(axis=0).mean(axis=-1)
    freq = freq.at[0].set(0.0)
    _, top = jax.lax.top_k(freq, TOP_K)
    # TODO(synk): guard against index 0 (all-zero spectrum); reference divides by zero there.
    top = jnp.maximum(top, 1)
    periods = (T // top).astype(jnp.int32)                               # (K,)
    lengths = (((T + periods - 1) // periods) * periods).astype(jnp.int32)
    sw = amp.mean(axis=-1)[:, top]                                       # (B, K)
    w = jax.nn.softmax(sw, axis=1)
    wfull = jnp.broadcast_to(w.T[:, :, None], (TOP_K, B, T)).reshape(TOP_K, B * T, 1)

    # --- adaptive adjacency -> node-propagation matrix kron(A^T, I_CC) (param-only glue) ---
    def prop_mat(nv1, nv2):
        adp = jax.nn.softmax(jax.nn.relu(nv1 @ nv2), axis=1)
        a = adp + jnp.eye(C_OUT, dtype=_F32)
        a = a / jnp.sum(a, axis=1, keepdims=True)
        return jnp.kron(a.T, jnp.eye(CONV_CHANNEL, dtype=_F32))
    prop = jax.vmap(prop_mat)(params["nodevec1"], params["nodevec2"])    # (K, n*CC, n*CC)

    xflat = x.reshape(B * T, N).astype(_F32)

    # --- Pallas 1: GraphBlock front, one launch for all TOP_K scales ---
    y = pl.pallas_call(
        _graph_front_kernel,
        grid=(TOP_K,),
        in_specs=[
            pl.BlockSpec((B * T, N), lambda i: (0, 0)),
            pl.BlockSpec((1, N, nCC), lambda i: (i, 0, 0)),
            pl.BlockSpec((1, 1, nCC), lambda i: (i, 0, 0)),
            pl.BlockSpec((1, nCC, nCC), lambda i: (i, 0, 0)),
            pl.BlockSpec((1, (GCN_DEPTH + 1) * nCC, nSC), lambda i: (i, 0, 0)),
            pl.BlockSpec((1, 1, nSC), lambda i: (i, 0, 0)),
        ],
        out_specs=pl.BlockSpec((1, B * T, nSC), lambda i: (i, 0, 0)),
        out_shape=jax.ShapeDtypeStruct((TOP_K, B * T, nSC), _F32),
        compiler_params=pltpu.CompilerParams(dimension_semantics=("parallel",)),
    )(xflat, params["start_w_unf"], params["start_b_unf"], prop,
      params["mlp_w_unf"], params["mlp_b_unf"])

    # layout glue so end_conv is a plain lane-dense matmul in the next kernel:
    # (K, B*T, n*SC) -> (K, B*T*SC, n), rows ordered (b, t, s)
    yt = (y.reshape(TOP_K, B, T, C_OUT, SKIP_CHANNEL)
           .transpose(0, 1, 2, 4, 3)
           .reshape(TOP_K, B * T * SKIP_CHANNEL, C_OUT))

    att = params["att"]

    # --- Pallas 2: fused GraphBlock tail + Attention + norm + gelu + KAN, grid (K, B) ---
    branch = pl.pallas_call(
        _branch_kernel,
        grid_spec=pltpu.PrefetchScalarGridSpec(
            num_scalar_prefetch=2,
            grid=(TOP_K, B),
            in_specs=[
                pl.BlockSpec((1, T * SKIP_CHANNEL, C_OUT), lambda i, b, *_: (i, b, 0)),
                pl.BlockSpec((T, N), lambda i, b, *_: (b, 0)),
                pl.BlockSpec((1, T, T * SKIP_CHANNEL), lambda i, b, *_: (i, 0, 0)),
                pl.BlockSpec((1, T, 1), lambda i, b, *_: (i, 0, 0)),
                pl.BlockSpec((1, C_OUT, N), lambda i, b, *_: (i, 0, 0)),
                pl.BlockSpec((1, 1, N), lambda i, b, *_: (i, 0, 0)),
                pl.BlockSpec((1, 1, N), lambda i, b, *_: (i, 0, 0)),
                pl.BlockSpec((1, 1, N), lambda i, b, *_: (i, 0, 0)),
                pl.BlockSpec((N, 3 * N), lambda i, b, *_: (0, 0)),
                pl.BlockSpec((1, 3 * N), lambda i, b, *_: (0, 0)),
                pl.BlockSpec((N, N), lambda i, b, *_: (0, 0)),
                pl.BlockSpec((1, N), lambda i, b, *_: (0, 0)),
                pl.BlockSpec((N, D_FF), lambda i, b, *_: (0, 0)),
                pl.BlockSpec((1, D_FF), lambda i, b, *_: (0, 0)),
                pl.BlockSpec((D_FF, N), lambda i, b, *_: (0, 0)),
                pl.BlockSpec((1, N), lambda i, b, *_: (0, 0)),
                pl.BlockSpec((1, N), lambda i, b, *_: (0, 0)),
                pl.BlockSpec((1, N), lambda i, b, *_: (0, 0)),
                pl.BlockSpec((1, N), lambda i, b, *_: (0, 0)),
                pl.BlockSpec((1, N), lambda i, b, *_: (0, 0)),
                pl.BlockSpec((1, N), lambda i, b, *_: (0, 0)),
                pl.BlockSpec((1, N), lambda i, b, *_: (0, 0)),
                pl.BlockSpec((N, N), lambda i, b, *_: (0, 0)),
                pl.BlockSpec((N_BASIS * N, N), lambda i, b, *_: (0, 0)),
                pl.BlockSpec((KNOTS, N), lambda i, b, *_: (0, 0)),
            ],
            out_specs=pl.BlockSpec((1, T, N), lambda i, b, *_: (i, b, 0)),
        ),
        out_shape=jax.ShapeDtypeStruct((TOP_K, B * T, N), _F32),
        compiler_params=pltpu.CompilerParams(
            dimension_semantics=("parallel", "parallel")),
    )(periods, lengths,
      yt, xflat,
      params["end_w_t"], params["end_b"], params["lin_w"], params["lin_b"],
      params["gln_g"], params["gln_b"],
      att["wqkv"], att["bqkv"], att["wo"], att["bo"],
      att["w1"], att["b1"], att["w2"], att["b2"],
      att["ln1_g"], att["ln1_b"], att["ln2_g"], att["ln2_b"],
      params["norm_g"], params["norm_b"],
      params["kan_base_w"], params["kan_spline_w"], params["kan_grid_t"])

    # --- Pallas 3: softmax-weighted combine over scales + residual ---
    out = pl.pallas_call(
        _combine_kernel,
        grid=(1,),
        in_specs=[pl.BlockSpec((TOP_K, B * T, N), lambda i: (0, 0, 0)),
                  pl.BlockSpec((TOP_K, B * T, 1), lambda i: (0, 0, 0)),
                  pl.BlockSpec((B * T, N), lambda i: (0, 0))],
        out_specs=pl.BlockSpec((B * T, N), lambda i: (0, 0)),
        out_shape=jax.ShapeDtypeStruct((B * T, N), _F32),
        compiler_params=pltpu.CompilerParams(dimension_semantics=("arbitrary",)),
    )(branch, wfull.astype(_F32), xflat)
    return out.reshape(B, T, N)


scale_graph_block = jax.jit(_forward)


# ----------------------------------- main --------------------------------------
if __name__ == "__main__":
    params = init_params(jax.random.PRNGKey(42))
    x = jax.random.normal(jax.random.PRNGKey(0), (2, SEQ_LEN, D_MODEL), dtype=_F32)
    out = scale_graph_block(params, x)
    out = jax.block_until_ready(out)
    assert out.shape == (2, SEQ_LEN, D_MODEL)
    assert bool(jnp.all(jnp.isfinite(out)))
    print("KERNEL_OK")
</pallas_src>

<mosaic_0001>
module attributes {stable_mosaic.version = 11 : i64} {
  func.func @_graph_front_kernel(%arg0: i32, %arg1: memref<32x32xf32, #tpu.memory_space<vmem>>, %arg2: memref<1x32x64xf32, #tpu.memory_space<vmem>>, %arg3: memref<1x1x64xf32, #tpu.memory_space<vmem>>, %arg4: memref<1x64x64xf32, #tpu.memory_space<vmem>>, %arg5: memref<1x192x64xf32, #tpu.memory_space<vmem>>, %arg6: memref<1x1x64xf32, #tpu.memory_space<vmem>>, %arg7: memref<1x32x64xf32, #tpu.memory_space<vmem>>) attributes {dimension_semantics = [#tpu.dimension_semantics<parallel>], iteration_bounds = array<i64: 2>, scalar_prefetch = 0 : i64, scratch_operands = 0 : i64, tpu.core_type = #tpu.core_type<tc>, window_params = [{pipeline_mode = #tpu.pipeline_mode<synchronous>, transform_indices = @transform_0, window_bounds = array<i64: 32, 32>}, {transform_indices = @transform_1, window_bounds = array<i64: 1, 32, 64>}, {transform_indices = @transform_2, window_bounds = array<i64: 1, 1, 64>}, {transform_indices = @transform_3, window_bounds = array<i64: 1, 64, 64>}, {transform_indices = @transform_4, window_bounds = array<i64: 1, 192, 64>}, {transform_indices = @transform_5, window_bounds = array<i64: 1, 1, 64>}, {transform_indices = @transform_6, window_bounds = array<i64: 1, 32, 64>}]} {
    %c0 = arith.constant 0 : index
    %c0_0 = arith.constant 0 : index
    %0 = vector.load %arg1[%c0, %c0_0] : memref<32x32xf32, #tpu.memory_space<vmem>>, vector<32x32xf32>
    %c0_1 = arith.constant 0 : index
    %c0_2 = arith.constant 0 : index
    %c0_3 = arith.constant 0 : index
    %1 = vector.load %arg2[%c0_1, %c0_2, %c0_3] : memref<1x32x64xf32, #tpu.memory_space<vmem>>, vector<1x32x64xf32>
    %2 = vector.shape_cast %1 : vector<1x32x64xf32> to vector<32x64xf32>
    %cst = arith.constant dense<0.000000e+00> : vector<32x64xf32>
    %3 = tpu.matmul %0, %2, %cst {dimension_numbers = #tpu.dot_dimension_numbers<[1], [0], [0], [1], [0, 0, 1, 1], [], []>} : vector<32x32xf32>, vector<32x64xf32>, vector<32x64xf32> -> vector<32x64xf32>
    %c0_4 = arith.constant 0 : index
    %c0_5 = arith.constant 0 : index
    %c0_6 = arith.constant 0 : index
    %4 = vector.load %arg3[%c0_4, %c0_5, %c0_6] : memref<1x1x64xf32, #tpu.memory_space<vmem>>, vector<1x1x64xf32>
    %5 = vector.shape_cast %4 : vector<1x1x64xf32> to vector<1x64xf32>
    %6 = vector.broadcast %5 : vector<1x64xf32> to vector<32x64xf32>
    %7 = arith.addf %3, %6 : vector<32x64xf32>
    %c0_7 = arith.constant 0 : index
    %c0_8 = arith.constant 0 : index
    %c0_9 = arith.constant 0 : index
    %8 = vector.load %arg4[%c0_7, %c0_8, %c0_9] : memref<1x64x64xf32, #tpu.memory_space<vmem>>, vector<1x64x64xf32>
    %9 = vector.shape_cast %8 : vector<1x64x64xf32> to vector<64x64xf32>
    %cst_10 = arith.constant 3.000000e-01 : f32
    %10 = vector.broadcast %cst_10 : f32 to vector<32x64xf32>
    %11 = arith.mulf %10, %7 : vector<32x64xf32>
    %cst_11 = arith.constant dense<0.000000e+00> : vector<32x64xf32>
    %12 = tpu.matmul %7, %9, %cst_11 {dimension_numbers = #tpu.dot_dimension_numbers<[1], [0], [0], [1], [0, 0, 1, 1], [], []>} : vector<32x64xf32>, vector<64x64xf32>, vector<32x64xf32> -> vector<32x64xf32>
    %cst_12 = arith.constant 0.699999988 : f32
    %13 = vector.broadcast %cst_12 : f32 to vector<32x64xf32>
    %14 = arith.mulf %13, %12 : vector<32x64xf32>
    %15 = arith.addf %11, %14 : vector<32x64xf32>
    %cst_13 = arith.constant 3.000000e-01 : f32
    %16 = vector.broadcast %cst_13 : f32 to vector<32x64xf32>
    %17 = arith.mulf %16, %7 : vector<32x64xf32>
    %cst_14 = arith.constant dense<0.000000e+00> : vector<32x64xf32>
    %18 = tpu.matmul %15, %9, %cst_14 {dimension_numbers = #tpu.dot_dimension_numbers<[1], [0], [0], [1], [0, 0, 1, 1], [], []>} : vector<32x64xf32>, vector<64x64xf32>, vector<32x64xf32> -> vector<32x64xf32>
    %cst_15 = arith.constant 0.699999988 : f32
    %19 = vector.broadcast %cst_15 : f32 to vector<32x64xf32>
    %20 = arith.mulf %19, %18 : vector<32x64xf32>
    %21 = arith.addf %17, %20 : vector<32x64xf32>
    %c0_16 = arith.constant 0 : index
    %c0_17 = arith.constant 0 : index
    %c0_18 = arith.constant 0 : index
    %22 = vector.load %arg5[%c0_16, %c0_17, %c0_18] : memref<1x192x64xf32, #tpu.memory_space<vmem>>, vector<1x192x64xf32>
    %23 = vector.shape_cast %22 : vector<1x192x64xf32> to vector<192x64xf32>
    %c0_19 = arith.constant 0 : index
    %c0_20 = arith.constant 0 : index
    %c0_21 = arith.constant 0 : index
    %24 = vector.load %arg6[%c0_19, %c0_20, %c0_21] : memref<1x1x64xf32, #tpu.memory_space<vmem>>, vector<1x1x64xf32>
    %25 = vector.shape_cast %24 : vector<1x1x64xf32> to vector<1x64xf32>
    %26 = vector.extract_strided_slice %23 {offsets = [0, 0], sizes = [64, 64], strides = [1, 1]} : vector<192x64xf32> to vector<64x64xf32>
    %cst_22 = arith.constant dense<0.000000e+00> : vector<32x64xf32>
    %27 = tpu.matmul %7, %26, %cst_22 {dimension_numbers = #tpu.dot_dimension_numbers<[1], [0], [0], [1], [0, 0, 1, 1], [], []>} : vector<32x64xf32>, vector<64x64xf32>, vector<32x64xf32> -> vector<32x64xf32>
    %28 = vector.broadcast %25 : vector<1x64xf32> to vector<32x64xf32>
    %29 = arith.addf %28, %27 : vector<32x64xf32>
    %30 = vector.extract_strided_slice %23 {offsets = [64, 0], sizes = [64, 64], strides = [1, 1]} : vector<192x64xf32> to vector<64x64xf32>
    %cst_23 = arith.constant dense<0.000000e+00> : vector<32x64xf32>
    %31 = tpu.matmul %15, %30, %cst_23 {dimension_numbers = #tpu.dot_dimension_numbers<[1], [0], [0], [1], [0, 0, 1, 1], [], []>} : vector<32x64xf32>, vector<64x64xf32>, vector<32x64xf32> -> vector<32x64xf32>
    %32 = arith.addf %29, %31 : vector<32x64xf32>
    %33 = vector.extract_strided_slice %23 {offsets = [128, 0], sizes = [64, 64], strides = [1, 1]} : vector<192x64xf32> to vector<64x64xf32>
    %cst_24 = arith.constant dense<0.000000e+00> : vector<32x64xf32>
    %34 = tpu.matmul %21, %33, %cst_24 {dimension_numbers = #tpu.dot_dimension_numbers<[1], [0], [0], [1], [0, 0, 1, 1], [], []>} : vector<32x64xf32>, vector<64x64xf32>, vector<32x64xf32> -> vector<32x64xf32>
    %35 = arith.addf %32, %34 : vector<32x64xf32>
    %cst_25 = arith.constant 5.000000e-01 : f32
    %36 = vector.broadcast %cst_25 : f32 to vector<32x64xf32>
    %37 = arith.mulf %36, %35 : vector<32x64xf32>
    %cst_26 = arith.constant 0.707106769 : f32
    %38 = vector.broadcast %cst_26 : f32 to vector<32x64xf32>
    %39 = arith.mulf %35, %38 : vector<32x64xf32>
    %40 = math.erf %39 : vector<32x64xf32>
    %cst_27 = arith.constant 1.000000e+00 : f32
    %41 = vector.broadcast %cst_27 : f32 to vector<32x64xf32>
    %42 = arith.addf %41, %40 : vector<32x64xf32>
    %43 = arith.mulf %37, %42 : vector<32x64xf32>
    %c0_28 = arith.constant 0 : index
    %c0_29 = arith.constant 0 : index
    %c0_30 = arith.constant 0 : index
    %44 = vector.load %arg7[%c0_28, %c0_29, %c0_30] : memref<1x32x64xf32, #tpu.memory_space<vmem>>, vector<1x32x64xf32>
    %45 = vector.shape_cast %44 : vector<1x32x64xf32> to vector<32x64xf32>
    %46 = vector.shape_cast %43 : vector<32x64xf32> to vector<1x32x64xf32>
    tpu.vector_store %arg7[%c0_28, %c0_29, %c0_30], %46 {strides = array<i32>} : memref<1x32x64xf32, #tpu.memory_space<vmem>>, vector<1x32x64xf32>,
    return
  }
  func.func @transform_0(%arg0: i32) -> (i32, i32) {
    %c0_i32 = arith.constant 0 : i32
    %c0_i32_0 = arith.constant 0 : i32
    %c0_i32_1 = arith.constant 0 : i32
    return %c0_i32, %c0_i32_0 : i32, i32
  }
  func.func @transform_1(%arg0: i32) -> (i32, i32, i32) {
    %c0_i32 = arith.constant 0 : i32
    %c0_i32_0 = arith.constant 0 : i32
    %c0_i32_1 = arith.constant 0 : i32
    return %arg0, %c0_i32, %c0_i32_0 : i32, i32, i32
  }
  func.func @transform_2(%arg0: i32) -> (i32, i32, i32) {
    %c0_i32 = arith.constant 0 : i32
    %c0_i32_0 = arith.constant 0 : i32
    %c0_i32_1 = arith.constant 0 : i32
    return %arg0, %c0_i32, %c0_i32_0 : i32, i32, i32
  }
  func.func @transform_3(%arg0: i32) -> (i32, i32, i32) {
    %c0_i32 = arith.constant 0 : i32
    %c0_i32_0 = arith.constant 0 : i32
    %c0_i32_1 = arith.constant 0 : i32
    return %arg0, %c0_i32, %c0_i32_0 : i32, i32, i32
  }
  func.func @transform_4(%arg0: i32) -> (i32, i32, i32) {
    %c0_i32 = arith.constant 0 : i32
    %c0_i32_0 = arith.constant 0 : i32
    %c0_i32_1 = arith.constant 0 : i32
    return %arg0, %c0_i32, %c0_i32_0 : i32, i32, i32
  }
  func.func @transform_5(%arg0: i32) -> (i32, i32, i32) {
    %c0_i32 = arith.constant 0 : i32
    %c0_i32_0 = arith.constant 0 : i32
    %c0_i32_1 = arith.constant 0 : i32
    return %arg0, %c0_i32, %c0_i32_0 : i32, i32, i32
  }
  func.func @transform_6(%arg0: i32) -> (i32, i32, i32) {
    %c0_i32 = arith.constant 0 : i32
    %c0_i32_0 = arith.constant 0 : i32
    %c0_i32_1 = arith.constant 0 : i32
    return %arg0, %c0_i32, %c0_i32_0 : i32, i32, i32
  }
}

module attributes {stable_mosaic.version = 11 : i64} {
  func.func @_branch_kernel(%arg0: i32, %arg1: i32, %arg2: memref<2xi32, #tpu.memory_space<smem>>, %arg3: memref<2xi32, #tpu.memory_space<smem>>, %arg4: memref<1x128x8xf32, #tpu.memory_space<vmem>>, %arg5: memref<16x32xf32, #tpu.memory_space<vmem>>, %arg6: memref<1x16x128xf32, #tpu.memory_space<vmem>>, %arg7: memref<1x16x1xf32, #tpu.memory_space<vmem>>, %arg8: memref<1x8x32xf32, #tpu.memory_space<vmem>>, %arg9: memref<1x1x32xf32, #tpu.memory_space<vmem>>, %arg10: memref<1x1x32xf32, #tpu.memory_space<vmem>>, %arg11: memref<1x1x32xf32, #tpu.memory_space<vmem>>, %arg12: memref<32x96xf32, #tpu.memory_space<vmem>>, %arg13: memref<1x96xf32, #tpu.memory_space<vmem>>, %arg14: memref<32x32xf32, #tpu.memory_space<vmem>>, %arg15: memref<1x32xf32, #tpu.memory_space<vmem>>, %arg16: memref<32x64xf32, #tpu.memory_space<vmem>>, %arg17: memref<1x64xf32, #tpu.memory_space<vmem>>, %arg18: memref<64x32xf32, #tpu.memory_space<vmem>>, %arg19: memref<1x32xf32, #tpu.memory_space<vmem>>, %arg20: memref<1x32xf32, #tpu.memory_space<vmem>>, %arg21: memref<1x32xf32, #tpu.memory_space<vmem>>, %arg22: memref<1x32xf32, #tpu.memory_space<vmem>>, %arg23: memref<1x32xf32, #tpu.memory_space<vmem>>, %arg24: memref<1x32xf32, #tpu.memory_space<vmem>>, %arg25: memref<1x32xf32, #tpu.memory_space<vmem>>, %arg26: memref<32x32xf32, #tpu.memory_space<vmem>>, %arg27: memref<256x32xf32, #tpu.memory_space<vmem>>, %arg28: memref<12x32xf32, #tpu.memory_space<vmem>>, %arg29: memref<1x16x32xf32, #tpu.memory_space<vmem>>) attributes {dimension_semantics = [#tpu.dimension_semantics<parallel>, #tpu.dimension_semantics<parallel>], iteration_bounds = array<i64: 2, 2>, scalar_prefetch = 2 : i64, scratch_operands = 0 : i64, tpu.core_type = #tpu.core_type<tc>, window_params = [{transform_indices = @transform_0, window_bounds = array<i64: 1, 128, 8>}, {transform_indices = @transform_1, window_bounds = array<i64: 16, 32>}, {transform_indices = @transform_2, window_bounds = array<i64: 1, 16, 128>}, {transform_indices = @transform_3, window_bounds = array<i64: 1, 16, 1>}, {transform_indices = @transform_4, window_bounds = array<i64: 1, 8, 32>}, {transform_indices = @transform_5, window_bounds = array<i64: 1, 1, 32>}, {transform_indices = @transform_6, window_bounds = array<i64: 1, 1, 32>}, {transform_indices = @transform_7, window_bounds = array<i64: 1, 1, 32>}, {pipeline_mode = #tpu.pipeline_mode<synchronous>, transform_indices = @transform_8, window_bounds = array<i64: 32, 96>}, {pipeline_mode = #tpu.pipeline_mode<synchronous>, transform_indices = @transform_9, window_bounds = array<i64: 1, 96>}, {pipeline_mode = #tpu.pipeline_mode<synchronous>, transform_indices = @transform_10, window_bounds = array<i64: 32, 32>}, {pipeline_mode = #tpu.pipeline_mode<synchronous>, transform_indices = @transform_11, window_bounds = array<i64: 1, 32>}, {pipeline_mode = #tpu.pipeline_mode<synchronous>, transform_indices = @transform_12, window_bounds = array<i64: 32, 64>}, {pipeline_mode = #tpu.pipeline_mode<synchronous>, transform_indices = @transform_13, window_bounds = array<i64: 1, 64>}, {pipeline_mode = #tpu.pipeline_mode<synchronous>, transform_indices = @transform_14, window_bounds = array<i64: 64, 32>}, {pipeline_mode = #tpu.pipeline_mode<synchronous>, transform_indices = @transform_15, window_bounds = array<i64: 1, 32>}, {pipeline_mode = #tpu.pipeline_mode<synchronous>, transform_indices = @transform_16, window_bounds = array<i64: 1, 32>}, {pipeline_mode = #tpu.pipeline_mode<synchronous>, transform_indices = @transform_17, window_bounds = array<i64: 1, 32>}, {pipeline_mode = #tpu.pipeline_mode<synchronous>, transform_indices = @transform_18, window_bounds = array<i64: 1, 32>}, {pipeline_mode = #tpu.pipeline_mode<synchronous>, transform_indices = @transform_19, window_bounds = array<i64: 1, 32>}, {pipeline_mode = #tpu.pipeline_mode<synchronous>, transform_indices = @transform_20, window_bounds = array<i64: 1, 32>}, {pipeline_mode = #tpu.pipeline_mode<synchronous>, transform_indices = @transform_21, window_bounds = array<i64: 1, 32>}, {pipeline_mode = #tpu.pipeline_mode<synchronous>, transform_indices = @transform_22, window_bounds = array<i64: 32, 32>}, {pipeline_mode = #tpu.pipeline_mode<synchronous>, transform_indices = @transform_23, window_bounds = array<i64: 256, 32>}, {pipeline_mode = #tpu.pipeline_mode<synchronous>, transform_indices = @transform_24, window_bounds = array<i64: 12, 32>}, {transform_indices = @transform_25, window_bounds = array<i64: 1, 16, 32>}]} {
    %0 = arith.index_cast %arg0 : i32 to index
    %1 = memref.load %arg3[%0] : memref<2xi32, #tpu.memory_space<smem>>
    %2 = arith.index_cast %arg0 : i32 to index
    %3 = memref.load %arg2[%2] : memref<2xi32, #tpu.memory_space<smem>>
    %4 = arith.sitofp %3 : i32 to f32
    %c0 = arith.constant 0 : index
    %c0_0 = arith.constant 0 : index
    %5 = vector.load %arg5[%c0, %c0_0] : memref<16x32xf32, #tpu.memory_space<vmem>>, vector<16x32xf32>
    %c0_1 = arith.constant 0 : index
    %c0_2 = arith.constant 0 : index
    %c0_3 = arith.constant 0 : index
    %6 = vector.load %arg6[%c0_1, %c0_2, %c0_3] : memref<1x16x128xf32, #tpu.memory_space<vmem>>, vector<1x16x128xf32>
    %7 = vector.shape_cast %6 : vector<1x16x128xf32> to vector<16x128xf32>
    %c0_4 = arith.constant 0 : index
    %c0_5 = arith.constant 0 : index
    %c0_6 = arith.constant 0 : index
    %8 = vector.load %arg4[%c0_4, %c0_5, %c0_6] : memref<1x128x8xf32, #tpu.memory_space<vmem>>, vector<1x128x8xf32>
    %9 = vector.shape_cast %8 : vector<1x128x8xf32> to vector<128x8xf32>
    %cst = arith.constant dense<0.000000e+00> : vector<16x8xf32>
    %10 = tpu.matmul %7, %9, %cst {dimension_numbers = #tpu.dot_dimension_numbers<[1], [0], [0], [1], [0, 0, 1, 1], [], []>} : vector<16x128xf32>, vector<128x8xf32>, vector<16x8xf32> -> vector<16x8xf32>
    %c0_7 = arith.constant 0 : index
    %c0_8 = arith.constant 0 : index
    %c0_9 = arith.constant 0 : index
    %11 = vector.load %arg7[%c0_7, %c0_8, %c0_9] : memref<1x16x1xf32, #tpu.memory_space<vmem>>, vector<1x16x1xf32>
    %12 = vector.shape_cast %11 : vector<1x16x1xf32> to vector<16x1xf32>
    %13 = vector.broadcast %12 : vector<16x1xf32> to vector<16x8xf32>
    %14 = arith.addf %10, %13 : vector<16x8xf32>
    %c0_10 = arith.constant 0 : index
    %c0_11 = arith.constant 0 : index
    %c0_12 = arith.constant 0 : index
    %15 = vector.load %arg8[%c0_10, %c0_11, %c0_12] : memref<1x8x32xf32, #tpu.memory_space<vmem>>, vector<1x8x32xf32>
    %16 = vector.shape_cast %15 : vector<1x8x32xf32> to vector<8x32xf32>
    %cst_13 = arith.constant dense<0.000000e+00> : vector<16x32xf32>
    %17 = tpu.matmul %14, %16, %cst_13 {dimension_numbers = #tpu.dot_dimension_numbers<[1], [0], [0], [1], [0, 0, 1, 1], [], []>} : vector<16x8xf32>, vector<8x32xf32>, vector<16x32xf32> -> vector<16x32xf32>
    %c0_14 = arith.constant 0 : index
    %c0_15 = arith.constant 0 : index
    %c0_16 = arith.constant 0 : index
    %18 = vector.load %arg9[%c0_14, %c0_15, %c0_16] : memref<1x1x32xf32, #tpu.memory_space<vmem>>, vector<1x1x32xf32>
    %19 = vector.shape_cast %18 : vector<1x1x32xf32> to vector<1x32xf32>
    %20 = vector.broadcast %19 : vector<1x32xf32> to vector<16x32xf32>
    %21 = arith.addf %17, %20 : vector<16x32xf32>
    %22 = arith.addf %5, %21 : vector<16x32xf32>
    %c0_17 = arith.constant 0 : index
    %c0_18 = arith.constant 0 : index
    %c0_19 = arith.constant 0 : index
    %23 = vector.load %arg10[%c0_17, %c0_18, %c0_19] : memref<1x1x32xf32, #tpu.memory_space<vmem>>, vector<1x1x32xf32>
    %24 = vector.shape_cast %23 : vector<1x1x32xf32> to vector<1x32xf32>
    %c0_20 = arith.constant 0 : index
    %c0_21 = arith.constant 0 : index
    %c0_22 = arith.constant 0 : index
    %25 = vector.load %arg11[%c0_20, %c0_21, %c0_22] : memref<1x1x32xf32, #tpu.memory_space<vmem>>, vector<1x1x32xf32>
    %26 = vector.shape_cast %25 : vector<1x1x32xf32> to vector<1x32xf32>
    %cst_23 = arith.constant dense<0.000000e+00> : vector<16xf32>
    %27 = vector.multi_reduction <add>, %22, %cst_23 [1] : vector<16x32xf32> to vector<16xf32>
    %28 = vector.shape_cast %27 : vector<16xf32> to vector<16x1xf32>
    %cst_24 = arith.constant 3.200000e+01 : f32
    %29 = vector.broadcast %cst_24 : f32 to vector<16x1xf32>
    %30 = arith.divf %28, %29 : vector<16x1xf32>
    %31 = vector.broadcast %30 : vector<16x1xf32> to vector<16x32xf32>
    %32 = arith.subf %22, %31 : vector<16x32xf32>
    %33 = arith.mulf %32, %32 : vector<16x32xf32>
    %cst_25 = arith.constant dense<0.000000e+00> : vector<16xf32>
    %34 = vector.multi_reduction <add>, %33, %cst_25 [1] : vector<16x32xf32> to vector<16xf32>
    %35 = vector.shape_cast %34 : vector<16xf32> to vector<16x1xf32>
    %cst_26 = arith.constant 3.200000e+01 : f32
    %36 = vector.broadcast %cst_26 : f32 to vector<16x1xf32>
    %37 = arith.divf %35, %36 : vector<16x1xf32>
    %38 = vector.broadcast %30 : vector<16x1xf32> to vector<16x32xf32>
    %39 = arith.subf %22, %38 : vector<16x32xf32>
    %cst_27 = arith.constant 9.99999974E-6 : f32
    %40 = vector.broadcast %cst_27 : f32 to vector<16x1xf32>
    %41 = arith.addf %37, %40 : vector<16x1xf32>
    %42 = math.rsqrt %41 : vector<16x1xf32>
    %43 = vector.broadcast %42 : vector<16x1xf32> to vector<16x32xf32>
    %44 = arith.mulf %39, %43 : vector<16x32xf32>
    %45 = vector.broadcast %24 : vector<1x32xf32> to vector<16x32xf32>
    %46 = arith.mulf %44, %45 : vector<16x32xf32>
    %47 = vector.broadcast %26 : vector<1x32xf32> to vector<16x32xf32>
    %48 = arith.addf %46, %47 : vector<16x32xf32>
    %49 = tpu.iota {dimensions = array<i32: 0>} : vector<20x16xi32>
    %50 = tpu.iota {dimensions = array<i32: 1>} : vector<20x16xi32>
    %51 = arith.cmpi eq, %49, %50 : vector<20x16xi32>
    %52 = arith.extui %51 : vector<20x16xi1> to vector<20x16xi32>
    %53 = arith.sitofp %52 : vector<20x16xi32> to vector<20x16xf32>
    %cst_28 = arith.constant dense<0.000000e+00> : vector<20x32xf32>
    %54 = tpu.matmul %53, %48, %cst_28 {dimension_numbers = #tpu.dot_dimension_numbers<[1], [0], [0], [1], [0, 0, 1, 1], [], []>} : vector<20x16xf32>, vector<16x32xf32>, vector<20x32xf32> -> vector<20x32xf32>
    %c0_29 = arith.constant 0 : index
    %c0_30 = arith.constant 0 : index
    %55 = vector.load %arg12[%c0_29, %c0_30] : memref<32x96xf32, #tpu.memory_space<vmem>>, vector<32x96xf32>
    %cst_31 = arith.constant dense<0.000000e+00> : vector<20x96xf32>
    %56 = tpu.matmul %54, %55, %cst_31 {dimension_numbers = #tpu.dot_dimension_numbers<[1], [0], [0], [1], [0, 0, 1, 1], [], []>} : vector<20x32xf32>, vector<32x96xf32>, vector<20x96xf32> -> vector<20x96xf32>
    %c0_32 = arith.constant 0 : index
    %c0_33 = arith.constant 0 : index
    %57 = vector.load %arg13[%c0_32, %c0_33] : memref<1x96xf32, #tpu.memory_space<vmem>>, vector<1x96xf32>
    %58 = vector.broadcast %57 : vector<1x96xf32> to vector<20x96xf32>
    %59 = arith.addf %56, %58 : vector<20x96xf32>
    %60 = tpu.iota {dimensions = array<i32: 0>} : vector<20x20xi32>
    %61 = tpu.iota {dimensions = array<i32: 1>} : vector<20x20xi32>
    %62 = arith.sitofp %60 : vector<20x20xi32> to vector<20x20xf32>
    %cst_34 = arith.constant 5.000000e-01 : f32
    %63 = vector.broadcast %cst_34 : f32 to vector<20x20xf32>
    %64 = arith.addf %62, %63 : vector<20x20xf32>
    %65 = vector.broadcast %4 : f32 to vector<20x20xf32>
    %66 = arith.divf %64, %65 : vector<20x20xf32>
    %67 = math.floor %66 : vector<20x20xf32>
    %68 = arith.sitofp %61 : vector<20x20xi32> to vector<20x20xf32>
    %cst_35 = arith.constant 5.000000e-01 : f32
    %69 = vector.broadcast %cst_35 : f32 to vector<20x20xf32>
    %70 = arith.addf %68, %69 : vector<20x20xf32>
    %71 = vector.broadcast %4 : f32 to vector<20x20xf32>
    %72 = arith.divf %70, %71 : vector<20x20xf32>
    %73 = math.floor %72 : vector<20x20xf32>
    %74 = arith.cmpf oeq, %67, %73 : vector<20x20xf32>
    %75 = vector.broadcast %1 : i32 to vector<20x20xi32>
    %76 = arith.cmpi slt, %61, %75 : vector<20x20xi32>
    %77 = arith.andi %74, %76 : vector<20x20xi1>
    %c0_36 = arith.constant 0 : index
    %c0_37 = arith.constant 0 : index
    %78 = vector.load %arg14[%c0_36, %c0_37] : memref<32x32xf32, #tpu.memory_space<vmem>>, vector<32x32xf32>
    %c0_38 = arith.constant 0 : index
    %c0_39 = arith.constant 0 : index
    %79 = vector.load %arg15[%c0_38, %c0_39] : memref<1x32xf32, #tpu.memory_space<vmem>>, vector<1x32xf32>
    %80 = vector.extract_strided_slice %59 {offsets = [0, 0], sizes = [20, 8], strides = [1, 1]} : vector<20x96xf32> to vector<20x8xf32>
    %81 = vector.extract_strided_slice %59 {offsets = [0, 32], sizes = [20, 8], strides = [1, 1]} : vector<20x96xf32> to vector<20x8xf32>
    %82 = vector.extract_strided_slice %59 {offsets = [0, 64], sizes = [20, 8], strides = [1, 1]} : vector<20x96xf32> to vector<20x8xf32>
    %83 = tpu.transpose %81, [1, 0] : vector<20x8xf32> -> vector<8x20xf32>
    %cst_40 = arith.constant dense<0.000000e+00> : vector<20x20xf32>
    %84 = tpu.matmul %80, %83, %cst_40 {dimension_numbers = #tpu.dot_dimension_numbers<[1], [0], [0], [1], [0, 0, 1, 1], [], []>} : vector<20x8xf32>, vector<8x20xf32>, vector<20x20xf32> -> vector<20x20xf32>
    %cst_41 = arith.constant 0.353553385 : f32
    %85 = vector.broadcast %cst_41 : f32 to vector<20x20xf32>
    %86 = arith.mulf %84, %85 : vector<20x20xf32>
    %cst_42 = arith.constant -1.000000e+30 : f32
    %87 = vector.broadcast %cst_42 : f32 to vector<20x20xf32>
    %88 = arith.select %77, %86, %87 : vector<20x20xi1>, vector<20x20xf32>
    %cst_43 = arith.constant dense<0xFF800000> : vector<20xf32>
    %89 = vector.multi_reduction <maximumf>, %88, %cst_43 [1] : vector<20x20xf32> to vector<20xf32>
    %90 = vector.shape_cast %89 : vector<20xf32> to vector<20x1xf32>
    %91 = vector.broadcast %90 : vector<20x1xf32> to vector<20x20xf32>
    %92 = arith.subf %88, %91 : vector<20x20xf32>
    %93 = math.exp %92 : vector<20x20xf32>
    %cst_44 = arith.constant dense<0.000000e+00> : vector<20xf32>
    %94 = vector.multi_reduction <add>, %93, %cst_44 [1] : vector<20x20xf32> to vector<20xf32>
    %95 = vector.shape_cast %94 : vector<20xf32> to vector<20x1xf32>
    %96 = vector.broadcast %95 : vector<20x1xf32> to vector<20x20xf32>
    %97 = arith.divf %93, %96 : vector<20x20xf32>
    %cst_45 = arith.constant dense<0.000000e+00> : vector<20x8xf32>
    %98 = tpu.matmul %97, %82, %cst_45 {dimension_numbers = #tpu.dot_dimension_numbers<[1], [0], [0], [1], [0, 0, 1, 1], [], []>} : vector<20x20xf32>, vector<20x8xf32>, vector<20x8xf32> -> vector<20x8xf32>
    %99 = vector.extract_strided_slice %78 {offsets = [0, 0], sizes = [8, 32], strides = [1, 1]} : vector<32x32xf32> to vector<8x32xf32>
    %cst_46 = arith.constant dense<0.000000e+00> : vector<20x32xf32>
    %100 = tpu.matmul %98, %99, %cst_46 {dimension_numbers = #tpu.dot_dimension_numbers<[1], [0], [0], [1], [0, 0, 1, 1], [], []>} : vector<20x8xf32>, vector<8x32xf32>, vector<20x32xf32> -> vector<20x32xf32>
    %101 = vector.broadcast %79 : vector<1x32xf32> to vector<20x32xf32>
    %102 = arith.addf %101, %100 : vector<20x32xf32>
    %103 = vector.extract_strided_slice %59 {offsets = [0, 8], sizes = [20, 8], strides = [1, 1]} : vector<20x96xf32> to vector<20x8xf32>
    %104 = vector.extract_strided_slice %59 {offsets = [0, 40], sizes = [20, 8], strides = [1, 1]} : vector<20x96xf32> to vector<20x8xf32>
    %105 = vector.extract_strided_slice %59 {offsets = [0, 72], sizes = [20, 8], strides = [1, 1]} : vector<20x96xf32> to vector<20x8xf32>
    %106 = tpu.transpose %104, [1, 0] : vector<20x8xf32> -> vector<8x20xf32>
    %cst_47 = arith.constant dense<0.000000e+00> : vector<20x20xf32>
    %107 = tpu.matmul %103, %106, %cst_47 {dimension_numbers = #tpu.dot_dimension_numbers<[1], [0], [0], [1], [0, 0, 1, 1], [], []>} : vector<20x8xf32>, vector<8x20xf32>, vector<20x20xf32> -> vector<20x20xf32>
    %cst_48 = arith.constant 0.353553385 : f32
    %108 = vector.broadcast %cst_48 : f32 to vector<20x20xf32>
    %109 = arith.mulf %107, %108 : vector<20x20xf32>
    %cst_49 = arith.constant -1.000000e+30 : f32
    %110 = vector.broadcast %cst_49 : f32 to vector<20x20xf32>
    %111 = arith.select %77, %109, %110 : vector<20x20xi1>, vector<20x20xf32>
    %cst_50 = arith.constant dense<0xFF800000> : vector<20xf32>
    %112 = vector.multi_reduction <maximumf>, %111, %cst_50 [1] : vector<20x20xf32> to vector<20xf32>
    %113 = vector.shape_cast %112 : vector<20xf32> to vector<20x1xf32>
    %114 = vector.broadcast %113 : vector<20x1xf32> to vector<20x20xf32>
    %115 = arith.subf %111, %114 : vector<20x20xf32>
    %116 = math.exp %115 : vector<20x20xf32>
    %cst_51 = arith.constant dense<0.000000e+00> : vector<20xf32>
    %117 = vector.multi_reduction <add>, %116, %cst_51 [1] : vector<20x20xf32> to vector<20xf32>
    %118 = vector.shape_cast %117 : vector<20xf32> to vector<20x1xf32>
    %119 = vector.broadcast %118 : vector<20x1xf32> to vector<20x20xf32>
    %120 = arith.divf %116, %119 : vector<20x20xf32>
    %cst_52 = arith.constant dense<0.000000e+00> : vector<20x8xf32>
    %121 = tpu.matmul %120, %105, %cst_52 {dimension_numbers = #tpu.dot_dimension_numbers<[1], [0], [0], [1], [0, 0, 1, 1], [], []>} : vector<20x20xf32>, vector<20x8xf32>, vector<20x8xf32> -> vector<20x8xf32>
    %122 = vector.extract_strided_slice %78 {offsets = [8, 0], sizes = [8, 32], strides = [1, 1]} : vector<32x32xf32> to vector<8x32xf32>
    %cst_53 = arith.constant dense<0.000000e+00> : vector<20x32xf32>
    %123 = tpu.matmul %121, %122, %cst_53 {dimension_numbers = #tpu.dot_dimension_numbers<[1], [0], [0], [1], [0, 0, 1, 1], [], []>} : vector<20x8xf32>, vector<8x32xf32>, vector<20x32xf32> -> vector<20x32xf32>
    %124 = arith.addf %102, %123 : vector<20x32xf32>
    %125 = vector.extract_strided_slice %59 {offsets = [0, 16], sizes = [20, 8], strides = [1, 1]} : vector<20x96xf32> to vector<20x8xf32>
    %126 = vector.extract_strided_slice %59 {offsets = [0, 48], sizes = [20, 8], strides = [1, 1]} : vector<20x96xf32> to vector<20x8xf32>
    %127 = vector.extract_strided_slice %59 {offsets = [0, 80], sizes = [20, 8], strides = [1, 1]} : vector<20x96xf32> to vector<20x8xf32>
    %128 = tpu.transpose %126, [1, 0] : vector<20x8xf32> -> vector<8x20xf32>
    %cst_54 = arith.constant dense<0.000000e+00> : vector<20x20xf32>
    %129 = tpu.matmul %125, %128, %cst_54 {dimension_numbers = #tpu.dot_dimension_numbers<[1], [0], [0], [1], [0, 0, 1, 1], [], []>} : vector<20x8xf32>, vector<8x20xf32>, vector<20x20xf32> -> vector<20x20xf32>
    %cst_55 = arith.constant 0.353553385 : f32
    %130 = vector.broadcast %cst_55 : f32 to vector<20x20xf32>
    %131 = arith.mulf %129, %130 : vector<20x20xf32>
    %cst_56 = arith.constant -1.000000e+30 : f32
    %132 = vector.broadcast %cst_56 : f32 to vector<20x20xf32>
    %133 = arith.select %77, %131, %132 : vector<20x20xi1>, vector<20x20xf32>
    %cst_57 = arith.constant dense<0xFF800000> : vector<20xf32>
    %134 = vector.multi_reduction <maximumf>, %133, %cst_57 [1] : vector<20x20xf32> to vector<20xf32>
    %135 = vector.shape_cast %134 : vector<20xf32> to vector<20x1xf32>
    %136 = vector.broadcast %135 : vector<20x1xf32> to vector<20x20xf32>
    %137 = arith.subf %133, %136 : vector<20x20xf32>
    %138 = math.exp %137 : vector<20x20xf32>
    %cst_58 = arith.constant dense<0.000000e+00> : vector<20xf32>
    %139 = vector.multi_reduction <add>, %138, %cst_58 [1] : vector<20x20xf32> to vector<20xf32>
    %140 = vector.shape_cast %139 : vector<20xf32> to vector<20x1xf32>
    %141 = vector.broadcast %140 : vector<20x1xf32> to vector<20x20xf32>
    %142 = arith.divf %138, %141 : vector<20x20xf32>
    %cst_59 = arith.constant dense<0.000000e+00> : vector<20x8xf32>
    %143 = tpu.matmul %142, %127, %cst_59 {dimension_numbers = #tpu.dot_dimension_numbers<[1], [0], [0], [1], [0, 0, 1, 1], [], []>} : vector<20x20xf32>, vector<20x8xf32>, vector<20x8xf32> -> vector<20x8xf32>
    %144 = vector.extract_strided_slice %78 {offsets = [16, 0], sizes = [8, 32], strides = [1, 1]} : vector<32x32xf32> to vector<8x32xf32>
    %cst_60 = arith.constant dense<0.000000e+00> : vector<20x32xf32>
    %145 = tpu.matmul %143, %144, %cst_60 {dimension_numbers = #tpu.dot_dimension_numbers<[1], [0], [0], [1], [0, 0, 1, 1], [], []>} : vector<20x8xf32>, vector<8x32xf32>, vector<20x32xf32> -> vector<20x32xf32>
    %146 = arith.addf %124, %145 : vector<20x32xf32>
    %147 = vector.extract_strided_slice %59 {offsets = [0, 24], sizes = [20, 8], strides = [1, 1]} : vector<20x96xf32> to vector<20x8xf32>
    %148 = vector.extract_strided_slice %59 {offsets = [0, 56], sizes = [20, 8], strides = [1, 1]} : vector<20x96xf32> to vector<20x8xf32>
    %149 = vector.extract_strided_slice %59 {offsets = [0, 88], sizes = [20, 8], strides = [1, 1]} : vector<20x96xf32> to vector<20x8xf32>
    %150 = tpu.transpose %148, [1, 0] : vector<20x8xf32> -> vector<8x20xf32>
    %cst_61 = arith.constant dense<0.000000e+00> : vector<20x20xf32>
    %151 = tpu.matmul %147, %150, %cst_61 {dimension_numbers = #tpu.dot_dimension_numbers<[1], [0], [0], [1], [0, 0, 1, 1], [], []>} : vector<20x8xf32>, vector<8x20xf32>, vector<20x20xf32> -> vector<20x20xf32>
    %cst_62 = arith.constant 0.353553385 : f32
    %152 = vector.broadcast %cst_62 : f32 to vector<20x20xf32>
    %153 = arith.mulf %151, %152 : vector<20x20xf32>
    %cst_63 = arith.constant -1.000000e+30 : f32
    %154 = vector.broadcast %cst_63 : f32 to vector<20x20xf32>
    %155 = arith.select %77, %153, %154 : vector<20x20xi1>, vector<20x20xf32>
    %cst_64 = arith.constant dense<0xFF800000> : vector<20xf32>
    %156 = vector.multi_reduction <maximumf>, %155, %cst_64 [1] : vector<20x20xf32> to vector<20xf32>
    %157 = vector.shape_cast %156 : vector<20xf32> to vector<20x1xf32>
    %158 = vector.broadcast %157 : vector<20x1xf32> to vector<20x20xf32>
    %159 = arith.subf %155, %158 : vector<20x20xf32>
    %160 = math.exp %159 : vector<20x20xf32>
    %cst_65 = arith.constant dense<0.000000e+00> : vector<20xf32>
    %161 = vector.multi_reduction <add>, %160, %cst_65 [1] : vector<20x20xf32> to vector<20xf32>
    %162 = vector.shape_cast %161 : vector<20xf32> to vector<20x1xf32>
    %163 = vector.broadcast %162 : vector<20x1xf32> to vector<20x20xf32>
    %164 = arith.divf %160, %163 : vector<20x20xf32>
    %cst_66 = arith.constant dense<0.000000e+00> : vector<20x8xf32>
    %165 = tpu.matmul %164, %149, %cst_66 {dimension_numbers = #tpu.dot_dimension_numbers<[1], [0], [0], [1], [0, 0, 1, 1], [], []>} : vector<20x20xf32>, vector<20x8xf32>, vector<20x8xf32> -> vector<20x8xf32>
    %166 = vector.extract_strided_slice %78 {offsets = [24, 0], sizes = [8, 32], strides = [1, 1]} : vector<32x32xf32> to vector<8x32xf32>
    %cst_67 = arith.constant dense<0.000000e+00> : vector<20x32xf32>
    %167 = tpu.matmul %165, %166, %cst_67 {dimension_numbers = #tpu.dot_dimension_numbers<[1], [0], [0], [1], [0, 0, 1, 1], [], []>} : vector<20x8xf32>, vector<8x32xf32>, vector<20x32xf32> -> vector<20x32xf32>
    %168 = arith.addf %146, %167 : vector<20x32xf32>
    %169 = arith.addf %54, %168 : vector<20x32xf32>
    %c0_68 = arith.constant 0 : index
    %c0_69 = arith.constant 0 : index
    %170 = vector.load %arg20[%c0_68, %c0_69] : memref<1x32xf32, #tpu.memory_space<vmem>>, vector<1x32xf32>
    %c0_70 = arith.constant 0 : index
    %c0_71 = arith.constant 0 : index
    %171 = vector.load %arg21[%c0_70, %c0_71] : memref<1x32xf32, #tpu.memory_space<vmem>>, vector<1x32xf32>
    %cst_72 = arith.constant dense<0.000000e+00> : vector<20xf32>
    %172 = vector.multi_reduction <add>, %169, %cst_72 [1] : vector<20x32xf32> to vector<20xf32>
    %173 = vector.shape_cast %172 : vector<20xf32> to vector<20x1xf32>
    %cst_73 = arith.constant 3.200000e+01 : f32
    %174 = vector.broadcast %cst_73 : f32 to vector<20x1xf32>
    %175 = arith.divf %173, %174 : vector<20x1xf32>
    %176 = vector.broadcast %175 : vector<20x1xf32> to vector<20x32xf32>
    %177 = arith.subf %169, %176 : vector<20x32xf32>
    %178 = arith.mulf %177, %177 : vector<20x32xf32>
    %cst_74 = arith.constant dense<0.000000e+00> : vector<20xf32>
    %179 = vector.multi_reduction <add>, %178, %cst_74 [1] : vector<20x32xf32> to vector<20xf32>
    %180 = vector.shape_cast %179 : vector<20xf32> to vector<20x1xf32>
    %cst_75 = arith.constant 3.200000e+01 : f32
    %181 = vector.broadcast %cst_75 : f32 to vector<20x1xf32>
    %182 = arith.divf %180, %181 : vector<20x1xf32>
    %183 = vector.broadcast %175 : vector<20x1xf32> to vector<20x32xf32>
    %184 = arith.subf %169, %183 : vector<20x32xf32>
    %cst_76 = arith.constant 9.99999974E-6 : f32
    %185 = vector.broadcast %cst_76 : f32 to vector<20x1xf32>
    %186 = arith.addf %182, %185 : vector<20x1xf32>
    %187 = math.rsqrt %186 : vector<20x1xf32>
    %188 = vector.broadcast %187 : vector<20x1xf32> to vector<20x32xf32>
    %189 = arith.mulf %184, %188 : vector<20x32xf32>
    %190 = vector.broadcast %170 : vector<1x32xf32> to vector<20x32xf32>
    %191 = arith.mulf %189, %190 : vector<20x32xf32>
    %192 = vector.broadcast %171 : vector<1x32xf32> to vector<20x32xf32>
    %193 = arith.addf %191, %192 : vector<20x32xf32>
    %c0_77 = arith.constant 0 : index
    %c0_78 = arith.constant 0 : index
    %194 = vector.load %arg16[%c0_77, %c0_78] : memref<32x64xf32, #tpu.memory_space<vmem>>, vector<32x64xf32>
    %cst_79 = arith.constant dense<0.000000e+00> : vector<20x64xf32>
    %195 = tpu.matmul %193, %194, %cst_79 {dimension_numbers = #tpu.dot_dimension_numbers<[1], [0], [0], [1], [0, 0, 1, 1], [], []>} : vector<20x32xf32>, vector<32x64xf32>, vector<20x64xf32> -> vector<20x64xf32>
    %c0_80 = arith.constant 0 : index
    %c0_81 = arith.constant 0 : index
    %196 = vector.load %arg17[%c0_80, %c0_81] : memref<1x64xf32, #tpu.memory_space<vmem>>, vector<1x64xf32>
    %197 = vector.broadcast %196 : vector<1x64xf32> to vector<20x64xf32>
    %198 = arith.addf %195, %197 : vector<20x64xf32>
    %cst_82 = arith.constant 5.000000e-01 : f32
    %199 = vector.broadcast %cst_82 : f32 to vector<20x64xf32>
    %200 = arith.mulf %199, %198 : vector<20x64xf32>
    %cst_83 = arith.constant 0.707106769 : f32
    %201 = vector.broadcast %cst_83 : f32 to vector<20x64xf32>
    %202 = arith.mulf %198, %201 : vector<20x64xf32>
    %203 = math.erf %202 : vector<20x64xf32>
    %cst_84 = arith.constant 1.000000e+00 : f32
    %204 = vector.broadcast %cst_84 : f32 to vector<20x64xf32>
    %205 = arith.addf %204, %203 : vector<20x64xf32>
    %206 = arith.mulf %200, %205 : vector<20x64xf32>
    %c0_85 = arith.constant 0 : index
    %c0_86 = arith.constant 0 : index
    %207 = vector.load %arg18[%c0_85, %c0_86] : memref<64x32xf32, #tpu.memory_space<vmem>>, vector<64x32xf32>
    %cst_87 = arith.constant dense<0.000000e+00> : vector<20x32xf32>
    %208 = tpu.matmul %206, %207, %cst_87 {dimension_numbers = #tpu.dot_dimension_numbers<[1], [0], [0], [1], [0, 0, 1, 1], [], []>} : vector<20x64xf32>, vector<64x32xf32>, vector<20x32xf32> -> vector<20x32xf32>
    %c0_88 = arith.constant 0 : index
    %c0_89 = arith.constant 0 : index
    %209 = vector.load %arg19[%c0_88, %c0_89] : memref<1x32xf32, #tpu.memory_space<vmem>>, vector<1x32xf32>
    %210 = vector.broadcast %209 : vector<1x32xf32> to vector<20x32xf32>
    %211 = arith.addf %208, %210 : vector<20x32xf32>
    %212 = arith.addf %193, %211 : vector<20x32xf32>
    %c0_90 = arith.constant 0 : index
    %c0_91 = arith.constant 0 : index
    %213 = vector.load %arg22[%c0_90, %c0_91] : memref<1x32xf32, #tpu.memory_space<vmem>>, vector<1x32xf32>
    %c0_92 = arith.constant 0 : index
    %c0_93 = arith.constant 0 : index
    %214 = vector.load %arg23[%c0_92, %c0_93] : memref<1x32xf32, #tpu.memory_space<vmem>>, vector<1x32xf32>
    %cst_94 = arith.constant dense<0.000000e+00> : vector<20xf32>
    %215 = vector.multi_reduction <add>, %212, %cst_94 [1] : vector<20x32xf32> to vector<20xf32>
    %216 = vector.shape_cast %215 : vector<20xf32> to vector<20x1xf32>
    %cst_95 = arith.constant 3.200000e+01 : f32
    %217 = vector.broadcast %cst_95 : f32 to vector<20x1xf32>
    %218 = arith.divf %216, %217 : vector<20x1xf32>
    %219 = vector.broadcast %218 : vector<20x1xf32> to vector<20x32xf32>
    %220 = arith.subf %212, %219 : vector<20x32xf32>
    %221 = arith.mulf %220, %220 : vector<20x32xf32>
    %cst_96 = arith.constant dense<0.000000e+00> : vector<20xf32>
    %222 = vector.multi_reduction <add>, %221, %cst_96 [1] : vector<20x32xf32> to vector<20xf32>
    %223 = vector.shape_cast %222 : vector<20xf32> to vector<20x1xf32>
    %cst_97 = arith.constant 3.200000e+01 : f32
    %224 = vector.broadcast %cst_97 : f32 to vector<20x1xf32>
    %225 = arith.divf %223, %224 : vector<20x1xf32>
    %226 = vector.broadcast %218 : vector<20x1xf32> to vector<20x32xf32>
    %227 = arith.subf %212, %226 : vector<20x32xf32>
    %cst_98 = arith.constant 9.99999974E-6 : f32
    %228 = vector.broadcast %cst_98 : f32 to vector<20x1xf32>
    %229 = arith.addf %225, %228 : vector<20x1xf32>
    %230 = math.rsqrt %229 : vector<20x1xf32>
    %231 = vector.broadcast %230 : vector<20x1xf32> to vector<20x32xf32>
    %232 = arith.mulf %227, %231 : vector<20x32xf32>
    %233 = vector.broadcast %213 : vector<1x32xf32> to vector<20x32xf32>
    %234 = arith.mulf %232, %233 : vector<20x32xf32>
    %235 = vector.broadcast %214 : vector<1x32xf32> to vector<20x32xf32>
    %236 = arith.addf %234, %235 : vector<20x32xf32>
    %c0_99 = arith.constant 0 : index
    %c0_100 = arith.constant 0 : index
    %237 = vector.load %arg24[%c0_99, %c0_100] : memref<1x32xf32, #tpu.memory_space<vmem>>, vector<1x32xf32>
    %c0_101 = arith.constant 0 : index
    %c0_102 = arith.constant 0 : index
    %238 = vector.load %arg25[%c0_101, %c0_102] : memref<1x32xf32, #tpu.memory_space<vmem>>, vector<1x32xf32>
    %cst_103 = arith.constant dense<0.000000e+00> : vector<20xf32>
    %239 = vector.multi_reduction <add>, %236, %cst_103 [1] : vector<20x32xf32> to vector<20xf32>
    %240 = vector.shape_cast %239 : vector<20xf32> to vector<20x1xf32>
    %cst_104 = arith.constant 3.200000e+01 : f32
    %241 = vector.broadcast %cst_104 : f32 to vector<20x1xf32>
    %242 = arith.divf %240, %241 : vector<20x1xf32>
    %243 = vector.broadcast %242 : vector<20x1xf32> to vector<20x32xf32>
    %244 = arith.subf %236, %243 : vector<20x32xf32>
    %245 = arith.mulf %244, %244 : vector<20x32xf32>
    %cst_105 = arith.constant dense<0.000000e+00> : vector<20xf32>
    %246 = vector.multi_reduction <add>, %245, %cst_105 [1] : vector<20x32xf32> to vector<20xf32>
    %247 = vector.shape_cast %246 : vector<20xf32> to vector<20x1xf32>
    %cst_106 = arith.constant 3.200000e+01 : f32
    %248 = vector.broadcast %cst_106 : f32 to vector<20x1xf32>
    %249 = arith.divf %247, %248 : vector<20x1xf32>
    %250 = vector.broadcast %242 : vector<20x1xf32> to vector<20x32xf32>
    %251 = arith.subf %236, %250 : vector<20x32xf32>
    %cst_107 = arith.constant 9.99999974E-6 : f32
    %252 = vector.broadcast %cst_107 : f32 to vector<20x1xf32>
    %253 = arith.addf %249, %252 : vector<20x1xf32>
    %254 = math.rsqrt %253 : vector<20x1xf32>
    %255 = vector.broadcast %254 : vector<20x1xf32> to vector<20x32xf32>
    %256 = arith.mulf %251, %255 : vector<20x32xf32>
    %257 = vector.broadcast %237 : vector<1x32xf32> to vector<20x32xf32>
    %258 = arith.mulf %256, %257 : vector<20x32xf32>
    %259 = vector.broadcast %238 : vector<1x32xf32> to vector<20x32xf32>
    %260 = arith.addf %258, %259 : vector<20x32xf32>
    %cst_108 = arith.constant 5.000000e-01 : f32
    %261 = vector.broadcast %cst_108 : f32 to vector<20x32xf32>
    %262 = arith.mulf %261, %260 : vector<20x32xf32>
    %cst_109 = arith.constant 0.707106769 : f32
    %263 = vector.broadcast %cst_109 : f32 to vector<20x32xf32>
    %264 = arith.mulf %260, %263 : vector<20x32xf32>
    %265 = math.erf %264 : vector<20x32xf32>
    %cst_110 = arith.constant 1.000000e+00 : f32
    %266 = vector.broadcast %cst_110 : f32 to vector<20x32xf32>
    %267 = arith.addf %266, %265 : vector<20x32xf32>
    %268 = arith.mulf %262, %267 : vector<20x32xf32>
    %269 = arith.negf %268 : vector<20x32xf32>
    %270 = math.exp %269 : vector<20x32xf32>
    %cst_111 = arith.constant 1.000000e+00 : f32
    %271 = vector.broadcast %cst_111 : f32 to vector<20x32xf32>
    %272 = arith.addf %271, %270 : vector<20x32xf32>
    %273 = arith.divf %271, %272 : vector<20x32xf32>
    %274 = arith.mulf %268, %273 : vector<20x32xf32>
    %c0_112 = arith.constant 0 : index
    %c0_113 = arith.constant 0 : index
    %275 = vector.load %arg26[%c0_112, %c0_113] : memref<32x32xf32, #tpu.memory_space<vmem>>, vector<32x32xf32>
    %cst_114 = arith.constant dense<0.000000e+00> : vector<20x32xf32>
    %276 = tpu.matmul %274, %275, %cst_114 {dimension_numbers = #tpu.dot_dimension_numbers<[1], [0], [0], [1], [0, 0, 1, 1], [], []>} : vector<20x32xf32>, vector<32x32xf32>, vector<20x32xf32> -> vector<20x32xf32>
    %c0_115 = arith.constant 0 : index
    %c0_116 = arith.constant 0 : index
    %277 = vector.load %arg28[%c0_115, %c0_116] : memref<12x32xf32, #tpu.memory_space<vmem>>, vector<12x32xf32>
    %278 = vector.extract_strided_slice %277 {offsets = [0, 0], sizes = [1, 32], strides = [1, 1]} : vector<12x32xf32> to vector<1x32xf32>
    %279 = vector.extract_strided_slice %277 {offsets = [1, 0], sizes = [1, 32], strides = [1, 1]} : vector<12x32xf32> to vector<1x32xf32>
    %280 = vector.extract_strided_slice %277 {offsets = [2, 0], sizes = [1, 32], strides = [1, 1]} : vector<12x32xf32> to vector<1x32xf32>
    %281 = vector.extract_strided_slice %277 {offsets = [3, 0], sizes = [1, 32], strides = [1, 1]} : vector<12x32xf32> to vector<1x32xf32>
    %282 = vector.extract_strided_slice %277 {offsets = [4, 0], sizes = [1, 32], strides = [1, 1]} : vector<12x32xf32> to vector<1x32xf32>
    %283 = vector.extract_strided_slice %277 {offsets = [5, 0], sizes = [1, 32], strides = [1, 1]} : vector<12x32xf32> to vector<1x32xf32>
    %284 = vector.extract_strided_slice %277 {offsets = [6, 0], sizes = [1, 32], strides = [1, 1]} : vector<12x32xf32> to vector<1x32xf32>
    %285 = vector.extract_strided_slice %277 {offsets = [7, 0], sizes = [1, 32], strides = [1, 1]} : vector<12x32xf32> to vector<1x32xf32>
    %286 = vector.extract_strided_slice %277 {offsets = [8, 0], sizes = [1, 32], strides = [1, 1]} : vector<12x32xf32> to vector<1x32xf32>
    %287 = vector.extract_strided_slice %277 {offsets = [9, 0], sizes = [1, 32], strides = [1, 1]} : vector<12x32xf32> to vector<1x32xf32>
    %288 = vector.extract_strided_slice %277 {offsets = [10, 0], sizes = [1, 32], strides = [1, 1]} : vector<12x32xf32> to vector<1x32xf32>
    %289 = vector.extract_strided_slice %277 {offsets = [11, 0], sizes = [1, 32], strides = [1, 1]} : vector<12x32xf32> to vector<1x32xf32>
    %290 = vector.broadcast %278 : vector<1x32xf32> to vector<20x32xf32>
    %291 = arith.cmpf oge, %268, %290 : vector<20x32xf32>
    %292 = vector.broadcast %279 : vector<1x32xf32> to vector<20x32xf32>
    %293 = arith.cmpf olt, %268, %292 : vector<20x32xf32>
    %294 = arith.andi %291, %293 : vector<20x32xi1>
    %295 = arith.extui %294 : vector<20x32xi1> to vector<20x32xi32>
    %296 = arith.sitofp %295 : vector<20x32xi32> to vector<20x32xf32>
    %297 = vector.broadcast %279 : vector<1x32xf32> to vector<20x32xf32>
    %298 = arith.cmpf oge, %268, %297 : vector<20x32xf32>
    %299 = vector.broadcast %280 : vector<1x32xf32> to vector<20x32xf32>
    %300 = arith.cmpf olt, %268, %299 : vector<20x32xf32>
    %301 = arith.andi %298, %300 : vector<20x32xi1>
    %302 = arith.extui %301 : vector<20x32xi1> to vector<20x32xi32>
    %303 = arith.sitofp %302 : vector<20x32xi32> to vector<20x32xf32>
    %304 = vector.broadcast %280 : vector<1x32xf32> to vector<20x32xf32>
    %305 = arith.cmpf oge, %268, %304 : vector<20x32xf32>
    %306 = vector.broadcast %281 : vector<1x32xf32> to vector<20x32xf32>
    %307 = arith.cmpf olt, %268, %306 : vector<20x32xf32>
    %308 = arith.andi %305, %307 : vector<20x32xi1>
    %309 = arith.extui %308 : vector<20x32xi1> to vector<20x32xi32>
    %310 = arith.sitofp %309 : vector<20x32xi32> to vector<20x32xf32>
    %311 = vector.broadcast %281 : vector<1x32xf32> to vector<20x32xf32>
    %312 = arith.cmpf oge, %268, %311 : vector<20x32xf32>
    %313 = vector.broadcast %282 : vector<1x32xf32> to vector<20x32xf32>
    %314 = arith.cmpf olt, %268, %313 : vector<20x32xf32>
    %315 = arith.andi %312, %314 : vector<20x32xi1>
    %316 = arith.extui %315 : vector<20x32xi1> to vector<20x32xi32>
    %317 = arith.sitofp %316 : vector<20x32xi32> to vector<20x32xf32>
    %318 = vector.broadcast %282 : vector<1x32xf32> to vector<20x32xf32>
    %319 = arith.cmpf oge, %268, %318 : vector<20x32xf32>
    %320 = vector.broadcast %283 : vector<1x32xf32> to vector<20x32xf32>
    %321 = arith.cmpf olt, %268, %320 : vector<20x32xf32>
    %322 = arith.andi %319, %321 : vector<20x32xi1>
    %323 = arith.extui %322 : vector<20x32xi1> to vector<20x32xi32>
    %324 = arith.sitofp %323 : vector<20x32xi32> to vector<20x32xf32>
    %325 = vector.broadcast %283 : vector<1x32xf32> to vector<20x32xf32>
    %326 = arith.cmpf oge, %268, %325 : vector<20x32xf32>
    %327 = vector.broadcast %284 : vector<1x32xf32> to vector<20x32xf32>
    %328 = arith.cmpf olt, %268, %327 : vector<20x32xf32>
    %329 = arith.andi %326, %328 : vector<20x32xi1>
    %330 = arith.extui %329 : vector<20x32xi1> to vector<20x32xi32>
    %331 = arith.sitofp %330 : vector<20x32xi32> to vector<20x32xf32>
    %332 = vector.broadcast %284 : vector<1x32xf32> to vector<20x32xf32>
    %333 = arith.cmpf oge, %268, %332 : vector<20x32xf32>
    %334 = vector.broadcast %285 : vector<1x32xf32> to vector<20x32xf32>
    %335 = arith.cmpf olt, %268, %334 : vector<20x32xf32>
    %336 = arith.andi %333, %335 : vector<20x32xi1>
    %337 = arith.extui %336 : vector<20x32xi1> to vector<20x32xi32>
    %338 = arith.sitofp %337 : vector<20x32xi32> to vector<20x32xf32>
    %339 = vector.broadcast %285 : vector<1x32xf32> to vector<20x32xf32>
    %340 = arith.cmpf oge, %268, %339 : vector<20x32xf32>
    %341 = vector.broadcast %286 : vector<1x32xf32> to vector<20x32xf32>
    %342 = arith.cmpf olt, %268, %341 : vector<20x32xf32>
    %343 = arith.andi %340, %342 : vector<20x32xi1>
    %344 = arith.extui %343 : vector<20x32xi1> to vector<20x32xi32>
    %345 = arith.sitofp %344 : vector<20x32xi32> to vector<20x32xf32>
    %346 = vector.broadcast %286 : vector<1x32xf32> to vector<20x32xf32>
    %347 = arith.cmpf oge, %268, %346 : vector<20x32xf32>
    %348 = vector.broadcast %287 : vector<1x32xf32> to vector<20x32xf32>
    %349 = arith.cmpf olt, %268, %348 : vector<20x32xf32>
    %350 = arith.andi %347, %349 : vector<20x32xi1>
    %351 = arith.extui %350 : vector<20x32xi1> to vector<20x32xi32>
    %352 = arith.sitofp %351 : vector<20x32xi32> to vector<20x32xf32>
    %353 = vector.broadcast %287 : vector<1x32xf32> to vector<20x32xf32>
    %354 = arith.cmpf oge, %268, %353 : vector<20x32xf32>
    %355 = vector.broadcast %288 : vector<1x32xf32> to vector<20x32xf32>
    %356 = arith.cmpf olt, %268, %355 : vector<20x32xf32>
    %357 = arith.andi %354, %356 : vector<20x32xi1>
    %358 = arith.extui %357 : vector<20x32xi1> to vector<20x32xi32>
    %359 = arith.sitofp %358 : vector<20x32xi32> to vector<20x32xf32>
    %360 = vector.broadcast %288 : vector<1x32xf32> to vector<20x32xf32>
    %361 = arith.cmpf oge, %268, %360 : vector<20x32xf32>
    %362 = vector.broadcast %289 : vector<1x32xf32> to vector<20x32xf32>
    %363 = arith.cmpf olt, %268, %362 : vector<20x32xf32>
    %364 = arith.andi %361, %363 : vector<20x32xi1>
    %365 = arith.extui %364 : vector<20x32xi1> to vector<20x32xi32>
    %366 = arith.sitofp %365 : vector<20x32xi32> to vector<20x32xf32>
    %367 = vector.broadcast %278 : vector<1x32xf32> to vector<20x32xf32>
    %368 = arith.subf %268, %367 : vector<20x32xf32>
    %369 = arith.subf %279, %278 : vector<1x32xf32>
    %370 = vector.broadcast %369 : vector<1x32xf32> to vector<20x32xf32>
    %371 = arith.divf %368, %370 : vector<20x32xf32>
    %372 = arith.mulf %371, %296 : vector<20x32xf32>
    %373 = vector.broadcast %280 : vector<1x32xf32> to vector<20x32xf32>
    %374 = arith.subf %373, %268 : vector<20x32xf32>
    %375 = arith.subf %280, %279 : vector<1x32xf32>
    %376 = vector.broadcast %375 : vector<1x32xf32> to vector<20x32xf32>
    %377 = arith.divf %374, %376 : vector<20x32xf32>
    %378 = arith.mulf %377, %303 : vector<20x32xf32>
    %379 = arith.addf %372, %378 : vector<20x32xf32>
    %380 = vector.broadcast %279 : vector<1x32xf32> to vector<20x32xf32>
    %381 = arith.subf %268, %380 : vector<20x32xf32>
    %382 = arith.subf %280, %279 : vector<1x32xf32>
    %383 = vector.broadcast %382 : vector<1x32xf32> to vector<20x32xf32>
    %384 = arith.divf %381, %383 : vector<20x32xf32>
    %385 = arith.mulf %384, %303 : vector<20x32xf32>
    %386 = vector.broadcast %281 : vector<1x32xf32> to vector<20x32xf32>
    %387 = arith.subf %386, %268 : vector<20x32xf32>
    %388 = arith.subf %281, %280 : vector<1x32xf32>
    %389 = vector.broadcast %388 : vector<1x32xf32> to vector<20x32xf32>
    %390 = arith.divf %387, %389 : vector<20x32xf32>
    %391 = arith.mulf %390, %310 : vector<20x32xf32>
    %392 = arith.addf %385, %391 : vector<20x32xf32>
    %393 = vector.broadcast %280 : vector<1x32xf32> to vector<20x32xf32>
    %394 = arith.subf %268, %393 : vector<20x32xf32>
    %395 = arith.subf %281, %280 : vector<1x32xf32>
    %396 = vector.broadcast %395 : vector<1x32xf32> to vector<20x32xf32>
    %397 = arith.divf %394, %396 : vector<20x32xf32>
    %398 = arith.mulf %397, %310 : vector<20x32xf32>
    %399 = vector.broadcast %282 : vector<1x32xf32> to vector<20x32xf32>
    %400 = arith.subf %399, %268 : vector<20x32xf32>
    %401 = arith.subf %282, %281 : vector<1x32xf32>
    %402 = vector.broadcast %401 : vector<1x32xf32> to vector<20x32xf32>
    %403 = arith.divf %400, %402 : vector<20x32xf32>
    %404 = arith.mulf %403, %317 : vector<20x32xf32>
    %405 = arith.addf %398, %404 : vector<20x32xf32>
    %406 = vector.broadcast %281 : vector<1x32xf32> to vector<20x32xf32>
    %407 = arith.subf %268, %406 : vector<20x32xf32>
    %408 = arith.subf %282, %281 : vector<1x32xf32>
    %409 = vector.broadcast %408 : vector<1x32xf32> to vector<20x32xf32>
    %410 = arith.divf %407, %409 : vector<20x32xf32>
    %411 = arith.mulf %410, %317 : vector<20x32xf32>
    %412 = vector.broadcast %283 : vector<1x32xf32> to vector<20x32xf32>
    %413 = arith.subf %412, %268 : vector<20x32xf32>
    %414 = arith.subf %283, %282 : vector<1x32xf32>
    %415 = vector.broadcast %414 : vector<1x32xf32> to vector<20x32xf32>
    %416 = arith.divf %413, %415 : vector<20x32xf32>
    %417 = arith.mulf %416, %324 : vector<20x32xf32>
    %418 = arith.addf %411, %417 : vector<20x32xf32>
    %419 = vector.broadcast %282 : vector<1x32xf32> to vector<20x32xf32>
    %420 = arith.subf %268, %419 : vector<20x32xf32>
    %421 = arith.subf %283, %282 : vector<1x32xf32>
    %422 = vector.broadcast %421 : vector<1x32xf32> to vector<20x32xf32>
    %423 = arith.divf %420, %422 : vector<20x32xf32>
    %424 = arith.mulf %423, %324 : vector<20x32xf32>
    %425 = vector.broadcast %284 : vector<1x32xf32> to vector<20x32xf32>
    %426 = arith.subf %425, %268 : vector<20x32xf32>
    %427 = arith.subf %284, %283 : vector<1x32xf32>
    %428 = vector.broadcast %427 : vector<1x32xf32> to vector<20x32xf32>
    %429 = arith.divf %426, %428 : vector<20x32xf32>
    %430 = arith.mulf %429, %331 : vector<20x32xf32>
    %431 = arith.addf %424, %430 : vector<20x32xf32>
    %432 = vector.broadcast %283 : vector<1x32xf32> to vector<20x32xf32>
    %433 = arith.subf %268, %432 : vector<20x32xf32>
    %434 = arith.subf %284, %283 : vector<1x32xf32>
    %435 = vector.broadcast %434 : vector<1x32xf32> to vector<20x32xf32>
    %436 = arith.divf %433, %435 : vector<20x32xf32>
    %437 = arith.mulf %436, %331 : vector<20x32xf32>
    %438 = vector.broadcast %285 : vector<1x32xf32> to vector<20x32xf32>
    %439 = arith.subf %438, %268 : vector<20x32xf32>
    %440 = arith.subf %285, %284 : vector<1x32xf32>
    %441 = vector.broadcast %440 : vector<1x32xf32> to vector<20x32xf32>
    %442 = arith.divf %439, %441 : vector<20x32xf32>
    %443 = arith.mulf %442, %338 : vector<20x32xf32>
    %444 = arith.addf %437, %443 : vector<20x32xf32>
    %445 = vector.broadcast %284 : vector<1x32xf32> to vector<20x32xf32>
    %446 = arith.subf %268, %445 : vector<20x32xf32>
    %447 = arith.subf %285, %284 : vector<1x32xf32>
    %448 = vector.broadcast %447 : vector<1x32xf32> to vector<20x32xf32>
    %449 = arith.divf %446, %448 : vector<20x32xf32>
    %450 = arith.mulf %449, %338 : vector<20x32xf32>
    %451 = vector.broadcast %286 : vector<1x32xf32> to vector<20x32xf32>
    %452 = arith.subf %451, %268 : vector<20x32xf32>
    %453 = arith.subf %286, %285 : vector<1x32xf32>
    %454 = vector.broadcast %453 : vector<1x32xf32> to vector<20x32xf32>
    %455 = arith.divf %452, %454 : vector<20x32xf32>
    %456 = arith.mulf %455, %345 : vector<20x32xf32>
    %457 = arith.addf %450, %456 : vector<20x32xf32>
    %458 = vector.broadcast %285 : vector<1x32xf32> to vector<20x32xf32>
    %459 = arith.subf %268, %458 : vector<20x32xf32>
    %460 = arith.subf %286, %285 : vector<1x32xf32>
    %461 = vector.broadcast %460 : vector<1x32xf32> to vector<20x32xf32>
    %462 = arith.divf %459, %461 : vector<20x32xf32>
    %463 = arith.mulf %462, %345 : vector<20x32xf32>
    %464 = vector.broadcast %287 : vector<1x32xf32> to vector<20x32xf32>
    %465 = arith.subf %464, %268 : vector<20x32xf32>
    %466 = arith.subf %287, %286 : vector<1x32xf32>
    %467 = vector.broadcast %466 : vector<1x32xf32> to vector<20x32xf32>
    %468 = arith.divf %465, %467 : vector<20x32xf32>
    %469 = arith.mulf %468, %352 : vector<20x32xf32>
    %470 = arith.addf %463, %469 : vector<20x32xf32>
    %471 = vector.broadcast %286 : vector<1x32xf32> to vector<20x32xf32>
    %472 = arith.subf %268, %471 : vector<20x32xf32>
    %473 = arith.subf %287, %286 : vector<1x32xf32>
    %474 = vector.broadcast %473 : vector<1x32xf32> to vector<20x32xf32>
    %475 = arith.divf %472, %474 : vector<20x32xf32>
    %476 = arith.mulf %475, %352 : vector<20x32xf32>
    %477 = vector.broadcast %288 : vector<1x32xf32> to vector<20x32xf32>
    %478 = arith.subf %477, %268 : vector<20x32xf32>
    %479 = arith.subf %288, %287 : vector<1x32xf32>
    %480 = vector.broadcast %479 : vector<1x32xf32> to vector<20x32xf32>
    %481 = arith.divf %478, %480 : vector<20x32xf32>
    %482 = arith.mulf %481, %359 : vector<20x32xf32>
    %483 = arith.addf %476, %482 : vector<20x32xf32>
    %484 = vector.broadcast %287 : vector<1x32xf32> to vector<20x32xf32>
    %485 = arith.subf %268, %484 : vector<20x32xf32>
    %486 = arith.subf %288, %287 : vector<1x32xf32>
    %487 = vector.broadcast %486 : vector<1x32xf32> to vector<20x32xf32>
    %488 = arith.divf %485, %487 : vector<20x32xf32>
    %489 = arith.mulf %488, %359 : vector<20x32xf32>
    %490 = vector.broadcast %289 : vector<1x32xf32> to vector<20x32xf32>
    %491 = arith.subf %490, %268 : vector<20x32xf32>
    %492 = arith.subf %289, %288 : vector<1x32xf32>
    %493 = vector.broadcast %492 : vector<1x32xf32> to vector<20x32xf32>
    %494 = arith.divf %491, %493 : vector<20x32xf32>
    %495 = arith.mulf %494, %366 : vector<20x32xf32>
    %496 = arith.addf %489, %495 : vector<20x32xf32>
    %497 = vector.broadcast %278 : vector<1x32xf32> to vector<20x32xf32>
    %498 = arith.subf %268, %497 : vector<20x32xf32>
    %499 = arith.subf %280, %278 : vector<1x32xf32>
    %500 = vector.broadcast %499 : vector<1x32xf32> to vector<20x32xf32>
    %501 = arith.divf %498, %500 : vector<20x32xf32>
    %502 = arith.mulf %501, %379 : vector<20x32xf32>
    %503 = vector.broadcast %281 : vector<1x32xf32> to vector<20x32xf32>
    %504 = arith.subf %503, %268 : vector<20x32xf32>
    %505 = arith.subf %281, %279 : vector<1x32xf32>
    %506 = vector.broadcast %505 : vector<1x32xf32> to vector<20x32xf32>
    %507 = arith.divf %504, %506 : vector<20x32xf32>
    %508 = arith.mulf %507, %392 : vector<20x32xf32>
    %509 = arith.addf %502, %508 : vector<20x32xf32>
    %510 = vector.broadcast %279 : vector<1x32xf32> to vector<20x32xf32>
    %511 = arith.subf %268, %510 : vector<20x32xf32>
    %512 = arith.subf %281, %279 : vector<1x32xf32>
    %513 = vector.broadcast %512 : vector<1x32xf32> to vector<20x32xf32>
    %514 = arith.divf %511, %513 : vector<20x32xf32>
    %515 = arith.mulf %514, %392 : vector<20x32xf32>
    %516 = vector.broadcast %282 : vector<1x32xf32> to vector<20x32xf32>
    %517 = arith.subf %516, %268 : vector<20x32xf32>
    %518 = arith.subf %282, %280 : vector<1x32xf32>
    %519 = vector.broadcast %518 : vector<1x32xf32> to vector<20x32xf32>
    %520 = arith.divf %517, %519 : vector<20x32xf32>
    %521 = arith.mulf %520, %405 : vector<20x32xf32>
    %522 = arith.addf %515, %521 : vector<20x32xf32>
    %523 = vector.broadcast %280 : vector<1x32xf32> to vector<20x32xf32>
    %524 = arith.subf %268, %523 : vector<20x32xf32>
    %525 = arith.subf %282, %280 : vector<1x32xf32>
    %526 = vector.broadcast %525 : vector<1x32xf32> to vector<20x32xf32>
    %527 = arith.divf %524, %526 : vector<20x32xf32>
    %528 = arith.mulf %527, %405 : vector<20x32xf32>
    %529 = vector.broadcast %283 : vector<1x32xf32> to vector<20x32xf32>
    %530 = arith.subf %529, %268 : vector<20x32xf32>
    %531 = arith.subf %283, %281 : vector<1x32xf32>
    %532 = vector.broadcast %531 : vector<1x32xf32> to vector<20x32xf32>
    %533 = arith.divf %530, %532 : vector<20x32xf32>
    %534 = arith.mulf %533, %418 : vector<20x32xf32>
    %535 = arith.addf %528, %534 : vector<20x32xf32>
    %536 = vector.broadcast %281 : vector<1x32xf32> to vector<20x32xf32>
    %537 = arith.subf %268, %536 : vector<20x32xf32>
    %538 = arith.subf %283, %281 : vector<1x32xf32>
    %539 = vector.broadcast %538 : vector<1x32xf32> to vector<20x32xf32>
    %540 = arith.divf %537, %539 : vector<20x32xf32>
    %541 = arith.mulf %540, %418 : vector<20x32xf32>
    %542 = vector.broadcast %284 : vector<1x32xf32> to vector<20x32xf32>
    %543 = arith.subf %542, %268 : vector<20x32xf32>
    %544 = arith.subf %284, %282 : vector<1x32xf32>
    %545 = vector.broadcast %544 : vector<1x32xf32> to vector<20x32xf32>
    %546 = arith.divf %543, %545 : vector<20x32xf32>
    %547 = arith.mulf %546, %431 : vector<20x32xf32>
    %548 = arith.addf %541, %547 : vector<20x32xf32>
    %549 = vector.broadcast %282 : vector<1x32xf32> to vector<20x32xf32>
    %550 = arith.subf %268, %549 : vector<20x32xf32>
    %551 = arith.subf %284, %282 : vector<1x32xf32>
    %552 = vector.broadcast %551 : vector<1x32xf32> to vector<20x32xf32>
    %553 = arith.divf %550, %552 : vector<20x32xf32>
    %554 = arith.mulf %553, %431 : vector<20x32xf32>
    %555 = vector.broadcast %285 : vector<1x32xf32> to vector<20x32xf32>
    %556 = arith.subf %555, %268 : vector<20x32xf32>
    %557 = arith.subf %285, %283 : vector<1x32xf32>
    %558 = vector.broadcast %557 : vector<1x32xf32> to vector<20x32xf32>
    %559 = arith.divf %556, %558 : vector<20x32xf32>
    %560 = arith.mulf %559, %444 : vector<20x32xf32>
    %561 = arith.addf %554, %560 : vector<20x32xf32>
    %562 = vector.broadcast %283 : vector<1x32xf32> to vector<20x32xf32>
    %563 = arith.subf %268, %562 : vector<20x32xf32>
    %564 = arith.subf %285, %283 : vector<1x32xf32>
    %565 = vector.broadcast %564 : vector<1x32xf32> to vector<20x32xf32>
    %566 = arith.divf %563, %565 : vector<20x32xf32>
    %567 = arith.mulf %566, %444 : vector<20x32xf32>
    %568 = vector.broadcast %286 : vector<1x32xf32> to vector<20x32xf32>
    %569 = arith.subf %568, %268 : vector<20x32xf32>
    %570 = arith.subf %286, %284 : vector<1x32xf32>
    %571 = vector.broadcast %570 : vector<1x32xf32> to vector<20x32xf32>
    %572 = arith.divf %569, %571 : vector<20x32xf32>
    %573 = arith.mulf %572, %457 : vector<20x32xf32>
    %574 = arith.addf %567, %573 : vector<20x32xf32>
    %575 = vector.broadcast %284 : vector<1x32xf32> to vector<20x32xf32>
    %576 = arith.subf %268, %575 : vector<20x32xf32>
    %577 = arith.subf %286, %284 : vector<1x32xf32>
    %578 = vector.broadcast %577 : vector<1x32xf32> to vector<20x32xf32>
    %579 = arith.divf %576, %578 : vector<20x32xf32>
    %580 = arith.mulf %579, %457 : vector<20x32xf32>
    %581 = vector.broadcast %287 : vector<1x32xf32> to vector<20x32xf32>
    %582 = arith.subf %581, %268 : vector<20x32xf32>
    %583 = arith.subf %287, %285 : vector<1x32xf32>
    %584 = vector.broadcast %583 : vector<1x32xf32> to vector<20x32xf32>
    %585 = arith.divf %582, %584 : vector<20x32xf32>
    %586 = arith.mulf %585, %470 : vector<20x32xf32>
    %587 = arith.addf %580, %586 : vector<20x32xf32>
    %588 = vector.broadcast %285 : vector<1x32xf32> to vector<20x32xf32>
    %589 = arith.subf %268, %588 : vector<20x32xf32>
    %590 = arith.subf %287, %285 : vector<1x32xf32>
    %591 = vector.broadcast %590 : vector<1x32xf32> to vector<20x32xf32>
    %592 = arith.divf %589, %591 : vector<20x32xf32>
    %593 = arith.mulf %592, %470 : vector<20x32xf32>
    %594 = vector.broadcast %288 : vector<1x32xf32> to vector<20x32xf32>
    %595 = arith.subf %594, %268 : vector<20x32xf32>
    %596 = arith.subf %288, %286 : vector<1x32xf32>
    %597 = vector.broadcast %596 : vector<1x32xf32> to vector<20x32xf32>
    %598 = arith.divf %595, %597 : vector<20x32xf32>
    %599 = arith.mulf %598, %483 : vector<20x32xf32>
    %600 = arith.addf %593, %599 : vector<20x32xf32>
    %601 = vector.broadcast %286 : vector<1x32xf32> to vector<20x32xf32>
    %602 = arith.subf %268, %601 : vector<20x32xf32>
    %603 = arith.subf %288, %286 : vector<1x32xf32>
    %604 = vector.broadcast %603 : vector<1x32xf32> to vector<20x32xf32>
    %605 = arith.divf %602, %604 : vector<20x32xf32>
    %606 = arith.mulf %605, %483 : vector<20x32xf32>
    %607 = vector.broadcast %289 : vector<1x32xf32> to vector<20x32xf32>
    %608 = arith.subf %607, %268 : vector<20x32xf32>
    %609 = arith.subf %289, %287 : vector<1x32xf32>
    %610 = vector.broadcast %609 : vector<1x32xf32> to vector<20x32xf32>
    %611 = arith.divf %608, %610 : vector<20x32xf32>
    %612 = arith.mulf %611, %496 : vector<20x32xf32>
    %613 = arith.addf %606, %612 : vector<20x32xf32>
    %614 = vector.broadcast %278 : vector<1x32xf32> to vector<20x32xf32>
    %615 = arith.subf %268, %614 : vector<20x32xf32>
    %616 = arith.subf %281, %278 : vector<1x32xf32>
    %617 = vector.broadcast %616 : vector<1x32xf32> to vector<20x32xf32>
    %618 = arith.divf %615, %617 : vector<20x32xf32>
    %619 = arith.mulf %618, %509 : vector<20x32xf32>
    %620 = vector.broadcast %282 : vector<1x32xf32> to vector<20x32xf32>
    %621 = arith.subf %620, %268 : vector<20x32xf32>
    %622 = arith.subf %282, %279 : vector<1x32xf32>
    %623 = vector.broadcast %622 : vector<1x32xf32> to vector<20x32xf32>
    %624 = arith.divf %621, %623 : vector<20x32xf32>
    %625 = arith.mulf %624, %522 : vector<20x32xf32>
    %626 = arith.addf %619, %625 : vector<20x32xf32>
    %627 = vector.broadcast %279 : vector<1x32xf32> to vector<20x32xf32>
    %628 = arith.subf %268, %627 : vector<20x32xf32>
    %629 = arith.subf %282, %279 : vector<1x32xf32>
    %630 = vector.broadcast %629 : vector<1x32xf32> to vector<20x32xf32>
    %631 = arith.divf %628, %630 : vector<20x32xf32>
    %632 = arith.mulf %631, %522 : vector<20x32xf32>
    %633 = vector.broadcast %283 : vector<1x32xf32> to vector<20x32xf32>
    %634 = arith.subf %633, %268 : vector<20x32xf32>
    %635 = arith.subf %283, %280 : vector<1x32xf32>
    %636 = vector.broadcast %635 : vector<1x32xf32> to vector<20x32xf32>
    %637 = arith.divf %634, %636 : vector<20x32xf32>
    %638 = arith.mulf %637, %535 : vector<20x32xf32>
    %639 = arith.addf %632, %638 : vector<20x32xf32>
    %640 = vector.broadcast %280 : vector<1x32xf32> to vector<20x32xf32>
    %641 = arith.subf %268, %640 : vector<20x32xf32>
    %642 = arith.subf %283, %280 : vector<1x32xf32>
    %643 = vector.broadcast %642 : vector<1x32xf32> to vector<20x32xf32>
    %644 = arith.divf %641, %643 : vector<20x32xf32>
    %645 = arith.mulf %644, %535 : vector<20x32xf32>
    %646 = vector.broadcast %284 : vector<1x32xf32> to vector<20x32xf32>
    %647 = arith.subf %646, %268 : vector<20x32xf32>
    %648 = arith.subf %284, %281 : vector<1x32xf32>
    %649 = vector.broadcast %648 : vector<1x32xf32> to vector<20x32xf32>
    %650 = arith.divf %647, %649 : vector<20x32xf32>
    %651 = arith.mulf %650, %548 : vector<20x32xf32>
    %652 = arith.addf %645, %651 : vector<20x32xf32>
    %653 = vector.broadcast %281 : vector<1x32xf32> to vector<20x32xf32>
    %654 = arith.subf %268, %653 : vector<20x32xf32>
    %655 = arith.subf %284, %281 : vector<1x32xf32>
    %656 = vector.broadcast %655 : vector<1x32xf32> to vector<20x32xf32>
    %657 = arith.divf %654, %656 : vector<20x32xf32>
    %658 = arith.mulf %657, %548 : vector<20x32xf32>
    %659 = vector.broadcast %285 : vector<1x32xf32> to vector<20x32xf32>
    %660 = arith.subf %659, %268 : vector<20x32xf32>
    %661 = arith.subf %285, %282 : vector<1x32xf32>
    %662 = vector.broadcast %661 : vector<1x32xf32> to vector<20x32xf32>
    %663 = arith.divf %660, %662 : vector<20x32xf32>
    %664 = arith.mulf %663, %561 : vector<20x32xf32>
    %665 = arith.addf %658, %664 : vector<20x32xf32>
    %666 = vector.broadcast %282 : vector<1x32xf32> to vector<20x32xf32>
    %667 = arith.subf %268, %666 : vector<20x32xf32>
    %668 = arith.subf %285, %282 : vector<1x32xf32>
    %669 = vector.broadcast %668 : vector<1x32xf32> to vector<20x32xf32>
    %670 = arith.divf %667, %669 : vector<20x32xf32>
    %671 = arith.mulf %670, %561 : vector<20x32xf32>
    %672 = vector.broadcast %286 : vector<1x32xf32> to vector<20x32xf32>
    %673 = arith.subf %672, %268 : vector<20x32xf32>
    %674 = arith.subf %286, %283 : vector<1x32xf32>
    %675 = vector.broadcast %674 : vector<1x32xf32> to vector<20x32xf32>
    %676 = arith.divf %673, %675 : vector<20x32xf32>
    %677 = arith.mulf %676, %574 : vector<20x32xf32>
    %678 = arith.addf %671, %677 : vector<20x32xf32>
    %679 = vector.broadcast %283 : vector<1x32xf32> to vector<20x32xf32>
    %680 = arith.subf %268, %679 : vector<20x32xf32>
    %681 = arith.subf %286, %283 : vector<1x32xf32>
    %682 = vector.broadcast %681 : vector<1x32xf32> to vector<20x32xf32>
    %683 = arith.divf %680, %682 : vector<20x32xf32>
    %684 = arith.mulf %683, %574 : vector<20x32xf32>
    %685 = vector.broadcast %287 : vector<1x32xf32> to vector<20x32xf32>
    %686 = arith.subf %685, %268 : vector<20x32xf32>
    %687 = arith.subf %287, %284 : vector<1x32xf32>
    %688 = vector.broadcast %687 : vector<1x32xf32> to vector<20x32xf32>
    %689 = arith.divf %686, %688 : vector<20x32xf32>
    %690 = arith.mulf %689, %587 : vector<20x32xf32>
    %691 = arith.addf %684, %690 : vector<20x32xf32>
    %692 = vector.broadcast %284 : vector<1x32xf32> to vector<20x32xf32>
    %693 = arith.subf %268, %692 : vector<20x32xf32>
    %694 = arith.subf %287, %284 : vector<1x32xf32>
    %695 = vector.broadcast %694 : vector<1x32xf32> to vector<20x32xf32>
    %696 = arith.divf %693, %695 : vector<20x32xf32>
    %697 = arith.mulf %696, %587 : vector<20x32xf32>
    %698 = vector.broadcast %288 : vector<1x32xf32> to vector<20x32xf32>
    %699 = arith.subf %698, %268 : vector<20x32xf32>
    %700 = arith.subf %288, %285 : vector<1x32xf32>
    %701 = vector.broadcast %700 : vector<1x32xf32> to vector<20x32xf32>
    %702 = arith.divf %699, %701 : vector<20x32xf32>
    %703 = arith.mulf %702, %600 : vector<20x32xf32>
    %704 = arith.addf %697, %703 : vector<20x32xf32>
    %705 = vector.broadcast %285 : vector<1x32xf32> to vector<20x32xf32>
    %706 = arith.subf %268, %705 : vector<20x32xf32>
    %707 = arith.subf %288, %285 : vector<1x32xf32>
    %708 = vector.broadcast %707 : vector<1x32xf32> to vector<20x32xf32>
    %709 = arith.divf %706, %708 : vector<20x32xf32>
    %710 = arith.mulf %709, %600 : vector<20x32xf32>
    %711 = vector.broadcast %289 : vector<1x32xf32> to vector<20x32xf32>
    %712 = arith.subf %711, %268 : vector<20x32xf32>
    %713 = arith.subf %289, %286 : vector<1x32xf32>
    %714 = vector.broadcast %713 : vector<1x32xf32> to vector<20x32xf32>
    %715 = arith.divf %712, %714 : vector<20x32xf32>
    %716 = arith.mulf %715, %613 : vector<20x32xf32>
    %717 = arith.addf %710, %716 : vector<20x32xf32>
    %c0_117 = arith.constant 0 : index
    %c0_118 = arith.constant 0 : index
    %718 = vector.load %arg27[%c0_117, %c0_118] : memref<256x32xf32, #tpu.memory_space<vmem>>, vector<256x32xf32>
    %719 = vector.extract_strided_slice %718 {offsets = [0, 0], sizes = [32, 32], strides = [1, 1]} : vector<256x32xf32> to vector<32x32xf32>
    %cst_119 = arith.constant dense<0.000000e+00> : vector<20x32xf32>
    %720 = tpu.matmul %626, %719, %cst_119 {dimension_numbers = #tpu.dot_dimension_numbers<[1], [0], [0], [1], [0, 0, 1, 1], [], []>} : vector<20x32xf32>, vector<32x32xf32>, vector<20x32xf32> -> vector<20x32xf32>
    %721 = arith.addf %276, %720 : vector<20x32xf32>
    %722 = vector.extract_strided_slice %718 {offsets = [32, 0], sizes = [32, 32], strides = [1, 1]} : vector<256x32xf32> to vector<32x32xf32>
    %cst_120 = arith.constant dense<0.000000e+00> : vector<20x32xf32>
    %723 = tpu.matmul %639, %722, %cst_120 {dimension_numbers = #tpu.dot_dimension_numbers<[1], [0], [0], [1], [0, 0, 1, 1], [], []>} : vector<20x32xf32>, vector<32x32xf32>, vector<20x32xf32> -> vector<20x32xf32>
    %724 = arith.addf %721, %723 : vector<20x32xf32>
    %725 = vector.extract_strided_slice %718 {offsets = [64, 0], sizes = [32, 32], strides = [1, 1]} : vector<256x32xf32> to vector<32x32xf32>
    %cst_121 = arith.constant dense<0.000000e+00> : vector<20x32xf32>
    %726 = tpu.matmul %652, %725, %cst_121 {dimension_numbers = #tpu.dot_dimension_numbers<[1], [0], [0], [1], [0, 0, 1, 1], [], []>} : vector<20x32xf32>, vector<32x32xf32>, vector<20x32xf32> -> vector<20x32xf32>
    %727 = arith.addf %724, %726 : vector<20x32xf32>
    %728 = vector.extract_strided_slice %718 {offsets = [96, 0], sizes = [32, 32], strides = [1, 1]} : vector<256x32xf32> to vector<32x32xf32>
    %cst_122 = arith.constant dense<0.000000e+00> : vector<20x32xf32>
    %729 = tpu.matmul %665, %728, %cst_122 {dimension_numbers = #tpu.dot_dimension_numbers<[1], [0], [0], [1], [0, 0, 1, 1], [], []>} : vector<20x32xf32>, vector<32x32xf32>, vector<20x32xf32> -> vector<20x32xf32>
    %730 = arith.addf %727, %729 : vector<20x32xf32>
    %731 = vector.extract_strided_slice %718 {offsets = [128, 0], sizes = [32, 32], strides = [1, 1]} : vector<256x32xf32> to vector<32x32xf32>
    %cst_123 = arith.constant dense<0.000000e+00> : vector<20x32xf32>
    %732 = tpu.matmul %678, %731, %cst_123 {dimension_numbers = #tpu.dot_dimension_numbers<[1], [0], [0], [1], [0, 0, 1, 1], [], []>} : vector<20x32xf32>, vector<32x32xf32>, vector<20x32xf32> -> vector<20x32xf32>
    %733 = arith.addf %730, %732 : vector<20x32xf32>
    %734 = vector.extract_strided_slice %718 {offsets = [160, 0], sizes = [32, 32], strides = [1, 1]} : vector<256x32xf32> to vector<32x32xf32>
    %cst_124 = arith.constant dense<0.000000e+00> : vector<20x32xf32>
    %735 = tpu.matmul %691, %734, %cst_124 {dimension_numbers = #tpu.dot_dimension_numbers<[1], [0], [0], [1], [0, 0, 1, 1], [], []>} : vector<20x32xf32>, vector<32x32xf32>, vector<20x32xf32> -> vector<20x32xf32>
    %736 = arith.addf %733, %735 : vector<20x32xf32>
    %737 = vector.extract_strided_slice %718 {offsets = [192, 0], sizes = [32, 32], strides = [1, 1]} : vector<256x32xf32> to vector<32x32xf32>
    %cst_125 = arith.constant dense<0.000000e+00> : vector<20x32xf32>
    %738 = tpu.matmul %704, %737, %cst_125 {dimension_numbers = #tpu.dot_dimension_numbers<[1], [0], [0], [1], [0, 0, 1, 1], [], []>} : vector<20x32xf32>, vector<32x32xf32>, vector<20x32xf32> -> vector<20x32xf32>
    %739 = arith.addf %736, %738 : vector<20x32xf32>
    %740 = vector.extract_strided_slice %718 {offsets = [224, 0], sizes = [32, 32], strides = [1, 1]} : vector<256x32xf32> to vector<32x32xf32>
    %cst_126 = arith.constant dense<0.000000e+00> : vector<20x32xf32>
    %741 = tpu.matmul %717, %740, %cst_126 {dimension_numbers = #tpu.dot_dimension_numbers<[1], [0], [0], [1], [0, 0, 1, 1], [], []>} : vector<20x32xf32>, vector<32x32xf32>, vector<20x32xf32> -> vector<20x32xf32>
    %742 = arith.addf %739, %741 : vector<20x32xf32>
    %743 = vector.extract_strided_slice %742 {offsets = [0, 0], sizes = [16, 32], strides = [1, 1]} : vector<20x32xf32> to vector<16x32xf32>
    %c0_127 = arith.constant 0 : index
    %c0_128 = arith.constant 0 : index
    %c0_129 = arith.constant 0 : index
    %744 = vector.load %arg29[%c0_127, %c0_128, %c0_129] : memref<1x16x32xf32, #tpu.memory_space<vmem>>, vector<1x16x32xf32>
    %745 = vector.shape_cast %744 : vector<1x16x32xf32> to vector<16x32xf32>
    %746 = vector.shape_cast %743 : vector<16x32xf32> to vector<1x16x32xf32>
    tpu.vector_store %arg29[%c0_127, %c0_128, %c0_129], %746 {strides = array<i32>} : memref<1x16x32xf32, #tpu.memory_space<vmem>>, vector<1x16x32xf32>,
    return
  }
  func.func @transform_0(%arg0: i32, %arg1: i32, %arg2: memref<2xi32, #tpu.memory_space<smem>>, %arg3: memref<2xi32, #tpu.memory_space<smem>>) -> (i32, i32, i32) {
    %c0_i32 = arith.constant 0 : i32
    %c0_i32_0 = arith.constant 0 : i32
    return %arg0, %arg1, %c0_i32 : i32, i32, i32
  }
  func.func @transform_1(%arg0: i32, %arg1: i32, %arg2: memref<2xi32, #tpu.memory_space<smem>>, %arg3: memref<2xi32, #tpu.memory_space<smem>>) -> (i32, i32) {
    %c0_i32 = arith.constant 0 : i32
    %c0_i32_0 = arith.constant 0 : i32
    return %arg1, %c0_i32 : i32, i32
  }
  func.func @transform_2(%arg0: i32, %arg1: i32, %arg2: memref<2xi32, #tpu.memory_space<smem>>, %arg3: memref<2xi32, #tpu.memory_space<smem>>) -> (i32, i32, i32) {
    %c0_i32 = arith.constant 0 : i32
    %c0_i32_0 = arith.constant 0 : i32
    %c0_i32_1 = arith.constant 0 : i32
    return %arg0, %c0_i32, %c0_i32_0 : i32, i32, i32
  }
  func.func @transform_3(%arg0: i32, %arg1: i32, %arg2: memref<2xi32, #tpu.memory_space<smem>>, %arg3: memref<2xi32, #tpu.memory_space<smem>>) -> (i32, i32, i32) {
    %c0_i32 = arith.constant 0 : i32
    %c0_i32_0 = arith.constant 0 : i32
    %c0_i32_1 = arith.constant 0 : i32
    return %arg0, %c0_i32, %c0_i32_0 : i32, i32, i32
  }
  func.func @transform_4(%arg0: i32, %arg1: i32, %arg2: memref<2xi32, #tpu.memory_space<smem>>, %arg3: memref<2xi32, #tpu.memory_space<smem>>) -> (i32, i32, i32) {
    %c0_i32 = arith.constant 0 : i32
    %c0_i32_0 = arith.constant 0 : i32
    %c0_i32_1 = arith.constant 0 : i32
    return %arg0, %c0_i32, %c0_i32_0 : i32, i32, i32
  }
  func.func @transform_5(%arg0: i32, %arg1: i32, %arg2: memref<2xi32, #tpu.memory_space<smem>>, %arg3: memref<2xi32, #tpu.memory_space<smem>>) -> (i32, i32, i32) {
    %c0_i32 = arith.constant 0 : i32
    %c0_i32_0 = arith.constant 0 : i32
    %c0_i32_1 = arith.constant 0 : i32
    return %arg0, %c0_i32, %c0_i32_0 : i32, i32, i32
  }
  func.func @transform_6(%arg0: i32, %arg1: i32, %arg2: memref<2xi32, #tpu.memory_space<smem>>, %arg3: memref<2xi32, #tpu.memory_space<smem>>) -> (i32, i32, i32) {
    %c0_i32 = arith.constant 0 : i32
    %c0_i32_0 = arith.constant 0 : i32
    %c0_i32_1 = arith.constant 0 : i32
    return %arg0, %c0_i32, %c0_i32_0 : i32, i32, i32
  }
  func.func @transform_7(%arg0: i32, %arg1: i32, %arg2: memref<2xi32, #tpu.memory_space<smem>>, %arg3: memref<2xi32, #tpu.memory_space<smem>>) -> (i32, i32, i32) {
    %c0_i32 = arith.constant 0 : i32
    %c0_i32_0 = arith.constant 0 : i32
    %c0_i32_1 = arith.constant 0 : i32
    return %arg0, %c0_i32, %c0_i32_0 : i32, i32, i32
  }
  func.func @transform_8(%arg0: i32, %arg1: i32, %arg2: memref<2xi32, #tpu.memory_space<smem>>, %arg3: memref<2xi32, #tpu.memory_space<smem>>) -> (i32, i32) {
    %c0_i32 = arith.constant 0 : i32
    %c0_i32_0 = arith.constant 0 : i32
    %c0_i32_1 = arith.constant 0 : i32
    return %c0_i32, %c0_i32_0 : i32, i32
  }
  func.func @transform_9(%arg0: i32, %arg1: i32, %arg2: memref<2xi32, #tpu.memory_space<smem>>, %arg3: memref<2xi32, #tpu.memory_space<smem>>) -> (i32, i32) {
    %c0_i32 = arith.constant 0 : i32
    %c0_i32_0 = arith.constant 0 : i32
    %c0_i32_1 = arith.constant 0 : i32
    return %c0_i32, %c0_i32_0 : i32, i32
  }
  func.func @transform_10(%arg0: i32, %arg1: i32, %arg2: memref<2xi32, #tpu.memory_space<smem>>, %arg3: memref<2xi32, #tpu.memory_space<smem>>) -> (i32, i32) {
    %c0_i32 = arith.constant 0 : i32
    %c0_i32_0 = arith.constant 0 : i32
    %c0_i32_1 = arith.constant 0 : i32
    return %c0_i32, %c0_i32_0 : i32, i32
  }
  func.func @transform_11(%arg0: i32, %arg1: i32, %arg2: memref<2xi32, #tpu.memory_space<smem>>, %arg3: memref<2xi32, #tpu.memory_space<smem>>) -> (i32, i32) {
    %c0_i32 = arith.constant 0 : i32
    %c0_i32_0 = arith.constant 0 : i32
    %c0_i32_1 = arith.constant 0 : i32
    return %c0_i32, %c0_i32_0 : i32, i32
  }
  func.func @transform_12(%arg0: i32, %arg1: i32, %arg2: memref<2xi32, #tpu.memory_space<smem>>, %arg3: memref<2xi32, #tpu.memory_space<smem>>) -> (i32, i32) {
    %c0_i32 = arith.constant 0 : i32
    %c0_i32_0 = arith.constant 0 : i32
    %c0_i32_1 = arith.constant 0 : i32
    return %c0_i32, %c0_i32_0 : i32, i32
  }
  func.func @transform_13(%arg0: i32, %arg1: i32, %arg2: memref<2xi32, #tpu.memory_space<smem>>, %arg3: memref<2xi32, #tpu.memory_space<smem>>) -> (i32, i32) {
    %c0_i32 = arith.constant 0 : i32
    %c0_i32_0 = arith.constant 0 : i32
    %c0_i32_1 = arith.constant 0 : i32
    return %c0_i32, %c0_i32_0 : i32, i32
  }
  func.func @transform_14(%arg0: i32, %arg1: i32, %arg2: memref<2xi32, #tpu.memory_space<smem>>, %arg3: memref<2xi32, #tpu.memory_space<smem>>) -> (i32, i32) {
    %c0_i32 = arith.constant 0 : i32
    %c0_i32_0 = arith.constant 0 : i32
    %c0_i32_1 = arith.constant 0 : i32
    return %c0_i32, %c0_i32_0 : i32, i32
  }
  func.func @transform_15(%arg0: i32, %arg1: i32, %arg2: memref<2xi32, #tpu.memory_space<smem>>, %arg3: memref<2xi32, #tpu.memory_space<smem>>) -> (i32, i32) {
    %c0_i32 = arith.constant 0 : i32
    %c0_i32_0 = arith.constant 0 : i32
    %c0_i32_1 = arith.constant 0 : i32
    return %c0_i32, %c0_i32_0 : i32, i32
  }
  func.func @transform_16(%arg0: i32, %arg1: i32, %arg2: memref<2xi32, #tpu.memory_space<smem>>, %arg3: memref<2xi32, #tpu.memory_space<smem>>) -> (i32, i32) {
    %c0_i32 = arith.constant 0 : i32
    %c0_i32_0 = arith.constant 0 : i32
    %c0_i32_1 = arith.constant 0 : i32
    return %c0_i32, %c0_i32_0 : i32, i32
  }
  func.func @transform_17(%arg0: i32, %arg1: i32, %arg2: memref<2xi32, #tpu.memory_space<smem>>, %arg3: memref<2xi32, #tpu.memory_space<smem>>) -> (i32, i32) {
    %c0_i32 = arith.constant 0 : i32
    %c0_i32_0 = arith.constant 0 : i32
    %c0_i32_1 = arith.constant 0 : i32
    return %c0_i32, %c0_i32_0 : i32, i32
  }
  func.func @transform_18(%arg0: i32, %arg1: i32, %arg2: memref<2xi32, #tpu.memory_space<smem>>, %arg3: memref<2xi32, #tpu.memory_space<smem>>) -> (i32, i32) {
    %c0_i32 = arith.constant 0 : i32
    %c0_i32_0 = arith.constant 0 : i32
    %c0_i32_1 = arith.constant 0 : i32
    return %c0_i32, %c0_i32_0 : i32, i32
  }
  func.func @transform_19(%arg0: i32, %arg1: i32, %arg2: memref<2xi32, #tpu.memory_space<smem>>, %arg3: memref<2xi32, #tpu.memory_space<smem>>) -> (i32, i32) {
    %c0_i32 = arith.constant 0 : i32
    %c0_i32_0 = arith.constant 0 : i32
    %c0_i32_1 = arith.constant 0 : i32
    return %c0_i32, %c0_i32_0 : i32, i32
  }
  func.func @transform_20(%arg0: i32, %arg1: i32, %arg2: memref<2xi32, #tpu.memory_space<smem>>, %arg3: memref<2xi32, #tpu.memory_space<smem>>) -> (i32, i32) {
    %c0_i32 = arith.constant 0 : i32
    %c0_i32_0 = arith.constant 0 : i32
    %c0_i32_1 = arith.constant 0 : i32
    return %c0_i32, %c0_i32_0 : i32, i32
  }
  func.func @transform_21(%arg0: i32, %arg1: i32, %arg2: memref<2xi32, #tpu.memory_space<smem>>, %arg3: memref<2xi32, #tpu.memory_space<smem>>) -> (i32, i32) {
    %c0_i32 = arith.constant 0 : i32
    %c0_i32_0 = arith.constant 0 : i32
    %c0_i32_1 = arith.constant 0 : i32
    return %c0_i32, %c0_i32_0 : i32, i32
  }
  func.func @transform_22(%arg0: i32, %arg1: i32, %arg2: memref<2xi32, #tpu.memory_space<smem>>, %arg3: memref<2xi32, #tpu.memory_space<smem>>) -> (i32, i32) {
    %c0_i32 = arith.constant 0 : i32
    %c0_i32_0 = arith.constant 0 : i32
    %c0_i32_1 = arith.constant 0 : i32
    return %c0_i32, %c0_i32_0 : i32, i32
  }
  func.func @transform_23(%arg0: i32, %arg1: i32, %arg2: memref<2xi32, #tpu.memory_space<smem>>, %arg3: memref<2xi32, #tpu.memory_space<smem>>) -> (i32, i32) {
    %c0_i32 = arith.constant 0 : i32
    %c0_i32_0 = arith.constant 0 : i32
    %c0_i32_1 = arith.constant 0 : i32
    return %c0_i32, %c0_i32_0 : i32, i32
  }
  func.func @transform_24(%arg0: i32, %arg1: i32, %arg2: memref<2xi32, #tpu.memory_space<smem>>, %arg3: memref<2xi32, #tpu.memory_space<smem>>) -> (i32, i32) {
    %c0_i32 = arith.constant 0 : i32
    %c0_i32_0 = arith.constant 0 : i32
    %c0_i32_1 = arith.constant 0 : i32
    return %c0_i32, %c0_i32_0 : i32, i32
  }
  func.func @transform_25(%arg0: i32, %arg1: i32, %arg2: memref<2xi32, #tpu.memory_space<smem>>, %arg3: memref<2xi32, #tpu.memory_space<smem>>) -> (i32, i32, i32) {
    %c0_i32 = arith.constant 0 : i32
    %c0_i32_0 = arith.constant 0 : i32
    return %arg0, %arg1, %c0_i32 : i32, i32, i32
  }
}

module attributes {stable_mosaic.version = 11 : i64} {
  func.func @_combine_kernel(%arg0: i32, %arg1: memref<2x32x32xf32, #tpu.memory_space<vmem>>, %arg2: memref<2x32x1xf32, #tpu.memory_space<vmem>>, %arg3: memref<32x32xf32, #tpu.memory_space<vmem>>, %arg4: memref<32x32xf32, #tpu.memory_space<vmem>>) attributes {dimension_semantics = [#tpu.dimension_semantics<arbitrary>], iteration_bounds = array<i64: 1>, scalar_prefetch = 0 : i64, scratch_operands = 0 : i64, tpu.core_type = #tpu.core_type<tc>, window_params = [{pipeline_mode = #tpu.pipeline_mode<synchronous>, transform_indices = @transform_0, window_bounds = array<i64: 2, 32, 32>}, {pipeline_mode = #tpu.pipeline_mode<synchronous>, transform_indices = @transform_1, window_bounds = array<i64: 2, 32, 1>}, {pipeline_mode = #tpu.pipeline_mode<synchronous>, transform_indices = @transform_2, window_bounds = array<i64: 32, 32>}, {pipeline_mode = #tpu.pipeline_mode<synchronous>, transform_indices = @transform_3, window_bounds = array<i64: 32, 32>}]} {
    %c0 = arith.constant 0 : index
    %c0_0 = arith.constant 0 : index
    %0 = vector.load %arg3[%c0, %c0_0] : memref<32x32xf32, #tpu.memory_space<vmem>>, vector<32x32xf32>
    %c0_1 = arith.constant 0 : index
    %c0_2 = arith.constant 0 : index
    %c0_3 = arith.constant 0 : index
    %1 = vector.load %arg1[%c0_1, %c0_2, %c0_3] : memref<2x32x32xf32, #tpu.memory_space<vmem>>, vector<1x32x32xf32>
    %2 = vector.shape_cast %1 : vector<1x32x32xf32> to vector<32x32xf32>
    %c0_4 = arith.constant 0 : index
    %c0_5 = arith.constant 0 : index
    %c0_6 = arith.constant 0 : index
    %3 = vector.load %arg2[%c0_4, %c0_5, %c0_6] : memref<2x32x1xf32, #tpu.memory_space<vmem>>, vector<1x32x1xf32>
    %4 = vector.shape_cast %3 : vector<1x32x1xf32> to vector<32x1xf32>
    %5 = vector.broadcast %4 : vector<32x1xf32> to vector<32x32xf32>
    %6 = arith.mulf %2, %5 : vector<32x32xf32>
    %7 = arith.addf %0, %6 : vector<32x32xf32>
    %c1 = arith.constant 1 : index
    %c0_7 = arith.constant 0 : index
    %c0_8 = arith.constant 0 : index
    %8 = vector.load %arg1[%c1, %c0_7, %c0_8] : memref<2x32x32xf32, #tpu.memory_space<vmem>>, vector<1x32x32xf32>
    %9 = vector.shape_cast %8 : vector<1x32x32xf32> to vector<32x32xf32>
    %c1_9 = arith.constant 1 : index
    %c0_10 = arith.constant 0 : index
    %c0_11 = arith.constant 0 : index
    %10 = vector.load %arg2[%c1_9, %c0_10, %c0_11] : memref<2x32x1xf32, #tpu.memory_space<vmem>>, vector<1x32x1xf32>
    %11 = vector.shape_cast %10 : vector<1x32x1xf32> to vector<32x1xf32>
    %12 = vector.broadcast %11 : vector<32x1xf32> to vector<32x32xf32>
    %13 = arith.mulf %9, %12 : vector<32x32xf32>
    %14 = arith.addf %7, %13 : vector<32x32xf32>
    %c0_12 = arith.constant 0 : index
    %c0_13 = arith.constant 0 : index
    %15 = vector.load %arg4[%c0_12, %c0_13] : memref<32x32xf32, #tpu.memory_space<vmem>>, vector<32x32xf32>
    tpu.vector_store %arg4[%c0_12, %c0_13], %14 {strides = array<i32>} : memref<32x32xf32, #tpu.memory_space<vmem>>, vector<32x32xf32>,
    return
  }
  func.func @transform_0(%arg0: i32) -> (i32, i32, i32) {
    %c0_i32 = arith.constant 0 : i32
    %c0_i32_0 = arith.constant 0 : i32
    %c0_i32_1 = arith.constant 0 : i32
    %c0_i32_2 = arith.constant 0 : i32
    return %c0_i32, %c0_i32_0, %c0_i32_1 : i32, i32, i32
  }
  func.func @transform_1(%arg0: i32) -> (i32, i32, i32) {
    %c0_i32 = arith.constant 0 : i32
    %c0_i32_0 = arith.constant 0 : i32
    %c0_i32_1 = arith.constant 0 : i32
    %c0_i32_2 = arith.constant 0 : i32
    return %c0_i32, %c0_i32_0, %c0_i32_1 : i32, i32, i32
  }
  func.func @transform_2(%arg0: i32) -> (i32, i32) {
    %c0_i32 = arith.constant 0 : i32
    %c0_i32_0 = arith.constant 0 : i32
    %c0_i32_1 = arith.constant 0 : i32
    return %c0_i32, %c0_i32_0 : i32, i32
  }
  func.func @transform_3(%arg0: i32) -> (i32, i32) {
    %c0_i32 = arith.constant 0 : i32
    %c0_i32_0 = arith.constant 0 : i32
    %c0_i32_1 = arith.constant 0 : i32
    return %c0_i32, %c0_i32_0 : i32, i32
  }
}

</mosaic_0001>

<bundles_post_ra>
// kernel: _forward.3
= control target key start
LH: loop header
LB: loop body
LE: loop exit
PB: predicated region body
PF: predicated region fallthrough
CT: control target
= control target key end

     0   :  { %s1382_s21 = smov 0   ;;  %s1498_s0 = inlined_call_operand.vmem [shape: f32[32,32], index: 0, kind: input, shape index: {}]   ;;  %s1499_s1 = inlined_call_operand.vmem [shape: f32[2,32,64], index: 1, kind: input, shape index: {}]   ;;  %s1500_s2 = inlined_call_operand.vmem [shape: f32[2,1,64], index: 2, kind: input, shape index: {}]   ;;  %s1501_s3 = inlined_call_operand.vmem [shape: f32[2,64,64], index: 3, kind: input, shape index: {}]   ;;  %s1502_s4 = inlined_call_operand.vmem [shape: f32[2,192,64], index: 4, kind: input, shape index: {}]   ;;  %s1503_s5 = inlined_call_operand.vmem [shape: f32[2,1,64], index: 5, kind: input, shape index: {}]   ;;  %s1504_s6 = inlined_call_operand.vmem [shape: f32[2,32,64], index: 6, kind: output, shape index: {}]  }
   0x1 LB: > { %s1087_s22 = sadd.s32 4294967295, %s1345_s21   ;;  %p1091_p0 = scmp.ge.s32.totalorder %s1345_s21, 1  ;;  %s1345_s21 = sphi %s1382_s21, %s16_s21  }
   0x2   : > { %p248_p1 = scmp.lt.s32.totalorder %s1345_s21, 3 }
   0x4   : > { %p249_p2 = pnand %p1091_p0, %p248_p1 }
   0x5   : > { %p294_p3 = scmp.lt.s32.totalorder (!%p249_p2), %s1087_s22, 1 }
   0x6   : > { %252 = sbr.rel (%p249_p2) target bundleno = 843 (0x34b), region = 44 }
   0xb   : > { %v320_v0 = vld [vmem:[%s1498_s0] sm:$0xff]  ;;  %vm335_vm0 = vcmask 261120   ;;  %s1506_s22 = smov (!%p294_p3, %s1087_s22), 1  ;;  %v321_v8 = vld [vmem:[%s1498_s0 + $0x8] sm:$0xff]  ;;  %v322_v10 = vld [vmem:[%s1498_s0 + $0x10] sm:$0xff]  ;;  %vm445_vm1 = vcmask 523264  }
   0xc   : > { %1206 = vmatprep.mubr.msk.f32.mxu0 %vm335_vm0, %v320_v0  ;;  %s1127_s25 = sshll.u32 %s1506_s22, 5  ;;  %s1128_s29 = sshll.u32 %s1506_s22, 6  ;;  %v323_v12 = vld [vmem:[%s1498_s0 + $0x18] sm:$0xff] }
   0xd   : > { %s298_s28 = scalar_lea.vmem %s1499_s1, %s1127_s25  ;;  %s1406_s8 = scalar_lea.vmem %s1501_s3, %s1128_s29 }
   0xe   : > { %v327_v1 = vld [vmem:[%s298_s28 + $0x18] sm:$0xff]  ;;  %v326_v2 = vld [vmem:[%s298_s28 + $0x10] sm:$0xff]  ;;  %v325_v3 = vld [vmem:[%s298_s28 + $0x8] sm:$0xff]  ;;  %s1322_s15 = smul.u32 192, %s1506_s22  ;;  %s301_s23 = scalar_lea.vmem %s1500_s2, %s1506_s22 }
   0xf   : > { %1198 = vmatprep.subr.mxu0 %v327_v1  ;;  %v440_v4 = vld [vmem:[%s1406_s8 + $0x38] sm:$0xff]  ;;  %v439_v5 = vld [vmem:[%s1406_s8 + $0x30] sm:$0xff]  ;;  %v324_v6 = vld [vmem:[%s298_s28] sm:$0xff]  ;;  %s314_s27 = scalar_lea.vmem %s1503_s5, %s1506_s22  ;;  %s319_s30 = scalar_lea.vmem %s1504_s6, %s1127_s25 }
  0x10   : > { %1199 = vmatpush3.msra.mxu0 %v327_v1  ;;  %1212 = vmatprep.subr.mxu1 %v440_v4  ;;  %v438_v7 = vld [vmem:[%s1406_s8 + $0x28] sm:$0xff]  ;;  %v437_v9 = vld [vmem:[%s1406_s8 + $0x20] sm:$0xff]  ;;  %v436_v11 = vld [vmem:[%s1406_s8 + $0x18] sm:$0xff]  ;;  %s1431_s18 = scalar_lea.vmem %s1502_s4, %s1322_s15 }
  0x11   : > { %1200 = vmatprep.subr.mxu0 %v326_v2  ;;  %1213 = vmatpush3.msra.mxu1 %v440_v4  ;;  %v435_v13 = vld [vmem:[%s1406_s8 + $0x10] sm:$0xff]  ;;  %v434_v14 = vld [vmem:[%s1406_s8 + $0x8] sm:$0xff]  ;;  %v433_v15 = vld [vmem:[%s1406_s8] sm:$0xff] }
  0x12   : > { %1201 = vmatpush3.msra.mxu0 %v326_v2  ;;  %1214 = vmatprep.subr.mxu1 %v439_v5  ;;  %v663_v16 = vld [vmem:[%s1431_s18 + $0x38] sm:$0xff]  ;;  %v1099_v18 = vld [vmem:[%s301_s23] ss:$0 sm:$0xff]  ;;  %v662_v23 = vld [vmem:[%s1431_s18 + $0x30] sm:$0xff] }
  0x13   : > { %1202 = vmatprep.subr.mxu0 %v325_v3  ;;  %1215 = vmatpush3.msra.mxu1 %v439_v5  ;;  %v661_v26 = vld [vmem:[%s1431_s18 + $0x28] sm:$0xff]  ;;  %v660_v28 = vld [vmem:[%s1431_s18 + $0x20] sm:$0xff]  ;;  %v659_v29 = vld [vmem:[%s1431_s18 + $0x18] sm:$0xff] }
  0x14   : > { %1203 = vmatpush3.msra.mxu0 %v325_v3  ;;  %1216 = vmatprep.subr.mxu1 %v438_v7  ;;  %v658_v30 = vld [vmem:[%s1431_s18 + $0x10] sm:$0xff]  ;;  %v657_v31 = vld [vmem:[%s1431_s18 + $0x8] sm:$0xff]  ;;  %v656_v32 = vld [vmem:[%s1431_s18] sm:$0xff] }
  0x15   : > { %1204 = vmatprep.subr.mxu0 %v324_v6  ;;  %1217 = vmatpush3.msra.mxu1 %v438_v7  ;;  %v671_v33 = vld [vmem:[%s1431_s18 + $0x78] sm:$0xff]  ;;  %v678_v35 = vld [vmem:[%s1431_s18 + $0xb0] sm:$0xff]  ;;  %v677_v36 = vld [vmem:[%s1431_s18 + $0xa8] sm:$0xff] }
  0x16   : > { %1205 = vmatpush3.msra.mxu0 %v324_v6  ;;  %1218 = vmatprep.subr.mxu1 %v437_v9  ;;  %v679_v34 = vld [vmem:[%s1431_s18 + $0xb8] sm:$0xff]  ;;  %v676_v37 = vld [vmem:[%s1431_s18 + $0xa0] sm:$0xff]  ;;  %v670_v51 = vld [vmem:[%s1431_s18 + $0x70] sm:$0xff] }
  0x17   : > { %1207 = vmatmul.mubr.msk.f32.vlgmr.msra.gmra.mxu0 %vm335_vm0, %v321_v8  ;;  %1219 = vmatpush3.msra.mxu1 %v437_v9  ;;  %v669_v54 = vld [vmem:[%s1431_s18 + $0x68] sm:$0xff]  ;;  %v668_v56 = vld [vmem:[%s1431_s18 + $0x60] sm:$0xff]  ;;  %v667_v57 = vld [vmem:[%s1431_s18 + $0x58] sm:$0xff] }
  0x18   : > { %1209 = vmatprep.mubr.msk.f32.mxu0 %vm335_vm0, %v322_v10  ;;  %1220 = vmatprep.subr.mxu1 %v436_v11  ;;  %v666_v58 = vld [vmem:[%s1431_s18 + $0x50] sm:$0xff]  ;;  %v665_v59 = vld [vmem:[%s1431_s18 + $0x48] sm:$0xff]  ;;  %v664_v60 = vld [vmem:[%s1431_s18 + $0x40] sm:$0xff] }
  0x19   : > { %1234 = vmatprep.subr.mxu0 %v440_v4  ;;  %1221 = vmatpush3.msra.mxu1 %v436_v11  ;;  %v675_v61 = vld [vmem:[%s1431_s18 + $0x98] sm:$0xff]  ;;  %v674_v62 = vld [vmem:[%s1431_s18 + $0x90] sm:$0xff]  ;;  %v673_v63 = vld [vmem:[%s1431_s18 + $0x88] sm:$0xff] }
  0x1a   : > { %1235 = vmatpush3.msra.mxu0 %v440_v4  ;;  %1222 = vmatprep.subr.mxu1 %v435_v13  ;;  %v672_v0 = vld [vmem:[%s1431_s18 + $0x80] sm:$0xff] }
  0x1b   : > { %1210 = vmatmul.mubr.msk.f32.gmra.mxu0 %vm335_vm0, %v323_v12  ;;  %1223 = vmatpush3.msra.mxu1 %v435_v13 }
  0x1c   : > { %1236 = vmatprep.subr.mxu0 %v439_v5  ;;  %1224 = vmatprep.subr.mxu1 %v434_v14 }
  0x1d   : > { %1237 = vmatpush3.msra.mxu0 %v439_v5  ;;  %1225 = vmatpush3.msra.mxu1 %v434_v14 }
  0x1e   : > { %1238 = vmatprep.subr.mxu0 %v438_v7  ;;  %1226 = vmatprep.subr.mxu1 %v433_v15 }
  0x1f   : > { %1239 = vmatpush3.msra.mxu0 %v438_v7  ;;  %1227 = vmatpush3.msra.mxu1 %v433_v15 }
  0x20   : > { %1240 = vmatprep.subr.mxu0 %v437_v9  ;;  %1256 = vmatprep.subr.mxu1 %v663_v16 }
  0x21   : > { %1241 = vmatpush3.msra.mxu0 %v437_v9 }
  0x22   : > { %1242 = vmatprep.subr.mxu0 %v436_v11 }
  0x23   : > { %1243 = vmatpush3.msra.mxu0 %v436_v11 }
  0x24   : > { %1244 = vmatprep.subr.mxu0 %v435_v13 }
  0x25   : > { %1245 = vmatpush3.msra.mxu0 %v435_v13 }
  0x26   : > { %1246 = vmatprep.subr.mxu0 %v434_v14 }
  0x27   : > { %1247 = vmatpush3.msra.mxu0 %v434_v14 }
  0x28   : > { %1248 = vmatprep.subr.mxu0 %v433_v15 }
  0x29   : > { %1249 = vmatpush3.msra.mxu0 %v433_v15 }
  0x2a   : > { %1278 = vmatprep.subr.mxu0 %v671_v33 }
  0xd7   : > { %v1208_v17 = vpop.f32.mrf.mxu0 }
  0xd8   : > { %v420_v21 = vadd.f32 %v1208_v17, %v1099_v18 }
  0xd9   : > { %v414_v19 = vpop.f32.mrf.mxu0 }
  0xda   : > { %v415_v20 = vadd.f32 %v1099_v18, %v414_v19  ;;  %v442_v43 = vmul.f32 0.3, %v420_v21 }
  0xdb   : > { %v1211_v22 = vpop.f32.mrf.mxu0 }
  0xdc   : > { %1228 = vmatprep.mubr.msk.f32.mxu1 %vm445_vm1, %v415_v20  ;;  %v430_v27 = vadd.f32 %v1211_v22, %v1099_v18  ;;  %v441_v41 = vmul.f32 0.3, %v415_v20 }
  0xdd   : > { %v424_v24 = vpop.f32.mrf.mxu0  ;;  %1229 = vmatmul.mubr.msk.f32.vlgmr.msra.gmra.mxu1 %vm445_vm1, %v420_v21 }
  0xde   : > { %v425_v25 = vadd.f32 %v1099_v18, %v424_v24  ;;  %1257 = vmatpush3.msra.mxu1 %v663_v16  ;;  %v444_v52 = vmul.f32 0.3, %v430_v27  ;;  %v1116_v16 = vld [vmem:[%s314_s27] ss:$0 sm:$0xff] }
  0xdf   : > { %1258 = vmatprep.subr.mxu1 %v662_v23 }
  0xe0   : > { %1259 = vmatpush3.msra.mxu1 %v662_v23  ;;  %1231 = vmatprep.mubr.msk.f32.mxu1 %vm445_vm1, %v425_v25  ;;  %v443_v49 = vmul.f32 0.3, %v425_v25 }
  0xe1   : > { %1260 = vmatprep.subr.mxu1 %v661_v26  ;;  %1232 = vmatmul.mubr.msk.f32.gmra.mxu1 %vm445_vm1, %v430_v27 }
  0xe2   : > { %1261 = vmatpush3.msra.mxu1 %v661_v26  ;;  %1272 = vmatprep.mubr.msk.f32.mxu1 %vm445_vm1, %v415_v20 }
  0xe3   : > { %1262 = vmatprep.subr.mxu1 %v660_v28 }
  0xe4   : > { %1263 = vmatpush3.msra.mxu1 %v660_v28 }
  0xe5   : > { %1264 = vmatprep.subr.mxu1 %v659_v29 }
  0xe6   : > { %1265 = vmatpush3.msra.mxu1 %v659_v29 }
  0xe7   : > { %1266 = vmatprep.subr.mxu1 %v658_v30 }
  0xe8   : > { %1267 = vmatpush3.msra.mxu1 %v658_v30 }
  0xe9   : > { %1268 = vmatprep.subr.mxu1 %v657_v31 }
  0xea   : > { %1269 = vmatpush3.msra.mxu1 %v657_v31 }
  0xeb   : > { %1270 = vmatprep.subr.mxu1 %v656_v32 }
  0xec   : > { %1271 = vmatpush3.msra.mxu1 %v656_v32 }
  0xed   : > { %1273 = vmatmul.mubr.msk.f32.vlgmr.msra.gmra.mxu1 %vm445_vm1, %v420_v21  ;;  %1300 = vmatprep.subr.mxu1 %v679_v34 }
  0xee   : > { %1275 = vmatprep.mubr.msk.f32.mxu1 %vm445_vm1, %v425_v25  ;;  %1301 = vmatpush3.msra.mxu1 %v679_v34 }
  0xef   : > { %1302 = vmatprep.subr.mxu1 %v678_v35 }
  0xf0   : > { %1303 = vmatpush3.msra.mxu1 %v678_v35 }
  0xf1   : > { %1276 = vmatmul.mubr.msk.f32.gmra.mxu1 %vm445_vm1, %v430_v27  ;;  %1304 = vmatprep.subr.mxu1 %v677_v36 }
  0xf2   : > { %1305 = vmatpush3.msra.mxu1 %v677_v36 }
  0xf3   : > { %1306 = vmatprep.subr.mxu1 %v676_v37 }
  0xf4   : > { %1307 = vmatpush3.msra.mxu1 %v676_v37 }
  0xf5   : > { %1308 = vmatprep.subr.mxu1 %v675_v61 }
  0xf6   : > { %1309 = vmatpush3.msra.mxu1 %v675_v61 }
  0xf7   : > { %1310 = vmatprep.subr.mxu1 %v674_v62 }
  0xf8   : > { %1311 = vmatpush3.msra.mxu1 %v674_v62 }
  0xf9   : > { %1312 = vmatprep.subr.mxu1 %v673_v63 }
  0xfa   : > { %1313 = vmatpush3.msra.mxu1 %v673_v63 }
  0xfb   : > { %1314 = vmatprep.subr.mxu1 %v672_v0 }
  0xfc   : > { %1315 = vmatpush3.msra.mxu1 %v672_v0 }
 0x19d   : > { %v1230_v38 = vpop.f32.mrf.mxu1 }
 0x19e   : > { %v544_v39 = vmul.f32 0.7, %v1230_v38 }
 0x19f   : > { %v524_v40 = vpop.f32.mrf.mxu1 }
 0x1a0   : > { %v543_v42 = vmul.f32 0.7, %v524_v40  ;;  %v548_v46 = vadd.f32 %v544_v39, %v442_v43 }
 0x1a1   : > { %v1233_v44 = vpop.f32.mrf.mxu1 }
 0x1a2   : > { %v547_v45 = vadd.f32 %v543_v42, %v441_v41  ;;  %v546_v47 = vmul.f32 0.7, %v1233_v44 }
 0x1a3   : > { %v534_v48 = vpop.f32.mrf.mxu1 }
 0x1a4   : > { %v545_v50 = vmul.f32 0.7, %v534_v48  ;;  %1250 = vmatprep.mubr.msk.f32.mxu0 %vm445_vm1, %v547_v45  ;;  %v550_v55 = vadd.f32 %v546_v47, %v444_v52 }
 0x1a5   : > { %1251 = vmatmul.mubr.msk.f32.vlgmr.msra.gmra.mxu0 %vm445_vm1, %v548_v46 }
 0x1a6   : > { %v549_v53 = vadd.f32 %v545_v50, %v443_v49  ;;  %1279 = vmatpush3.msra.mxu0 %v671_v33 }
 0x1a7   : > { %1280 = vmatprep.subr.mxu0 %v670_v51 }
 0x1a8   : > { %1281 = vmatpush3.msra.mxu0 %v670_v51  ;;  %1253 = vmatprep.mubr.msk.f32.mxu0 %vm445_vm1, %v549_v53 }
 0x1a9   : > { %1282 = vmatprep.subr.mxu0 %v669_v54  ;;  %1254 = vmatmul.mubr.msk.f32.gmra.mxu0 %vm445_vm1, %v550_v55 }
 0x1aa   : > { %1283 = vmatpush3.msra.mxu0 %v669_v54  ;;  %1294 = vmatprep.mubr.msk.f32.mxu0 %vm445_vm1, %v547_v45 }
 0x1ab   : > { %1284 = vmatprep.subr.mxu0 %v668_v56 }
 0x1ac   : > { %1285 = vmatpush3.msra.mxu0 %v668_v56 }
 0x1ad   : > { %1286 = vmatprep.subr.mxu0 %v667_v57  ;;  %v1274_v13 = vpop.f32.mrf.mxu1 }
 0x1ae   : > { %1287 = vmatpush3.msra.mxu0 %v667_v57  ;;  %v773_v19 = vadd.f32 %v1274_v13, %v1116_v16 }
 0x1af   : > { %1288 = vmatprep.subr.mxu0 %v666_v58  ;;  %v747_v14 = vpop.f32.mrf.mxu1 }
 0x1b0   : > { %1289 = vmatpush3.msra.mxu0 %v666_v58  ;;  %v772_v22 = vadd.f32 %v1116_v16, %v747_v14 }
 0x1b1   : > { %1290 = vmatprep.subr.mxu0 %v665_v59  ;;  %v1277_v17 = vpop.f32.mrf.mxu1 }
 0x1b2   : > { %1291 = vmatpush3.msra.mxu0 %v665_v59  ;;  %v775_v25 = vadd.f32 %v1277_v17, %v1116_v16 }
 0x1b3   : > { %1292 = vmatprep.subr.mxu0 %v664_v60  ;;  %v757_v20 = vpop.f32.mrf.mxu1 }
 0x1b4   : > { %1293 = vmatpush3.msra.mxu0 %v664_v60  ;;  %v774_v30 = vadd.f32 %v1116_v16, %v757_v20 }
 0x1b5   : > { %1295 = vmatmul.mubr.msk.f32.vlgmr.msra.gmra.mxu0 %vm445_vm1, %v548_v46 }
 0x1b6   : > { %1297 = vmatprep.mubr.msk.f32.mxu0 %vm445_vm1, %v549_v53 }
 0x1b9   : > { %1298 = vmatmul.mubr.msk.f32.gmra.mxu0 %vm445_vm1, %v550_v55 }
 0x265   : > { %v1252_v1 = vpop.f32.mrf.mxu0 }
 0x266   : > { %v649_v2 = vmul.f32 0.7, %v1252_v1 }
 0x267   : > { %v629_v3 = vpop.f32.mrf.mxu0 }
 0x268   : > { %v648_v4 = vmul.f32 0.7, %v629_v3  ;;  %v653_v7 = vadd.f32 %v649_v2, %v442_v43 }
 0x269   : > { %v1255_v5 = vpop.f32.mrf.mxu0 }
 0x26a   : > { %v652_v6 = vadd.f32 %v648_v4, %v441_v41  ;;  %v651_v8 = vmul.f32 0.7, %v1255_v5 }
 0x26b   : > { %v639_v9 = vpop.f32.mrf.mxu0 }
 0x26c   : > { %v650_v10 = vmul.f32 0.7, %v639_v9  ;;  %1316 = vmatprep.mubr.msk.f32.mxu1 %vm445_vm1, %v652_v6  ;;  %v655_v12 = vadd.f32 %v651_v8, %v444_v52 }
 0x26d   : > { %1317 = vmatmul.mubr.msk.f32.vlgmr.msra.gmra.mxu1 %vm445_vm1, %v653_v7 }
 0x26e   : > { %v654_v11 = vadd.f32 %v650_v10, %v443_v49 }
 0x270   : > { %1319 = vmatprep.mubr.msk.f32.mxu1 %vm445_vm1, %v654_v11 }
 0x271   : > { %1320 = vmatmul.mubr.msk.f32.gmra.mxu1 %vm445_vm1, %v655_v12 }
 0x275   : > { %v1296_v15 = vpop.f32.mrf.mxu0 }
 0x276   : > { %v862_v23 = vadd.f32 %v1296_v15, %v773_v19 }
 0x277   : > { %v842_v18 = vpop.f32.mrf.mxu0 }
 0x278   : > { %v861_v26 = vadd.f32 %v842_v18, %v772_v22 }
 0x279   : > { %v1299_v21 = vpop.f32.mrf.mxu0 }
 0x27a   : > { %v864_v31 = vadd.f32 %v1299_v21, %v775_v25 }
 0x27b   : > { %v852_v28 = vpop.f32.mrf.mxu0 }
 0x27c   : > { %v863_v35 = vadd.f32 %v852_v28, %v774_v30 }
 0x32d   : > { %v1318_v24 = vpop.f32.mrf.mxu1 }
 0x32e   : > { %v963_v27 = vadd.f32 %v1318_v24, %v862_v23 }
 0x32f   : > { %v943_v29 = vpop.f32.mrf.mxu1 }
 0x330   : > { %v971_v32 = vmul.f32 0.70710677, %v963_v27  ;;  %v962_v33 = vadd.f32 %v943_v29, %v861_v26  ;;  %v967_v43 = vmul.f32 0.5, %v963_v27 }
 0x331   : > { %v1321_v34 = vpop.f32.mrf.mxu1 }
 0x332   : > { %1331 = verf.f32 %v971_v32  ;;  %v970_v36 = vmul.f32 0.70710677, %v962_v33  ;;  %v965_v37 = vadd.f32 %v1321_v34, %v864_v31  ;;  %v966_v47 = vmul.f32 0.5, %v962_v33 }
 0x333   : > { %v953_v38 = vpop.f32.mrf.mxu1 }
 0x334   : > { %1333 = verf.f32 %v970_v36  ;;  %v973_v39 = vmul.f32 0.70710677, %v965_v37  ;;  %v964_v40 = vadd.f32 %v953_v38, %v863_v35  ;;  %v969_v51 = vmul.f32 0.5, %v965_v37 }
 0x336   : > { %1335 = verf.f32 %v973_v39  ;;  %v972_v41 = vmul.f32 0.70710677, %v964_v40  ;;  %v968_v55 = vmul.f32 0.5, %v964_v40 }
 0x338   : > { %1337 = verf.f32 %v972_v41 }
 0x33f   : > { %v1332_v42 = vpop.eup %1331 }
 0x340   : > { %v979_v44 = vadd.f32 1.0, %v1332_v42 }
 0x341   : > { %v1334_v45 = vpop.eup %1333 }
 0x342   : > { %v983_v46 = vmul.f32 %v979_v44, %v967_v43  ;;  %v978_v48 = vadd.f32 1.0, %v1334_v45 }
 0x343   : > { %v1336_v49 = vpop.eup %1335 }
 0x344   : > { %987 = vst.msk [vmem:[%s319_s30 + $0x8] sm:$0xff] %vm445_vm1, %v983_v46  ;;  %v982_v50 = vmul.f32 %v978_v48, %v966_v47  ;;  %v981_v52 = vadd.f32 1.0, %v1336_v49 }
 0x345   : > { %v1338_v53 = vpop.eup %1337 }
 0x346   : > { %986 = vst.msk [vmem:[%s319_s30] sm:$0xff] %vm445_vm1, %v982_v50  ;;  %v985_v54 = vmul.f32 %v981_v52, %v969_v51  ;;  %v980_v56 = vadd.f32 1.0, %v1338_v53 }
 0x348   : > { %989 = vst.msk [vmem:[%s319_s30 + $0x18] sm:$0xff] %vm445_vm1, %v985_v54  ;;  %v984_v57 = vmul.f32 %v980_v56, %v968_v55 }
 0x34a   : > { %988 = vst.msk [vmem:[%s319_s30 + $0x10] sm:$0xff] %vm445_vm1, %v984_v57 }
 0x34b PF: > { %s16_s21 = sadd.s32 1, %s1345_s21  }
 0x34c   : > { %p13_p4 = scmp.ge.s32.totalorder %s16_s21, 4  }
 0x34e   :  { %15 = sbr.rel (!%p13_p4) target bundleno = 1 (0x1), region = 86 }

// kernel: _forward.5
= control target key start
LH: loop header
LB: loop body
LE: loop exit
PB: predicated region body
PF: predicated region fallthrough
CT: control target
= control target key end

     0   :  { %v150_v2 = vmov 0   ;;  %s241_s0 = inlined_call_operand.vmem [shape: f32[2,32,32], index: 0, kind: input, shape index: {}]   ;;  %s242_s1 = inlined_call_operand.vmem [shape: f32[2,32,1], index: 1, kind: input, shape index: {}]   ;;  %s243_s2 = inlined_call_operand.vmem [shape: f32[32,32], index: 2, kind: input, shape index: {}]   ;;  %s244_s3 = inlined_call_operand.hbm [shape: f32[32,32], index: 3, kind: output, shape index: {}]  }
   0x1   :  { %v25_v0 = vld [vmem:[%s242_s1 + $0x10] sm:$0xff]  ;;  %v23_v1 = vld [vmem:[%s242_s1] sm:$0xff]  ;;  %127 = vset.pattern.permute.xlu1 %v150_v2  ;;  %126 = vset.pattern.permute.xlu0 %v150_v2  ;;  %v26_v3 = vld [vmem:[%s242_s1 + $0x18] sm:$0xff] }
   0x2   :  { %39 = vperm.xlu1 %127, %v25_v0   ;;  %29 = vperm.xlu0 %126, %v23_v1   ;;  %v24_v4 = vld [vmem:[%s242_s1 + $0x8] sm:$0xff] }
   0x6   :  { %44 = vperm.xlu1 %127, %v26_v3   ;;  %34 = vperm.xlu0 %126, %v24_v4  }
   0x7   :  { %8 = vsyncpa [#allocation3], 0  ;;  %v119_v5 = vld [vmem:[%s242_s1 + $0x28] sm:$0xff]  ;;  %v118_v6 = vld [vmem:[%s242_s1 + $0x20] sm:$0xff]  ;;  %vm93_vm0 = vcmask 261120   ;;  %s151_s24 = smov [#allocation2]  }
   0x8   :  { %v121_v7 = vld [vmem:[%s242_s1 + $0x38] sm:$0xff]  ;;  %v120_v8 = vld [vmem:[%s242_s1 + $0x30] sm:$0xff]  ;;  %v19_v11 = vld [vmem:[%s241_s0] sm:$0xff]  ;;  %s103_s25 = sshll.u32 %s151_s24, 4  ;;  %s104_s25 = int_to_ptr.vmem [resolvable:$true] %s103_s25 }
   0x9   :  { %v20_v12 = vld [vmem:[%s241_s0 + $0x8] sm:$0xff]  ;;  %v21_v16 = vld [vmem:[%s241_s0 + $0x10] sm:$0xff]  ;;  %v15_v17 = vld [vmem:[%s243_s2] sm:$0xff]  ;;  %p133_p1 = scmp.lt.s32.totalorder %s104_s25, %s104_s25 }
   0xa   :  { %72 = vperm.xlu1 %127, %v119_v5   ;;  %67 = vperm.xlu0 %126, %v118_v6   ;;  %v22_v18 = vld [vmem:[%s241_s0 + $0x18] sm:$0xff]  ;;  %v16_v20 = vld [vmem:[%s243_s2 + $0x8] sm:$0xff]  ;;  %v114_v22 = vld [vmem:[%s241_s0 + $0x20] sm:$0xff] }
   0xb   :  { %v115_v21 = vld [vmem:[%s241_s0 + $0x28] sm:$0xff]  ;;  %v17_v27 = vld [vmem:[%s243_s2 + $0x10] sm:$0xff]  ;;  %v18_v32 = vld [vmem:[%s243_s2 + $0x18] sm:$0xff] }
   0xc   :  { %v117_v33 = vld [vmem:[%s241_s0 + $0x38] sm:$0xff]  ;;  %v116_v34 = vld [vmem:[%s241_s0 + $0x30] sm:$0xff]  ;;  %s128_s0 = scalar_lea.vmem %s104_s25, 512 }
   0xd   :  { %p129_p0 = scmp.ne.s32.totalorder %s104_s25, %s128_s0  ;;  %p134_p2 = scmp.lt.s32.totalorder %s128_s0, %s128_s0 }
   0xe   :  { %82 = vperm.xlu1 %127, %v121_v7   ;;  %77 = vperm.xlu0 %126, %v120_v8  }
   0xf   :  { %p135_p3 = por %p134_p2, %p133_p1 }
  0x11   :  { %p136_p4 = pnand %p135_p3, %p129_p0 }
  0x7d   :  { %v40_v9 = vpop.permute.xlu1 %39  ;;  %v30_v10 = vpop.permute.xlu0 %29 }
  0x7e   :  { %v47_v13 = vmul.f32 %v30_v10, %v19_v11  ;;  %v49_v23 = vmul.f32 %v40_v9, %v21_v16 }
  0x80   :  { %v51_v24 = vadd.f32 %v47_v13, %v15_v17  ;;  %v53_v39 = vadd.f32 %v49_v23, %v17_v27 }
  0x81   :  { %v45_v14 = vpop.permute.xlu1 %44  ;;  %v35_v15 = vpop.permute.xlu0 %34 }
  0x82   :  { %v48_v19 = vmul.f32 %v35_v15, %v20_v12  ;;  %v50_v28 = vmul.f32 %v45_v14, %v22_v18 }
  0x84   :  { %v52_v29 = vadd.f32 %v48_v19, %v16_v20  ;;  %v54_v40 = vadd.f32 %v50_v28, %v18_v32 }
  0x85   :  { %v73_v25 = vpop.permute.xlu1 %72  ;;  %v68_v26 = vpop.permute.xlu0 %67 }
  0x86   :  { %v86_v30 = vmul.f32 %v115_v21, %v73_v25  ;;  %v85_v31 = vmul.f32 %v114_v22, %v68_v26 }
  0x88   :  { %v90_v35 = vadd.f32 %v86_v30, %v52_v29  ;;  %v89_v36 = vadd.f32 %v85_v31, %v51_v24 }
  0x89   :  { %v83_v37 = vpop.permute.xlu1 %82  ;;  %v78_v38 = vpop.permute.xlu0 %77 }
  0x8a   :  { %95 = vst.msk [vmem:[#allocation2 + $0x8] sm:$0xff] %vm93_vm0, %v90_v35  ;;  %94 = vst.msk [vmem:[#allocation2] sm:$0xff] %vm93_vm0, %v89_v36  ;;  %v88_v41 = vmul.f32 %v117_v33, %v83_v37  ;;  %v87_v42 = vmul.f32 %v116_v34, %v78_v38 }
  0x8c   :  { %v92_v43 = vadd.f32 %v88_v41, %v54_v40  ;;  %v91_v44 = vadd.f32 %v87_v42, %v53_v39 }
  0x8e   :  { %97 = vst.msk [vmem:[#allocation2 + $0x18] sm:$0xff] %vm93_vm0, %v92_v43  ;;  %96 = vst.msk [vmem:[#allocation2 + $0x10] sm:$0xff] %vm93_vm0, %v91_v44 }
  0x8f   :  { %139 = shalt.err (!%p136_p4)
}
  0x90   :  { %s152_s2 = smov 128   ;;  %s153_s26 = smov 8  }
  0x91   :  { %109 = dma.vmem_to_hbm [thread:$0]  %s104_s25, 512, %s244_s3, [#allocation3], %s152_s2, %s152_s2, %s153_s26  }
  0x92   :  { %148 = dma.done.wait [#allocation3], 512  }
  0x93   :  { %149 = vsyncadd [#allocation3], 4294966784 }
  0x94   :  { %113 = vsyncpa [#allocation3], 1 }

// kernel: _forward.4
= control target key start
LH: loop header
LB: loop body
LE: loop exit
PB: predicated region body
PF: predicated region fallthrough
CT: control target
= control target key end

     0   :  { %s8169_s0 = inlined_call_operand.vmem [shape: s32[2], index: 0, kind: input, shape index: {}]   ;;  %s8170_s2 = inlined_call_operand.vmem [shape: f32[2,256,8], index: 2, kind: input, shape index: {}]   ;;  %s8171_s3 = inlined_call_operand.vmem [shape: f32[32,32], index: 3, kind: input, shape index: {}]   ;;  %s8172_s4 = inlined_call_operand.vmem [shape: f32[2,16,128], index: 4, kind: input, shape index: {}]   ;;  %s8173_s5 = inlined_call_operand.vmem [shape: f32[2,16,1], index: 5, kind: input, shape index: {}]   ;;  %s8174_s6 = inlined_call_operand.vmem [shape: f32[2,8,32], index: 6, kind: input, shape index: {}]   ;;  %s8175_s7 = inlined_call_operand.vmem [shape: f32[2,1,32], index: 7, kind: input, shape index: {}]   ;;  %s8176_s8 = inlined_call_operand.vmem [shape: f32[2,1,32], index: 8, kind: input, shape index: {}]   ;;  %s8177_s9 = inlined_call_operand.vmem [shape: f32[2,1,32], index: 9, kind: input, shape index: {}]   ;;  %s8178_s10 = inlined_call_operand.vmem [shape: f32[32,96], index: 10, kind: input, shape index: {}]   ;;  %s8179_s11 = inlined_call_operand.vmem [shape: f32[1,96], index: 11, kind: input, shape index: {}]   ;;  %s8180_s12 = inlined_call_operand.vmem [shape: f32[32,32], index: 12, kind: input, shape index: {}]   ;;  %s8181_s13 = inlined_call_operand.vmem [shape: f32[1,32], index: 13, kind: input, shape index: {}]   ;;  %s8182_s14 = inlined_call_operand.vmem [shape: f32[32,64], index: 14, kind: input, shape index: {}]   ;;  %s8183_s15 = inlined_call_operand.vmem [shape: f32[1,64], index: 15, kind: input, shape index: {}]   ;;  %s8184_s16 = inlined_call_operand.vmem [shape: f32[64,32], index: 16, kind: input, shape index: {}]   ;;  %s8185_s17 = inlined_call_operand.vmem [shape: f32[1,32], index: 17, kind: input, shape index: {}]   ;;  %s8186_s18 = inlined_call_operand.vmem [shape: f32[1,32], index: 18, kind: input, shape index: {}]   ;;  %s8187_s19 = inlined_call_operand.vmem [shape: f32[1,32], index: 19, kind: input, shape index: {}]   ;;  %s8188_s20 = inlined_call_operand.vmem [shape: f32[1,32], index: 20, kind: input, shape index: {}]   ;;  %s8189_s21 = inlined_call_operand.vmem [shape: f32[1,32], index: 21, kind: input, shape index: {}]   ;;  %s8190_s22 = inlined_call_operand.vmem [shape: f32[1,32], index: 22, kind: input, shape index: {}]   ;;  %s8191_s23 = inlined_call_operand.vmem [shape: f32[1,32], index: 23, kind: input, shape index: {}]   ;;  %s8192_s24 = inlined_call_operand.vmem [shape: f32[32,32], index: 24, kind: input, shape index: {}]   ;;  %s8193_s25 = inlined_call_operand.vmem [shape: f32[256,32], index: 25, kind: input, shape index: {}]   ;;  %s8194_s26 = inlined_call_operand.vmem [shape: f32[12,32], index: 26, kind: input, shape index: {}]   ;;  %s8195_s27 = inlined_call_operand.vmem [shape: f32[2,32,32], index: 27, kind: output, shape index: {}]   ;;  %s8196_s1 = inlined_call_operand.vmem [shape: s32[2], index: 1, kind: input, shape index: {}]  }
   0x1   :  { %8225 = sst [smem:[#allocation25_spill]] %s8169_s0 }
   0x2   :  { %8226 = sst [smem:[#allocation26_spill]] %s8170_s2 }
   0x3   :  { %8227 = sst [smem:[#allocation27_spill]] %s8171_s3 }
   0x4   :  { %8228 = sst [smem:[#allocation28_spill]] %s8172_s4 }
   0x5   :  { %8229 = sst [smem:[#allocation29_spill]] %s8173_s5 }
   0x6   :  { %8230 = sst [smem:[#allocation30_spill]] %s8174_s6  ;;  %s36_s6 = sshll.u32 %s8196_s1, 4  ;;  %s37_s6 = int_to_ptr.vmem [resolvable:$true] %s36_s6 }
   0x7   :  { %8231 = sst [smem:[#allocation31_spill]] %s8175_s7 }
   0x8   :  { %8232 = sst [smem:[#allocation32_spill]] %s8176_s8 }
   0x9   :  { %8233 = sst [smem:[#allocation33_spill]] %s8177_s9 }
   0xa   :  { %8234 = sst [smem:[#allocation34_spill]] %s8178_s10 }
   0xb   :  { %8235 = sst [smem:[#allocation35_spill]] %s8179_s11 }
   0xc   :  { %8236 = sst [smem:[#allocation36_spill]] %s8180_s12 }
   0xd   :  { %8237 = sst [smem:[#allocation37_spill]] %s8190_s22 }
   0xe   :  { %8238 = sst [smem:[#allocation38_spill]] %s8191_s23 }
   0xf   :  { %8239 = sst [smem:[#allocation39_spill]] %s8192_s24 }
  0x10   :  { %8240 = sst [smem:[#allocation40_spill]] %s8195_s27 }
  0x11   :  { %s8241_s9 = sld [smem:[#allocation25_spill]] }
  0x17   :  { %s32_s22 = sshll.u32 %s8241_s9, 4  ;;  %s33_s22 = int_to_ptr.vmem [resolvable:$true] %s32_s22 }
  0x18   :  { %s6052_s28 = scalar_lea.vmem %s33_s22, 16  ;;  %p6057_p1 = scmp.lt.s32.totalorder %s33_s22, %s33_s22 }
  0x19   :  { %p6053_p0 = scmp.ne.s32.totalorder %s33_s22, %s6052_s28  ;;  %p6058_p2 = scmp.lt.s32.totalorder %s6052_s28, %s6052_s28 }
  0x1b   :  { %p6059_p3 = por %p6058_p2, %p6057_p1 }
  0x1d   :  { %p6060_p4 = pnand %p6059_p3, %p6053_p0 }
  0x1f   :  { %6063 = shalt.err (!%p6060_p4)  }
  0x20   :  { %s6118_s0 = smov [#allocation3]   ;;  %s6064_s11 = scalar_lea.vmem %s37_s6, 16 }
  0x21   :  { %35 = dma.vmem_to_smem %s33_s22, 16, %s6118_s0, [#allocation2] }
  0x22   :  { %p6065_p5 = scmp.ne.s32.totalorder %s37_s6, %s6064_s11  ;;  %p6069_p6 = scmp.lt.s32.totalorder %s37_s6, %s37_s6 }
  0x23   :  { %p6070_p7 = scmp.lt.s32.totalorder %s6064_s11, %s6064_s11 }
  0x25   :  { %p6071_p8 = por %p6070_p7, %p6069_p6 }
  0x27   :  { %p6072_p9 = pnand %p6071_p8, %p6065_p5 }
  0x29   :  { %6075 = shalt.err (!%p6072_p9)  }
  0x2a   :  { %s6119_s29 = smov [#allocation4]  }
  0x2b   :  { %39 = dma.vmem_to_smem %s37_s6, 16, %s6119_s29, [#allocation2] }
  0x2c   :  { %6096 = dma.done.wait [#allocation2], 32 }
  0x2d   :  { %6097 = vsyncadd [#allocation2], 4294967264 }
  0x2e   :  { %41 = sfence }
  0x2f   :  { %s6280_s1 = smov 0   ;;  %s6282_s2 = smov 0  }
  0x30   :  { %s6284_s7 = smov 0   ;;  %s6286_s12 = smov 0  }
  0x31   :  { %s6288_s22 = smov 0  }
  0x32 LB: > { %8242 = sst [smem:[#allocation6_spill]] %s6108_s7  ;;  %s56_s3 = sadd.s32 1, %s6108_s7  ;;  %s6116_s22 = sphi %s6288_s22, %s47_s22   ;;  %s6112_s12 = sphi %s6286_s12, %s8314_s12   ;;  %s6108_s7 = sphi %s6284_s7, %s8313_s7   ;;  %s6104_s2 = sphi %s6282_s2, %s8312_s2   ;;  %s6100_s1 = sphi %s6280_s1, %s8311_s1  }
  0x33   : > { %8243 = sst [smem:[#allocation7_spill]] %s6112_s12  ;;  %s59_s4 = sadd.s32 1, %s6112_s12 }
  0x34   : > { %8244 = sst [smem:[#allocation8_spill]] %s6116_s22  ;;  %p57_p10 = scmp.ge.s32.totalorder %s56_s3, 2 }
  0x35   : > { %p5069_p11 = scmp.ge.s32.totalorder %s6116_s22, 1  ;;  %p784_p12 = scmp.lt.s32.totalorder %s6116_s22, 5 }
  0x36   : > { %s8316_s3 = smov (%p57_p10, %s56_s3), 0  ;;  %s8318_s4 = smov (!%p57_p10, %s59_s4), %s6112_s12 }
  0x37   : > { %8245 = sst [smem:[#allocation9_spill]] %s8316_s3  ;;  %p785_p13 = pnand %p5069_p11, %p784_p12 }
  0x38   : > { %p61_p0 = scmp.ge.s32.totalorder %s8318_s4, 2 }
  0x39   : > { %788 = sbr.rel (%p785_p13) target bundleno = 5592 (0x15d8), region = 120 }
  0x3a   : > { %s8320_s4 = smov (%p61_p0, %s8318_s4), 0 }
  0x3b   : > { %8246 = sst [smem:[#allocation10_spill]] %s8320_s4 }
  0x3e   : > { %s5070_s8 = sshll.u32 %s6100_s1, 4  ;;  %p889_p1 = scmp.lt.s32.totalorder %s6104_s2, 1  ;;  %v6120_v0 = vmov 0   ;;  %vm1055_vm0 = vcmask 64512   ;;  %vm1141_vm1 = vcmask 261120   ;;  %v8203_v49 = vmov 0.0  }
  0x3f   : > { %p891_p2 = scmp.lt.s32.totalorder %s5070_s8, 31  ;;  %5895 = vset.pattern.permute.xlu0 %v6120_v0  ;;  %s8247_s0 = sld [smem:[#allocation28_spill]]  ;;  %vm6122_vm2 = vmmov 0   ;;  %v1185_v56 = vlaneseq  ;;  %vm1200_vm4 = vcmask 130048   ;;  %vm1528_vm10 = vcmask 162816  }
  0x40   : > { %s6317_s5 = scalar_select %p889_p1, %s6104_s2, 1  ;;  %vm1535_vm15 = vcmask 158720  }
  0x41   : > { %s8322_s8 = smov (!%p891_p2, %s5070_s8), 31  ;;  %s8248_s12 = sld [smem:[#allocation29_spill]]  ;;  %v6387_v61 = vshrl.u32 %v1185_v56, 7  ;;  %v6389_v62 = vand.u32 127, %v1185_v56 }
  0x42   : > { %s5071_s9 = sshll.u32 %s6317_s5, 5  ;;  %s5230_s30 = sshll.u32 %s6317_s5, 4 }
  0x43   : > { %s894_s10 = sadd.s32 %s5071_s9, %s8322_s8  ;;  %s8249_s23 = sld [smem:[#allocation26_spill]]  ;;  %vm1191_vm3 = vcmp.eq.s32.totalorder %v6387_v61, %v6389_v62 }
  0x44   : > { %s5072_s29 = sshll.u32 %s894_s10, 3  ;;  %s8251_s9 = sld [smem:[#allocation31_spill]] }
  0x45   : > { %s6324_s11 = scalar_lea.vmem %s8247_s0, %s5230_s30  ;;  %s8252_s28 = sld [smem:[#allocation27_spill]] }
  0x46   : > { %v942_v1 = vld [vmem:[%s6324_s11] sm:$0xff]  ;;  %v943_v20 = vld [vmem:[%s6324_s11 + $0x8] sm:$0xff]  ;;  %s8255_s8 = sld [smem:[#allocation34_spill]]  ;;  %s6127_s10 = smov 56  }
  0x47   : > { %s913_s7 = scalar_lea.vmem %s8248_s12, %s5230_s30  ;;  %5442 = vmatprep.mubr.f32.mxu0 %v942_v1  ;;  %s8250_s12 = sld [smem:[#allocation30_spill]] }
  0x48   : > { %v960_v2 = vld [vmem:[%s913_s7] sm:$0xff]  ;;  %v961_v5 = vld [vmem:[%s913_s7 + $0x8] sm:$0xff]  ;;  %s938_s27 = sld [smem:[#allocation3 + %s6104_s2]]  ;;  %s6128_s6 = smov 80  }
  0x49   : > { %s6333_s24 = scalar_lea.vmem %s8249_s23, %s5072_s29  ;;  %964 = vperm.xlu0 %5895, %v960_v2   ;;  %s5079_s23 = sshll.u32 %s6317_s5, 3 }
  0x4a   : > { %v959_v3 = vld [vmem:[%s6333_s24 + $0x78] sm:$0xff]  ;;  %v958_v4 = vld [vmem:[%s6333_s24 + $0x70] sm:$0xff]  ;;  %v957_v6 = vld [vmem:[%s6333_s24 + $0x68] sm:$0xff]  ;;  %s920_s30 = scalar_lea.vmem %s8251_s9, %s6317_s5  ;;  %s8253_s29 = sld [smem:[#allocation32_spill]] }
  0x4b   : > { %5410 = vmatprep.subr.mxu0 %v959_v3  ;;  %v956_v7 = vld [vmem:[%s6333_s24 + $0x60] sm:$0xff]  ;;  %v955_v8 = vld [vmem:[%s6333_s24 + $0x58] sm:$0xff]  ;;  %v954_v9 = vld [vmem:[%s6333_s24 + $0x50] sm:$0xff]  ;;  %s6130_s11 = smov 48   ;;  %s8309_s9 = sld [smem:[#allocation40_spill]] }
  0x4c   : > { %5411 = vmatpush3.msra.mxu0 %v959_v3  ;;  %v953_v10 = vld [vmem:[%s6333_s24 + $0x48] sm:$0xff]  ;;  %v952_v11 = vld [vmem:[%s6333_s24 + $0x40] sm:$0xff]  ;;  %v951_v12 = vld [vmem:[%s6333_s24 + $0x38] sm:$0xff]  ;;  %v6394_v3 = vadd.s32 8, %v6387_v61 }
  0x4d   : > { %5412 = vmatprep.subr.mxu0 %v958_v4  ;;  %969 = vperm.xlu0 %5895, %v961_v5   ;;  %v950_v13 = vld [vmem:[%s6333_s24 + $0x30] sm:$0xff]  ;;  %v949_v14 = vld [vmem:[%s6333_s24 + $0x28] sm:$0xff]  ;;  %v948_v15 = vld [vmem:[%s6333_s24 + $0x20] sm:$0xff]  ;;  %s917_s22 = scalar_lea.vmem %s8250_s12, %s5079_s23  ;;  %s8254_s12 = sld [smem:[#allocation33_spill]] }
  0x4e   : > { %5413 = vmatpush3.msra.mxu0 %v958_v4  ;;  %v947_v16 = vld [vmem:[%s6333_s24 + $0x18] sm:$0xff]  ;;  %v946_v17 = vld [vmem:[%s6333_s24 + $0x10] sm:$0xff]  ;;  %v945_v18 = vld [vmem:[%s6333_s24 + $0x8] sm:$0xff]  ;;  %vm1192_vm5 = vcmp.eq.s32.totalorder %v6394_v3, %v6389_v62  ;;  %s939_s7 = scvt.s32.f32 %s938_s27 }
  0x4f   : > { %5414 = vmatprep.subr.mxu0 %v957_v6  ;;  %v944_v19 = vld [vmem:[%s6333_s24] sm:$0xff]  ;;  %s5073_s24 = sshll.u32 %s6100_s1, 1 }
  0x50   : > { %5415 = vmatpush3.msra.mxu0 %v957_v6  ;;  %v1047_v21 = vld [vmem:[%s917_s22] sm:$0xff]  ;;  %p899_p3 = scmp.lt.s32.totalorder %s5073_s24, 3  ;;  %s923_s23 = scalar_lea.vmem %s8253_s29, %s6317_s5  ;;  %v5088_v6 = vsel %vm1191_vm3, 1.0, %v8203_v49  ;;  %vm1580_vm3 = vcmask 1043456  }
  0x51   : > { %5416 = vmatprep.subr.mxu0 %v956_v7  ;;  %5445 = vmatprep.subr.mxu1 %v1047_v21  ;;  %v5083_v28 = vld [vmem:[%s920_s30] ss:$0 sm:$0xff]  ;;  %s8256_s29 = sld [smem:[#allocation35_spill]] }
  0x52   : > { %5417 = vmatpush3.msra.mxu0 %v956_v7  ;;  %5446 = vmatpush3.msra.mxu1 %v1047_v21  ;;  %s8324_s24 = smov (!%p899_p3, %s5073_s24), 3  ;;  %v5086_v58 = vld [vmem:[%s923_s23] ss:$0 sm:$0xff]  ;;  %v6401_v7 = vadd.s32 16, %v6387_v61  ;;  %s6123_s23 = smov 96  }
  0x53   : > { %5418 = vmatprep.subr.mxu0 %v955_v8  ;;  %s5074_s3 = sshll.u32 %s8324_s24, 3  ;;  %5450 = vmatprep.subr.mxu1 %v8203_v49  ;;  %s926_s22 = scalar_lea.vmem %s8254_s12, %s6317_s5 }
  0x54   : > { %5419 = vmatpush3.msra.mxu0 %v955_v8  ;;  %s902_s0 = scalar_lea.vmem %s8252_s28, %s5074_s3  ;;  %v5087_v60 = vld [vmem:[%s926_s22] ss:$0 sm:$0xff]  ;;  %v1293_v8 = vld [vmem:[%s8255_s8 + $0x18] sm:$0xff]  ;;  %vm1193_vm6 = vcmp.eq.s32.totalorder %v6401_v7, %v6389_v62  ;;  %s937_s12 = sld [smem:[#allocation4 + %s6104_s2]] }
  0x55   : > { %5420 = vmatprep.subr.mxu0 %v954_v9  ;;  %v941_v30 = vld [vmem:[%s902_s0 + $0x8] sm:$0xff]  ;;  %v940_v33 = vld [vmem:[%s902_s0] sm:$0xff]  ;;  %s6124_s2 = smov 64   ;;  %s6125_s22 = smov 88  }
  0x56   : > { %5421 = vmatpush3.msra.mxu0 %v954_v9  ;;  %v1292_v9 = vld [vmem:[%s8255_s8 + $0x10] sm:$0xff]  ;;  %s6126_s3 = smov 120   ;;  %s8265_s30 = sld [smem:[#allocation36_spill]] }
  0x57   : > { %5422 = vmatprep.subr.mxu0 %v953_v10  ;;  %s6129_s28 = smov 112  }
  0x58   : > { %5423 = vmatpush3.msra.mxu0 %v953_v10  ;;  %v5089_v10 = vsel %vm1192_vm5, 1.0, %v8203_v49 }
  0x59   : > { %5424 = vmatprep.subr.mxu0 %v952_v11 }
  0x5a   : > { %5425 = vmatpush3.msra.mxu0 %v952_v11  ;;  %v1291_v11 = vld [vmem:[%s8255_s8 + $0x8] sm:$0xff] }
  0x5b   : > { %5426 = vmatprep.subr.mxu0 %v951_v12 }
  0x5c   : > { %5427 = vmatpush3.msra.mxu0 %v951_v12  ;;  %v1290_v12 = vld [vmem:[%s8255_s8] sm:$0xff] }
  0x5d   : > { %5428 = vmatprep.subr.mxu0 %v950_v13 }
  0x5e   : > { %5429 = vmatpush3.msra.mxu0 %v950_v13  ;;  %v5090_v13 = vsel %vm1193_vm6, 1.0, %v8203_v49 }
  0x5f   : > { %5430 = vmatprep.subr.mxu0 %v949_v14 }
  0x60   : > { %5431 = vmatpush3.msra.mxu0 %v949_v14 }
  0x61   : > { %5432 = vmatprep.subr.mxu0 %v948_v15 }
  0x62   : > { %5433 = vmatpush3.msra.mxu0 %v948_v15 }
  0x63   : > { %5434 = vmatprep.subr.mxu0 %v947_v16 }
  0x64   : > { %5435 = vmatpush3.msra.mxu0 %v947_v16 }
  0x65   : > { %5436 = vmatprep.subr.mxu0 %v946_v17 }
  0x66   : > { %5437 = vmatpush3.msra.mxu0 %v946_v17 }
  0x67   : > { %5438 = vmatprep.subr.mxu0 %v945_v18 }
  0x68   : > { %5439 = vmatpush3.msra.mxu0 %v945_v18 }
  0x69   : > { %5440 = vmatprep.subr.mxu0 %v944_v19 }
  0x6a   : > { %5441 = vmatpush3.msra.mxu0 %v944_v19 }
  0x6b   : > { %5443 = vmatmul.mubr.f32.vlgmr.msra.gmra.mxu0 %v943_v20  ;;  %5495 = vmatprep.subr.mxu0 %v8203_v49 }
  0x6c   : > { %5501 = vmatprep.mubr.msk.f32.mxu0 %vm6122_vm2, %v8203_v49 }
  0xc4   : > { %v965_v22 = vpop.permute.xlu0 %964 }
  0xc8   : > { %v970_v24 = vpop.permute.xlu0 %969 }
 0x12b   : > { %v5444_v23 = vpop.f32.mrf.mxu0 }
 0x12c   : > { %v1044_v27 = vadd.f32 %v5444_v23, %v970_v24  ;;  %v5094_v24 = vld [vmem:[%s8256_s29] ss:$0 sm:$0xff]  ;;  %s6131_s29 = smov 72  }
 0x12d   : > { %v1038_v25 = vpop.f32.mrf.mxu0 }
 0x12e   : > { %v1039_v26 = vadd.f32 %v1038_v25, %v965_v22 }
 0x130   : > { %5447 = vmatprep.mubr.msk.f32.mxu1 %vm1055_vm0, %v1039_v26 }
 0x131   : > { %5448 = vmatmul.mubr.msk.f32.vlgmr.msra.gmra.mxu1 %vm1055_vm0, %v1044_v27 }
 0x132   : > { %5454 = vmatprep.mubr.msk.f32.mxu1 %vm6122_vm2, %v8203_v49 }
 0x1f1   : > { %v5449_v29 = vpop.f32.mrf.mxu1 }
 0x1f2   : > { %v1134_v31 = vadd.f32 %v5449_v29, %v5083_v28 }
 0x1f3   : > { %v1128_v32 = vpop.f32.mrf.mxu1 }
 0x1f4   : > { %v1129_v34 = vadd.f32 %v5083_v28, %v1128_v32  ;;  %v1138_v35 = vadd.f32 %v1134_v31, %v941_v30 }
 0x1f6   : > { %v1145_v36 = vsel %vm1141_vm1, %v1138_v35, 0.0  ;;  %v1137_v37 = vadd.f32 %v1129_v34, %v940_v33  ;;  %v1396_v33 = vstv %s939_s7  ;;  %v1390_v34 = vcvt.s32.f32 %v6387_v61  ;;  %s6132_s7 = smov 104  }
 0x1f7   : > { %1146 = vadd.xlane.f32.xlu1 %v1145_v36  ;;  %v1391_v36 = vcvt.s32.f32 %v6394_v3 }
 0x1f8   : > { %v1142_v38 = vsel %vm1141_vm1, %v1137_v37, 0.0 }
 0x1fb   : > { %1143 = vadd.xlane.f32.xlu1 %v1142_v38 }
 0x280   : > { %v1147_v39 = vpop.xlane.xlu1 %1146 }
 0x281   : > { %v1150_v40 = vmul.f32 0.03125, %v1147_v39 }
 0x283   : > { %v1152_v41 = vsub.f32 %v1138_v35, %v1150_v40  ;;  %v1404_v35 = vcvt.s32.f32 %v6389_v62  ;;  %v1394_v40 = vadd.f32 0.5, %v1391_v36 }
 0x284   : > { %v1144_v42 = vpop.xlane.xlu1 %1143 }
 0x285   : > { %v1149_v43 = vmul.f32 0.03125, %v1144_v42  ;;  %v1154_v44 = vmul.f32 %v1152_v41, %v1152_v41  ;;  %v1405_v38 = vadd.f32 0.5, %v1404_v35 }
 0x287   : > { %v1151_v45 = vsub.f32 %v1137_v37, %v1149_v43  ;;  %v1158_v46 = vsel %vm1141_vm1, %v1154_v44, 0.0  ;;  %v1393_v37 = vadd.f32 0.5, %v1390_v34 }
 0x288   : > { %1159 = vadd.xlane.f32.xlu0 %v1158_v46 }
 0x289   : > { %v1153_v47 = vmul.f32 %v1151_v45, %v1151_v45 }
 0x28b   : > { %v1155_v48 = vsel %vm1141_vm1, %v1153_v47, 0.0 }
 0x28c   : > { %1156 = vadd.xlane.f32.xlu1 %v1155_v48  ;;  %v1411_v48 = vstv %s937_s12  ;;  %s8269_s12 = sld [smem:[#allocation37_spill]] }
 0x28d   : > { %vm6488_vm8 = vcmp.lt.s32.totalorder %v6389_v62, %v1411_v48  ;;  %v1416_v48 = vld [vmem:[%s8265_s30] sm:$0xff] }
 0x311   : > { %v1160_v50 = vpop.xlane.xlu0 %1159 }
 0x312   : > { %v1162_v51 = vmul.f32 0.03125, %v1160_v50 }
 0x314   : > { %v1164_v52 = vadd.f32 1e-05, %v1162_v51 }
 0x315   : > { %v1157_v53 = vpop.xlane.xlu1 %1156 }
 0x316   : > { %5896 = vrsqrt.f32 %v1164_v52  ;;  %v1161_v54 = vmul.f32 0.03125, %v1157_v53 }
 0x318   : > { %v1163_v55 = vadd.f32 1e-05, %v1161_v54 }
 0x31a   : > { %5898 = vrsqrt.f32 %v1163_v55 }
 0x31b   : > { %5900 = vrcp.f32 %v1396_v33 }
 0x323   : > { %v5897_v57 = vpop.eup %5896 }
 0x324   : > { %v1168_v59 = vmul.f32 %v5897_v57, %v1152_v41  ;;  %v1392_v41 = vcvt.s32.f32 %v6401_v7 }
 0x326   : > { %v1176_v63 = vmul.f32 %v5086_v58, %v1168_v59  ;;  %v1395_v44 = vadd.f32 0.5, %v1392_v41 }
 0x327   : > { %v5899_v0 = vpop.eup %5898 }
 0x328   : > { %v1184_v1 = vadd.f32 %v5087_v60, %v1176_v63  ;;  %v1167_v2 = vmul.f32 %v5899_v0, %v1151_v45  ;;  %v5901_v39 = vpop.eup %5900 }
 0x329   : > { %v1398_v42 = vmul.f32 %v5901_v39, %v1393_v37  ;;  %v1406_v43 = vmul.f32 %v5901_v39, %v1405_v38  ;;  %v1399_v47 = vmul.f32 %v5901_v39, %v1394_v40  ;;  %v1400_v52 = vmul.f32 %v5901_v39, %v1395_v44 }
 0x32a   : > { %5451 = vmatpush3.msra.mxu1 %v1184_v1  ;;  %v1175_v4 = vmul.f32 %v5086_v58, %v1167_v2 }
 0x32b   : > { %5452 = vmatprep.subr.mxu1 %v8203_v49  ;;  %v1401_v45 = vfloor.f32 %v1398_v42  ;;  %v1407_v46 = vfloor.f32 %v1406_v43  ;;  %v1402_v51 = vfloor.f32 %v1399_v47  ;;  %v1403_v56 = vfloor.f32 %v1400_v52 }
 0x32c   : > { %v1183_v5 = vadd.f32 %v5087_v60, %v1175_v4 }
 0x32d   : > { %vm1408_vm7 = vcmp.eq.f32.partialorder %v1401_v45, %v1407_v46  ;;  %vm1409_vm11 = vcmp.eq.f32.partialorder %v1402_v51, %v1407_v46  ;;  %vm1410_vm13 = vcmp.eq.f32.partialorder %v1403_v56, %v1407_v46 }
 0x32e   : > { %5453 = vmatpush3.msra.mxu1 %v1183_v5  ;;  %vm6494_vm9 = vmand %vm1408_vm7, %vm6488_vm8 }
 0x32f   : > { %5455 = vmatmul.mubr.msk.f32.vlgmr.msra.gmra.mxu1 %vm1200_vm4, %v5088_v6  ;;  %5463 = vmatprep.subr.mxu1 %v8203_v49  ;;  %vm6503_vm12 = vmand %vm1409_vm11, %vm6488_vm8 }
 0x330   : > { %5457 = vmatprep.mubr.msk.f32.mxu1 %vm6122_vm2, %v8203_v49  ;;  %5464 = vmatpush3.msra.mxu1 %v1293_v8  ;;  %vm6512_vm14 = vmand %vm1410_vm13, %vm6488_vm8 }
 0x331   : > { %5465 = vmatprep.subr.mxu1 %v8203_v49 }
 0x332   : > { %5466 = vmatpush3.msra.mxu1 %v1292_v9 }
 0x333   : > { %5458 = vmatmul.mubr.msk.f32.gmra.mxu1 %vm1200_vm4, %v5089_v10  ;;  %5467 = vmatprep.subr.mxu1 %v8203_v49 }
 0x334   : > { %5460 = vmatprep.mubr.msk.f32.mxu1 %vm6122_vm2, %v8203_v49  ;;  %5468 = vmatpush3.msra.mxu1 %v1291_v11 }
 0x335   : > { %5469 = vmatprep.subr.mxu1 %v8203_v49 }
 0x336   : > { %5470 = vmatpush3.msra.mxu1 %v1290_v12 }
 0x337   : > { %5461 = vmatmul.mubr.msk.f32.gmra.mxu1 %vm1200_vm4, %v5090_v13  ;;  %5480 = vmatprep.subr.mxu1 %v8203_v49  ;;  %vm2956_vm4 = vcmask 523264  }
 0x338   : > { %5471 = vmatprep.mubr.msk.f32.mxu1 %vm6122_vm2, %v8203_v49 }
 0x3ef   : > { %v6433_v14 = vpop.f32.mrf.mxu1 }
 0x3f0   : > { %5472 = vmatmul.mubr.msk.f32.vlgmr.msra.gmra.mxu1 %vm1141_vm1, %v6433_v14 }
 0x3f1   : > { %v5456_v15 = vpop.f32.mrf.mxu1  ;;  %5474 = vmatprep.mubr.msk.f32.mxu1 %vm6122_vm2, %v8203_v49 }
 0x3f3   : > { %v6439_v16 = vpop.f32.mrf.mxu1 }
 0x3f4   : > { %5475 = vmatmul.mubr.msk.f32.gmra.mxu1 %vm1141_vm1, %v6439_v16 }
 0x3f5   : > { %v5459_v17 = vpop.f32.mrf.mxu1  ;;  %5477 = vmatprep.mubr.msk.f32.mxu1 %vm6122_vm2, %v8203_v49 }
 0x3f7   : > { %v6445_v18 = vpop.f32.mrf.mxu1 }
 0x3f8   : > { %5478 = vmatmul.mubr.msk.f32.gmra.mxu1 %vm1141_vm1, %v6445_v18 }
 0x3f9   : > { %v5462_v19 = vpop.f32.mrf.mxu1  ;;  %5486 = vmatprep.mubr.msk.f32.mxu1 %vm6122_vm2, %v8203_v49 }
 0x4b0   : > { %v1376_v20 = vpop.f32.mrf.mxu1 }
 0x4b1   : > { %v6460_v29 = vadd.f32 %v5094_v24, %v1376_v20 }
 0x4b2   : > { %v5473_v21 = vpop.f32.mrf.mxu1 }
 0x4b4   : > { %v1381_v22 = vpop.f32.mrf.mxu1 }
 0x4b5   : > { %v6457_v28 = vadd.f32 %v5094_v24, %v1381_v22 }
 0x4b6   : > { %v5476_v23 = vpop.f32.mrf.mxu1 }
 0x4b8   : > { %v1386_v25 = vpop.f32.mrf.mxu1 }
 0x4b9   : > { %v6454_v26 = vadd.f32 %v5094_v24, %v1386_v25 }
 0x4ba   : > { %v5479_v27 = vpop.f32.mrf.mxu1 }
 0x4bb   : > { %1428 = vrot.lane.b32.xlu1 %v6454_v26, %s6123_s23 }
 0x4bf   : > { %1426 = vrot.lane.b32.xlu1 %v6457_v28, %s6123_s23 }
 0x4c3   : > { %1424 = vrot.lane.b32.xlu1 %v6460_v29, %s6123_s23 }
 0x52d   : > { %v1429_v30 = vpop.permute.xlu1 %1428 }
 0x52e   : > { %5481 = vmatpush3.xpose.msk.msra.mxu1 %vm1055_vm0, %v1429_v30 }
 0x52f   : > { %5482 = vmatprep.subr.mxu1 %v8203_v49 }
 0x531   : > { %v1427_v31 = vpop.permute.xlu1 %1426 }
 0x532   : > { %5483 = vmatpush3.xpose.msk.msra.mxu1 %vm1055_vm0, %v1427_v31 }
 0x533   : > { %5484 = vmatprep.subr.mxu1 %v8203_v49 }
 0x535   : > { %v1425_v32 = vpop.permute.xlu1 %1424 }
 0x536   : > { %5485 = vmatpush3.xpose.msk.msra.mxu1 %vm1055_vm0, %v1425_v32 }
 0x537   : > { %5510 = vmatprep.subr.mxu1 %v8203_v49 }
 0x539   : > { %5487 = vmatmul.mubr.msk.f32.vlgmr.msra.gmra.mxu1 %vm1055_vm0, %v6460_v29 }
 0x53a   : > { %5489 = vmatprep.mubr.msk.f32.mxu1 %vm6122_vm2, %v8203_v49  ;;  %5511 = vmatpush3.msra.mxu1 %v1416_v48 }
 0x53b   : > { %5536 = vmatprep.subr.mxu1 %v8203_v49 }
 0x53d   : > { %5490 = vmatmul.mubr.msk.f32.gmra.mxu1 %vm1055_vm0, %v6457_v28 }
 0x53e   : > { %5492 = vmatprep.mubr.msk.f32.mxu1 %vm6122_vm2, %v8203_v49 }
 0x541   : > { %5493 = vmatmul.mubr.msk.f32.gmra.mxu1 %vm1055_vm0, %v6454_v26 }
 0x542   : > { %5512 = vmatprep.mubr.msk.f32.mxu1 %vm6122_vm2, %v8203_v49 }
 0x5f9   : > { %v1508_v53 = vpop.f32.mrf.mxu1 }
 0x5fa   : > { %v1522_v55 = vmul.f32 0.35355338, %v1508_v53 }
 0x5fb   : > { %v5488_v57 = vpop.f32.mrf.mxu1 }
 0x5fc   : > { %v1525_v58 = vsel %vm6494_vm9, %v1522_v55, -1e+30 }
 0x5fd   : > { %v1513_v59 = vpop.f32.mrf.mxu1  ;;  %v1529_v60 = vsel %vm1528_vm10, %v1525_v58, -inf }
 0x5fe   : > { %v1523_v63 = vmul.f32 0.35355338, %v1513_v59  ;;  %1530 = vmax.xlane.f32.xlu1 %v1529_v60 }
 0x5ff   : > { %v5491_v0 = vpop.f32.mrf.mxu1 }
 0x600   : > { %v1526_v1 = vsel %vm6503_vm12, %v1523_v63, -1e+30 }
 0x601   : > { %v1518_v2 = vpop.f32.mrf.mxu1  ;;  %v1532_v3 = vsel %vm1528_vm10, %v1526_v1, -inf }
 0x602   : > { %v1524_v5 = vmul.f32 0.35355338, %v1518_v2  ;;  %1533 = vmax.xlane.f32.xlu0 %v1532_v3 }
 0x603   : > { %v5494_v6 = vpop.f32.mrf.mxu1 }
 0x604   : > { %v1527_v7 = vsel %vm6512_vm14, %v1524_v5, -1e+30 }
 0x605   : > { %v1536_v8 = vsel %vm1535_vm15, %v1527_v7, -inf }
 0x606   : > { %1537 = vmax.xlane.f32.xlu0 %v1536_v8 }
 0x60f   : > { %1565 = vrot.lane.b32.xlu1 %v6457_v28, %s6124_s2 }
 0x613   : > { %1767 = vrot.lane.b32.xlu1 %v6460_v29, %s6125_s22 }
 0x617   : > { %1763 = vrot.lane.b32.xlu1 %v6457_v28, %s6126_s3 }
 0x61c   : > { %1567 = vrot.lane.b32.xlu0 %v6454_v26, %s6124_s2 }
 0x620   : > { %1563 = vrot.lane.b32.xlu0 %v6460_v29, %s6124_s2 }
 0x624   : > { %1771 = vrot.lane.b32.xlu0 %v6454_v26, %s6125_s22 }
 0x687   : > { %v1531_v9 = vpop.xlane.xlu1 %1530 }
 0x688   : > { %v1539_v10 = vsub.f32 %v1525_v58, %v1531_v9 }
 0x68a   : > { %v1542_v11 = vmul.f32 1.442695, %v1539_v10 }
 0x68b   : > { %v1534_v12 = vpop.xlane.xlu0 %1533  ;;  %v1566_v22 = vpop.permute.xlu1 %1565 }
 0x68c   : > { %5902 = vpow2.f32 %v1542_v11  ;;  %v1540_v13 = vsub.f32 %v1526_v1, %v1534_v12 }
 0x68e   : > { %v1544_v15 = vmul.f32 1.442695, %v1540_v13 }
 0x68f   : > { %v1538_v17 = vpop.xlane.xlu0 %1537  ;;  %v1768_v44 = vpop.permute.xlu1 %1767 }
 0x690   : > { %5904 = vpow2.f32 %v1544_v15  ;;  %v1541_v19 = vsub.f32 %v1527_v7, %v1538_v17 }
 0x692   : > { %v1546_v20 = vmul.f32 1.442695, %v1541_v19 }
 0x693   : > { %v1568_v21 = vpop.permute.xlu0 %1567  ;;  %v1764_v46 = vpop.permute.xlu1 %1763 }
 0x694   : > { %5906 = vpow2.f32 %v1546_v20  ;;  %5496 = vmatpush3.msk.msra.mxu0 %vm1580_vm3, %v1568_v21 }
 0x695   : > { %5497 = vmatprep.subr.mxu0 %v8203_v49 }
 0x696   : > { %5498 = vmatpush3.msra.mxu0 %v1566_v22 }
 0x697   : > { %5499 = vmatprep.subr.mxu0 %v8203_v49  ;;  %v1564_v23 = vpop.permute.xlu0 %1563 }
 0x698   : > { %5500 = vmatpush3.msra.mxu0 %v1564_v23 }
 0x699   : > { %v5903_v24 = vpop.eup %5902  ;;  %5521 = vmatprep.subr.mxu0 %v8203_v49 }
 0x69a   : > { %v1548_v25 = vsel %vm1528_vm10, %v5903_v24, 0.0 }
 0x69b   : > { %1549 = vadd.xlane.f32.xlu0 %v1548_v25  ;;  %v1772_v33 = vpop.permute.xlu0 %1771 }
 0x69d   : > { %v5905_v27 = vpop.eup %5904 }
 0x69e   : > { %v1551_v30 = vsel %vm1528_vm10, %v5905_v27, 0.0 }
 0x69f   : > { %1552 = vadd.xlane.f32.xlu0 %v1551_v30 }
 0x6a1   : > { %v5907_v31 = vpop.eup %5906 }
 0x6a2   : > { %v1554_v32 = vsel %vm1535_vm15, %v5907_v31, 0.0 }
 0x6a3   : > { %1555 = vadd.xlane.f32.xlu0 %v1554_v32 }
 0x6b9   : > { %1769 = vrot.lane.b32.xlu0 %v6457_v28, %s6125_s22  ;;  %s6133_s22 = smov 40  }
 0x6bd   : > { %1761 = vrot.lane.b32.xlu0 %v6460_v29, %s6126_s3 }
 0x6c1   : > { %1765 = vrot.lane.b32.xlu0 %v6454_v26, %s6126_s3  ;;  %s8270_s3 = sld [smem:[#allocation38_spill]] }
 0x724   : > { %v1550_v34 = vpop.xlane.xlu0 %1549 }
 0x725   : > { %5908 = vrcp.f32 %v1550_v34 }
 0x728   : > { %v1553_v35 = vpop.xlane.xlu0 %1552 }
 0x729   : > { %5910 = vrcp.f32 %v1553_v35 }
 0x72c   : > { %v1556_v36 = vpop.xlane.xlu0 %1555 }
 0x72d   : > { %5912 = vrcp.f32 %v1556_v36 }
 0x730   : > { %v1770_v41 = vpop.permute.xlu0 %1769 }
 0x732   : > { %v5909_v37 = vpop.eup %5908 }
 0x733   : > { %v1558_v38 = vmul.f32 %v5909_v37, %v5903_v24 }
 0x734   : > { %v1762_v45 = vpop.permute.xlu0 %1761 }
 0x735   : > { %5502 = vmatmul.mubr.msk.f32.vlgmr.msra.gmra.mxu0 %vm1528_vm10, %v1558_v38 }
 0x736   : > { %v5911_v39 = vpop.eup %5910  ;;  %5522 = vmatpush3.xpose.msk.msra.mxu0 %vm1055_vm0, %v1772_v33  ;;  %5504 = vmatprep.mubr.msk.f32.mxu0 %vm6122_vm2, %v8203_v49 }
 0x737   : > { %5523 = vmatprep.subr.mxu0 %v8203_v49  ;;  %v1560_v40 = vmul.f32 %v5911_v39, %v5905_v27 }
 0x738   : > { %v1766_v47 = vpop.permute.xlu0 %1765 }
 0x739   : > { %5505 = vmatmul.mubr.msk.f32.gmra.mxu0 %vm1528_vm10, %v1560_v40 }
 0x73a   : > { %v5913_v42 = vpop.eup %5912  ;;  %5524 = vmatpush3.xpose.msk.msra.mxu0 %vm1055_vm0, %v1770_v41  ;;  %5507 = vmatprep.mubr.msk.f32.mxu0 %vm6122_vm2, %v8203_v49 }
 0x73b   : > { %5525 = vmatprep.subr.mxu0 %v8203_v49  ;;  %v1562_v43 = vmul.f32 %v5913_v42, %v5907_v31 }
 0x73d   : > { %5508 = vmatmul.mubr.msk.f32.gmra.mxu0 %vm1528_vm10, %v1562_v43 }
 0x73e   : > { %5526 = vmatpush3.xpose.msk.msra.mxu0 %vm1055_vm0, %v1768_v44  ;;  %5527 = vmatprep.mubr.msk.f32.mxu0 %vm6122_vm2, %v8203_v49 }
 0x73f   : > { %5551 = vmatprep.subr.mxu0 %v8203_v49 }
 0x741   : > { %5528 = vmatmul.mubr.msk.f32.vlgmr.msra.gmra.mxu0 %vm1055_vm0, %v1762_v45 }
 0x742   : > { %5530 = vmatprep.mubr.msk.f32.mxu0 %vm6122_vm2, %v8203_v49 }
 0x745   : > { %5531 = vmatmul.mubr.msk.f32.gmra.mxu0 %vm1055_vm0, %v1764_v46 }
 0x746   : > { %5533 = vmatprep.mubr.msk.f32.mxu0 %vm6122_vm2, %v8203_v49 }
 0x749   : > { %5534 = vmatmul.mubr.msk.f32.gmra.mxu0 %vm1055_vm0, %v1766_v47 }
 0x74a   : > { %5553 = vmatprep.mubr.msk.f32.mxu0 %vm6122_vm2, %v8203_v49 }
 0x7f5   : > { %v1649_v50 = vpop.f32.mrf.mxu0 }
 0x7f6   : > { %5513 = vmatmul.mubr.msk.f32.vlgmr.msra.gmra.mxu1 %vm1055_vm0, %v1649_v50 }
 0x7f7   : > { %v5503_v51 = vpop.f32.mrf.mxu0  ;;  %5515 = vmatprep.mubr.msk.f32.mxu1 %vm6122_vm2, %v8203_v49 }
 0x7f9   : > { %v1654_v52 = vpop.f32.mrf.mxu0 }
 0x7fa   : > { %5516 = vmatmul.mubr.msk.f32.gmra.mxu1 %vm1055_vm0, %v1654_v52 }
 0x7fb   : > { %v5506_v53 = vpop.f32.mrf.mxu0  ;;  %5518 = vmatprep.mubr.msk.f32.mxu1 %vm6122_vm2, %v8203_v49 }
 0x7fd   : > { %v1659_v55 = vpop.f32.mrf.mxu0 }
 0x7fe   : > { %5519 = vmatmul.mubr.msk.f32.gmra.mxu1 %vm1055_vm0, %v1659_v55 }
 0x7ff   : > { %v5509_v56 = vpop.f32.mrf.mxu0  ;;  %5542 = vmatprep.mubr.msk.f32.mxu1 %vm6122_vm2, %v8203_v49 }
 0x801   : > { %v1851_v57 = vpop.f32.mrf.mxu0 }
 0x802   : > { %v1865_v58 = vmul.f32 0.35355338, %v1851_v57 }
 0x803   : > { %v5529_v59 = vpop.f32.mrf.mxu0 }
 0x804   : > { %v1868_v60 = vsel %vm6494_vm9, %v1865_v58, -1e+30  ;;  %v1417_v58 = vld [vmem:[%s8265_s30 + $0x8] sm:$0xff] }
 0x805   : > { %v1856_v63 = vpop.f32.mrf.mxu0  ;;  %v1871_v0 = vsel %vm1528_vm10, %v1868_v60, -inf  ;;  %5552 = vmatpush3.msra.mxu0 %v1417_v58 }
 0x806   : > { %v1866_v1 = vmul.f32 0.35355338, %v1856_v63  ;;  %1872 = vmax.xlane.f32.xlu1 %v1871_v0  ;;  %5577 = vmatprep.subr.mxu0 %v8203_v49 }
 0x807   : > { %v5532_v2 = vpop.f32.mrf.mxu0 }
 0x808   : > { %v1869_v3 = vsel %vm6503_vm12, %v1866_v1, -1e+30 }
 0x809   : > { %v1861_v5 = vpop.f32.mrf.mxu0  ;;  %v1874_v6 = vsel %vm1528_vm10, %v1869_v3, -inf }
 0x80a   : > { %v1867_v7 = vmul.f32 0.35355338, %v1861_v5  ;;  %1875 = vmax.xlane.f32.xlu0 %v1874_v6 }
 0x80b   : > { %v5535_v8 = vpop.f32.mrf.mxu0 }
 0x80c   : > { %v1870_v9 = vsel %vm6512_vm14, %v1867_v7, -1e+30 }
 0x80d   : > { %v1877_v10 = vsel %vm1535_vm15, %v1870_v9, -inf }
 0x80e   : > { %1878 = vmax.xlane.f32.xlu0 %v1877_v10 }
 0x817   : > { %1906 = vrot.lane.b32.xlu1 %v6457_v28, %s6127_s10 }
 0x81b   : > { %1904 = vrot.lane.b32.xlu1 %v6460_v29, %s6127_s10 }
 0x824   : > { %1908 = vrot.lane.b32.xlu0 %v6454_v26, %s6127_s10 }
 0x88f   : > { %v1873_v11 = vpop.xlane.xlu1 %1872 }
 0x890   : > { %v1880_v12 = vsub.f32 %v1868_v60, %v1873_v11 }
 0x892   : > { %v1883_v13 = vmul.f32 1.442695, %v1880_v12 }
 0x893   : > { %v1876_v15 = vpop.xlane.xlu0 %1875  ;;  %v1907_v21 = vpop.permute.xlu1 %1906 }
 0x894   : > { %5914 = vpow2.f32 %v1883_v13  ;;  %v1881_v17 = vsub.f32 %v1869_v3, %v1876_v15 }
 0x896   : > { %v1885_v19 = vmul.f32 1.442695, %v1881_v17 }
 0x897   : > { %v1879_v20 = vpop.xlane.xlu0 %1878  ;;  %v1905_v23 = vpop.permute.xlu1 %1904 }
 0x898   : > { %5916 = vpow2.f32 %v1885_v19  ;;  %v1882_v36 = vsub.f32 %v1870_v9, %v1879_v20 }
 0x89a   : > { %v1887_v38 = vmul.f32 1.442695, %v1882_v36 }
 0x89b   : > { %v1909_v22 = vpop.permute.xlu0 %1908 }
 0x89c   : > { %5537 = vmatpush3.msk.msra.mxu1 %vm1580_vm3, %v1909_v22  ;;  %5918 = vpow2.f32 %v1887_v38  ;;  %v5111_v22 = vld [vmem:[%s8181_s13] ss:$0 sm:$0xff] }
 0x89d   : > { %5538 = vmatprep.subr.mxu1 %v8203_v49 }
 0x89e   : > { %5539 = vmatpush3.msra.mxu1 %v1907_v21 }
 0x89f   : > { %5540 = vmatprep.subr.mxu1 %v8203_v49 }
 0x8a0   : > { %5541 = vmatpush3.msra.mxu1 %v1905_v23 }
 0x8a1   : > { %v5915_v24 = vpop.eup %5914  ;;  %5562 = vmatprep.subr.mxu1 %v8203_v49 }
 0x8a2   : > { %v1889_v25 = vsel %vm1528_vm10, %v5915_v24, 0.0 }
 0x8a3   : > { %1890 = vadd.xlane.f32.xlu1 %v1889_v25 }
 0x8a5   : > { %v5917_v27 = vpop.eup %5916 }
 0x8a6   : > { %v1892_v30 = vsel %vm1528_vm10, %v5917_v27, 0.0 }
 0x8a7   : > { %1893 = vadd.xlane.f32.xlu0 %v1892_v30 }
 0x8a9   : > { %v5919_v39 = vpop.eup %5918 }
 0x8aa   : > { %v1895_v40 = vsel %vm1535_vm15, %v5919_v39, 0.0 }
 0x8b4   : > { %2103 = vrot.lane.b32.xlu1 %v6457_v28, %s6128_s6 }
 0x8b6   : > { %v6597_v31 = vpop.f32.mrf.mxu1 }
 0x8b7   : > { %v1758_v23 = vadd.f32 %v5111_v22, %v6597_v31 }
 0x8b8   : > { %v5514_v32 = vpop.f32.mrf.mxu1 }
 0x8ba   : > { %v6599_v33 = vpop.f32.mrf.mxu1 }
 0x8bb   : > { %v1759_v30 = vadd.f32 %v5111_v22, %v6599_v33 }
 0x8bc   : > { %v5517_v34 = vpop.f32.mrf.mxu1 }
 0x8bd   : > { %2105 = vrot.lane.b32.xlu0 %v6454_v26, %s6128_s6 }
 0x8be   : > { %v6602_v35 = vpop.f32.mrf.mxu1 }
 0x8c0   : > { %v5520_v37 = vpop.f32.mrf.mxu1 }
 0x8c1   : > { %2101 = vrot.lane.b32.xlu0 %v6460_v29, %s6128_s6  ;;  %s8266_s6 = sld [smem:[#allocation39_spill]] }
 0x8c5   : > { %2097 = vrot.lane.b32.xlu0 %v6457_v28, %s6129_s28 }
 0x8d8   : > { %1896 = vadd.xlane.f32.xlu1 %v1895_v40 }
 0x8e9   : > { %2095 = vrot.lane.b32.xlu1 %v6460_v29, %s6129_s28 }
 0x8ed   : > { %2099 = vrot.lane.b32.xlu1 %v6454_v26, %s6129_s28 }
 0x92c   : > { %v1891_v41 = vpop.xlane.xlu1 %1890 }
 0x92d   : > { %5920 = vrcp.f32 %v1891_v41 }
 0x930   : > { %v1894_v42 = vpop.xlane.xlu0 %1893  ;;  %v2104_v48 = vpop.permute.xlu1 %2103 }
 0x931   : > { %5922 = vrcp.f32 %v1894_v42 }
 0x934   : > { %v2106_v45 = vpop.permute.xlu0 %2105 }
 0x938   : > { %v2102_v50 = vpop.permute.xlu0 %2101 }
 0x93a   : > { %v5921_v43 = vpop.eup %5920 }
 0x93b   : > { %v1899_v44 = vmul.f32 %v5921_v43, %v5915_v24 }
 0x93c   : > { %v2098_v56 = vpop.permute.xlu0 %2097 }
 0x93d   : > { %5543 = vmatmul.mubr.msk.f32.vlgmr.msra.gmra.mxu1 %vm1528_vm10, %v1899_v44 }
 0x93e   : > { %v5923_v46 = vpop.eup %5922  ;;  %5563 = vmatpush3.xpose.msk.msra.mxu1 %vm1055_vm0, %v2106_v45  ;;  %5545 = vmatprep.mubr.msk.f32.mxu1 %vm6122_vm2, %v8203_v49 }
 0x93f   : > { %5564 = vmatprep.subr.mxu1 %v8203_v49  ;;  %v1901_v47 = vmul.f32 %v5923_v46, %v5917_v27 }
 0x941   : > { %5546 = vmatmul.mubr.msk.f32.gmra.mxu1 %vm1528_vm10, %v1901_v47 }
 0x942   : > { %5565 = vmatpush3.xpose.msk.msra.mxu1 %vm1055_vm0, %v2104_v48  ;;  %5548 = vmatprep.mubr.msk.f32.mxu1 %vm6122_vm2, %v8203_v49 }
 0x943   : > { %5566 = vmatprep.subr.mxu1 %v8203_v49 }
 0x946   : > { %5567 = vmatpush3.xpose.msk.msra.mxu1 %vm1055_vm0, %v2102_v50 }
 0x947   : > { %5592 = vmatprep.subr.mxu1 %v8203_v49 }
 0x961   : > { %v1897_v51 = vpop.xlane.xlu1 %1896 }
 0x962   : > { %5924 = vrcp.f32 %v1897_v51 }
 0x965   : > { %v2096_v55 = vpop.permute.xlu1 %2095 }
 0x969   : > { %v2100_v57 = vpop.permute.xlu1 %2099 }
 0x96f   : > { %v5925_v52 = vpop.eup %5924 }
 0x970   : > { %v1903_v53 = vmul.f32 %v5925_v52, %v5919_v39 }
 0x972   : > { %5549 = vmatmul.mubr.msk.f32.gmra.mxu1 %vm1528_vm10, %v1903_v53 }
 0x973   : > { %5568 = vmatprep.mubr.msk.f32.mxu1 %vm6122_vm2, %v8203_v49 }
 0x976   : > { %5569 = vmatmul.mubr.msk.f32.vlgmr.msra.gmra.mxu1 %vm1055_vm0, %v2096_v55  ;;  %v1760_v55 = vadd.f32 %v5111_v22, %v6602_v35 }
 0x977   : > { %5571 = vmatprep.mubr.msk.f32.mxu1 %vm6122_vm2, %v8203_v49 }
 0x97a   : > { %5572 = vmatmul.mubr.msk.f32.gmra.mxu1 %vm1055_vm0, %v2098_v56 }
 0x97b   : > { %5574 = vmatprep.mubr.msk.f32.mxu1 %vm6122_vm2, %v8203_v49 }
 0x97e   : > { %5575 = vmatmul.mubr.msk.f32.gmra.mxu1 %vm1055_vm0, %v2100_v57 }
 0x97f   : > { %5594 = vmatprep.mubr.msk.f32.mxu1 %vm6122_vm2, %v8203_v49 }
 0x9fd   : > { %v1989_v59 = vpop.f32.mrf.mxu1 }
 0x9fe   : > { %5554 = vmatmul.mubr.msk.f32.vlgmr.msra.gmra.mxu0 %vm1055_vm0, %v1989_v59 }
 0x9ff   : > { %v5544_v60 = vpop.f32.mrf.mxu1  ;;  %5556 = vmatprep.mubr.msk.f32.mxu0 %vm6122_vm2, %v8203_v49 }
 0xa01   : > { %v1994_v63 = vpop.f32.mrf.mxu1 }
 0xa02   : > { %5557 = vmatmul.mubr.msk.f32.gmra.mxu0 %vm1055_vm0, %v1994_v63 }
 0xa03   : > { %v5547_v0 = vpop.f32.mrf.mxu1  ;;  %5559 = vmatprep.mubr.msk.f32.mxu0 %vm6122_vm2, %v8203_v49 }
 0xa32   : > { %v1999_v1 = vpop.f32.mrf.mxu1 }
 0xa33   : > { %5560 = vmatmul.mubr.msk.f32.gmra.mxu0 %vm1055_vm0, %v1999_v1 }
 0xa34   : > { %v5550_v2 = vpop.f32.mrf.mxu1  ;;  %5583 = vmatprep.mubr.msk.f32.mxu0 %vm6122_vm2, %v8203_v49 }
 0xa36   : > { %v2185_v3 = vpop.f32.mrf.mxu1 }
 0xa37   : > { %v2199_v5 = vmul.f32 0.35355338, %v2185_v3 }
 0xa38   : > { %v5570_v6 = vpop.f32.mrf.mxu1 }
 0xa39   : > { %v2202_v7 = vsel %vm6494_vm9, %v2199_v5, -1e+30 }
 0xa3a   : > { %v2190_v8 = vpop.f32.mrf.mxu1  ;;  %v2205_v9 = vsel %vm1528_vm10, %v2202_v7, -inf }
 0xa3b   : > { %v2200_v10 = vmul.f32 0.35355338, %v2190_v8  ;;  %2206 = vmax.xlane.f32.xlu0 %v2205_v9 }
 0xa3c   : > { %v5573_v11 = vpop.f32.mrf.mxu1 }
 0xa3d   : > { %v2203_v12 = vsel %vm6503_vm12, %v2200_v10, -1e+30 }
 0xa3e   : > { %v2195_v13 = vpop.f32.mrf.mxu1  ;;  %v2208_v15 = vsel %vm1528_vm10, %v2203_v12, -inf }
 0xa3f   : > { %v2201_v17 = vmul.f32 0.35355338, %v2195_v13  ;;  %2209 = vmax.xlane.f32.xlu1 %v2208_v15 }
 0xa40   : > { %v5576_v19 = vpop.f32.mrf.mxu1 }
 0xa41   : > { %v2204_v20 = vsel %vm6512_vm14, %v2201_v17, -1e+30 }
 0xa42   : > { %v2211_v21 = vsel %vm1535_vm15, %v2204_v20, -inf }
 0xa43   : > { %2212 = vmax.xlane.f32.xlu0 %v2211_v21 }
 0xa50   : > { %2242 = vrot.lane.b32.xlu1 %v6454_v26, %s6130_s11 }
 0xa54   : > { %2238 = vrot.lane.b32.xlu1 %v6460_v29, %s6130_s11 }
 0xa58   : > { %2439 = vrot.lane.b32.xlu1 %v6454_v26, %s6131_s29 }
 0xa59   : > { %2240 = vrot.lane.b32.xlu0 %v6457_v28, %s6130_s11 }
 0xabe   : > { %v2078_v24 = vpop.f32.mrf.mxu0 }
 0xabf   : > { %v6664_v25 = vadd.f32 %v2078_v24, %v1758_v23 }
 0xac0   : > { %v5555_v27 = vpop.f32.mrf.mxu0 }
 0xac2   : > { %v2083_v32 = vpop.f32.mrf.mxu0 }
 0xac3   : > { %v6667_v34 = vadd.f32 %v2083_v32, %v1759_v30 }
 0xac4   : > { %v5558_v36 = vpop.f32.mrf.mxu0  ;;  %v2207_v37 = vpop.xlane.xlu0 %2206 }
 0xac5   : > { %v2214_v38 = vsub.f32 %v2202_v7, %v2207_v37 }
 0xac7   : > { %v2217_v39 = vmul.f32 1.442695, %v2214_v38 }
 0xac8   : > { %v2210_v40 = vpop.xlane.xlu1 %2209 }
 0xac9   : > { %5926 = vpow2.f32 %v2217_v39  ;;  %v2215_v41 = vsub.f32 %v2203_v12, %v2210_v40  ;;  %v1418_v12 = vld [vmem:[%s8265_s30 + $0x10] sm:$0xff] }
 0xaca   : > { %5593 = vmatpush3.msra.mxu1 %v1418_v12 }
 0xacb   : > { %v2219_v42 = vmul.f32 1.442695, %v2215_v41  ;;  %5618 = vmatprep.subr.mxu1 %v8203_v49 }
 0xacc   : > { %v2243_v43 = vpop.permute.xlu1 %2242  ;;  %v2213_v44 = vpop.xlane.xlu0 %2212 }
 0xacd   : > { %5928 = vpow2.f32 %v2219_v42  ;;  %v2216_v31 = vsub.f32 %v2204_v20, %v2213_v44  ;;  %5578 = vmatpush3.msk.msra.mxu0 %vm1580_vm3, %v2243_v43 }
 0xace   : > { %5579 = vmatprep.subr.mxu0 %v8203_v49 }
 0xacf   : > { %v2221_v33 = vmul.f32 1.442695, %v2216_v31 }
 0xad0   : > { %v2241_v45 = vpop.permute.xlu0 %2240  ;;  %v2239_v46 = vpop.permute.xlu1 %2238 }
 0xad1   : > { %5930 = vpow2.f32 %v2221_v33  ;;  %5580 = vmatpush3.msra.mxu0 %v2241_v45 }
 0xad2   : > { %5581 = vmatprep.subr.mxu0 %v8203_v49 }
 0xad3   : > { %5582 = vmatpush3.msra.mxu0 %v2239_v46 }
 0xad4   : > { %5603 = vmatprep.subr.mxu0 %v8203_v49  ;;  %v2440_v59 = vpop.permute.xlu1 %2439 }
 0xad6   : > { %v5927_v47 = vpop.eup %5926 }
 0xad7   : > { %v2223_v48 = vsel %vm1528_vm10, %v5927_v47, 0.0 }
 0xad8   : > { %2224 = vadd.xlane.f32.xlu0 %v2223_v48 }
 0xada   : > { %v5929_v50 = vpop.eup %5928 }
 0xadb   : > { %v2226_v51 = vsel %vm1528_vm10, %v5929_v50, 0.0 }
 0xadc   : > { %2227 = vadd.xlane.f32.xlu1 %v2226_v51 }
 0xade   : > { %v5931_v52 = vpop.eup %5930 }
 0xadf   : > { %v2229_v53 = vsel %vm1535_vm15, %v5931_v52, 0.0 }
 0xae0   : > { %2230 = vadd.xlane.f32.xlu0 %v2229_v53 }
 0xaed   : > { %2435 = vrot.lane.b32.xlu1 %v6460_v29, %s6131_s29 }
 0xaf1   : > { %2431 = vrot.lane.b32.xlu1 %v6457_v28, %s6132_s7 }
 0xaf3   : > { %v2088_v56 = vpop.f32.mrf.mxu0 }
 0xaf4   : > { %v6680_v57 = vadd.f32 %v2088_v56, %v1760_v55 }
 0xaf5   : > { %v5561_v58 = vpop.f32.mrf.mxu0 }
 0xaf6   : > { %2437 = vrot.lane.b32.xlu0 %v6457_v28, %s6131_s29 }
 0xafa   : > { %2429 = vrot.lane.b32.xlu0 %v6460_v29, %s6132_s7 }
 0xafe   : > { %2433 = vrot.lane.b32.xlu0 %v6454_v26, %s6132_s7 }
 0xb61   : > { %v2225_v60 = vpop.xlane.xlu0 %2224 }
 0xb62   : > { %5932 = vrcp.f32 %v2225_v60 }
 0xb65   : > { %v2228_v63 = vpop.xlane.xlu1 %2227 }
 0xb66   : > { %5934 = vrcp.f32 %v2228_v63 }
 0xb69   : > { %v2231_v0 = vpop.xlane.xlu0 %2230  ;;  %v2436_v8 = vpop.permute.xlu1 %2435 }
 0xb6a   : > { %5936 = vrcp.f32 %v2231_v0 }
 0xb6d   : > { %v2438_v5 = vpop.permute.xlu0 %2437  ;;  %v2432_v10 = vpop.permute.xlu1 %2431 }
 0xb6f   : > { %v5933_v1 = vpop.eup %5932 }
 0xb70   : > { %v2233_v35 = vmul.f32 %v5933_v1, %v5927_v47 }
 0xb71   : > { %v2430_v9 = vpop.permute.xlu0 %2429 }
 0xb72   : > { %5584 = vmatmul.mubr.msk.f32.vlgmr.msra.gmra.mxu0 %vm1528_vm10, %v2233_v35 }
 0xb73   : > { %v5935_v2 = vpop.eup %5934  ;;  %5604 = vmatpush3.xpose.msk.msra.mxu0 %vm1055_vm0, %v2440_v59  ;;  %5586 = vmatprep.mubr.msk.f32.mxu0 %vm6122_vm2, %v8203_v49 }
 0xb74   : > { %5605 = vmatprep.subr.mxu0 %v8203_v49  ;;  %v2235_v3 = vmul.f32 %v5935_v2, %v5929_v50 }
 0xb75   : > { %v2434_v11 = vpop.permute.xlu0 %2433 }
 0xb76   : > { %5587 = vmatmul.mubr.msk.f32.gmra.mxu0 %vm1528_vm10, %v2235_v3 }
 0xb77   : > { %v5937_v6 = vpop.eup %5936  ;;  %5606 = vmatpush3.xpose.msk.msra.mxu0 %vm1055_vm0, %v2438_v5  ;;  %5589 = vmatprep.mubr.msk.f32.mxu0 %vm6122_vm2, %v8203_v49 }
 0xb78   : > { %5607 = vmatprep.subr.mxu0 %v8203_v49  ;;  %v2237_v7 = vmul.f32 %v5937_v6, %v5931_v52 }
 0xb7a   : > { %5590 = vmatmul.mubr.msk.f32.gmra.mxu0 %vm1528_vm10, %v2237_v7 }
 0xb7b   : > { %5608 = vmatpush3.xpose.msk.msra.mxu0 %vm1055_vm0, %v2436_v8  ;;  %5609 = vmatprep.mubr.msk.f32.mxu0 %vm6122_vm2, %v8203_v49 }
 0xb7c   : > { %5633 = vmatprep.subr.mxu0 %v8203_v49 }
 0xb7e   : > { %5610 = vmatmul.mubr.msk.f32.vlgmr.msra.gmra.mxu0 %vm1055_vm0, %v2430_v9 }
 0xb7f   : > { %5612 = vmatprep.mubr.msk.f32.mxu0 %vm6122_vm2, %v8203_v49 }
 0xb82   : > { %5613 = vmatmul.mubr.msk.f32.gmra.mxu0 %vm1055_vm0, %v2432_v10 }
 0xb83   : > { %5615 = vmatprep.mubr.msk.f32.mxu0 %vm6122_vm2, %v8203_v49 }
 0xb86   : > { %5616 = vmatmul.mubr.msk.f32.gmra.mxu0 %vm1055_vm0, %v2434_v11 }
 0xb87   : > { %5635 = vmatprep.mubr.msk.f32.mxu0 %vm6122_vm2, %v8203_v49 }
 0xc32   : > { %v2323_v13 = vpop.f32.mrf.mxu0 }
 0xc33   : > { %5595 = vmatmul.mubr.msk.f32.vlgmr.msra.gmra.mxu1 %vm1055_vm0, %v2323_v13 }
 0xc34   : > { %v5585_v15 = vpop.f32.mrf.mxu0  ;;  %5597 = vmatprep.mubr.msk.f32.mxu1 %vm6122_vm2, %v8203_v49 }
 0xc36   : > { %v2328_v17 = vpop.f32.mrf.mxu0 }
 0xc37   : > { %5598 = vmatmul.mubr.msk.f32.gmra.mxu1 %vm1055_vm0, %v2328_v17 }
 0xc38   : > { %v5588_v19 = vpop.f32.mrf.mxu0  ;;  %5600 = vmatprep.mubr.msk.f32.mxu1 %vm6122_vm2, %v8203_v49 }
 0xc3a   : > { %v2333_v20 = vpop.f32.mrf.mxu0 }
 0xc3b   : > { %5601 = vmatmul.mubr.msk.f32.gmra.mxu1 %vm1055_vm0, %v2333_v20 }
 0xc3c   : > { %v5591_v21 = vpop.f32.mrf.mxu0  ;;  %5624 = vmatprep.mubr.msk.f32.mxu1 %vm6122_vm2, %v8203_v49 }
 0xc3e   : > { %v2519_v22 = vpop.f32.mrf.mxu0 }
 0xc3f   : > { %v2533_v23 = vmul.f32 0.35355338, %v2519_v22 }
 0xc40   : > { %v5611_v24 = vpop.f32.mrf.mxu0 }
 0xc41   : > { %v2536_v27 = vsel %vm6494_vm9, %v2533_v23, -1e+30 }
 0xc42   : > { %v2524_v30 = vpop.f32.mrf.mxu0  ;;  %v2539_v32 = vsel %vm1528_vm10, %v2536_v27, -inf }
 0xc43   : > { %v2534_v36 = vmul.f32 0.35355338, %v2524_v30  ;;  %2540 = vmax.xlane.f32.xlu1 %v2539_v32 }
 0xc44   : > { %v5614_v37 = vpop.f32.mrf.mxu0 }
 0xc45   : > { %v2537_v38 = vsel %vm6503_vm12, %v2534_v36, -1e+30 }
 0xc46   : > { %v2529_v39 = vpop.f32.mrf.mxu0  ;;  %v2542_v40 = vsel %vm1528_vm10, %v2537_v38, -inf }
 0xc47   : > { %v2535_v41 = vmul.f32 0.35355338, %v2529_v39  ;;  %2543 = vmax.xlane.f32.xlu0 %v2542_v40 }
 0xc48   : > { %v5617_v42 = vpop.f32.mrf.mxu0 }
 0xc49   : > { %v2538_v43 = vsel %vm6512_vm14, %v2535_v41, -1e+30 }
 0xc4a   : > { %v2545_v54 = vsel %vm1535_vm15, %v2538_v43, -inf }
 0xc4b   : > { %2546 = vmax.xlane.f32.xlu0 %v2545_v54 }
 0xccc   : > { %v2541_v44 = vpop.xlane.xlu1 %2540 }
 0xccd   : > { %v2548_v31 = vsub.f32 %v2536_v27, %v2541_v44 }
 0xccf   : > { %v2551_v33 = vmul.f32 1.442695, %v2548_v31 }
 0xcd0   : > { %v2544_v45 = vpop.xlane.xlu0 %2543 }
 0xcd1   : > { %5938 = vpow2.f32 %v2551_v33  ;;  %v2549_v46 = vsub.f32 %v2537_v38, %v2544_v45 }
 0xcd3   : > { %v2553_v62 = vmul.f32 1.442695, %v2549_v46 }
 0xcd4   : > { %v2547_v58 = vpop.xlane.xlu0 %2546 }
 0xcd5   : > { %5940 = vpow2.f32 %v2553_v62  ;;  %v2550_v63 = vsub.f32 %v2538_v43, %v2547_v58 }
 0xcd7   : > { %v2555_v35 = vmul.f32 1.442695, %v2550_v63 }
 0xcd9   : > { %5942 = vpow2.f32 %v2555_v35 }
 0xcde   : > { %v5939_v47 = vpop.eup %5938 }
 0xcdf   : > { %v2557_v48 = vsel %vm1528_vm10, %v5939_v47, 0.0 }
 0xce0   : > { %2558 = vadd.xlane.f32.xlu1 %v2557_v48 }
 0xce2   : > { %v5941_v50 = vpop.eup %5940 }
 0xce3   : > { %v2560_v51 = vsel %vm1528_vm10, %v5941_v50, 0.0 }
 0xce4   : > { %2561 = vadd.xlane.f32.xlu0 %v2560_v51 }
 0xcf1   : > { %2574 = vrot.lane.b32.xlu1 %v6457_v28, %s6133_s22  ;;  %v5943_v28 = vpop.eup %5942 }
 0xcf2   : > { %v2563_v2 = vsel %vm1535_vm15, %v5943_v28, 0.0 }
 0xcf3   : > { %v2412_v4 = vpop.f32.mrf.mxu1 }
 0xcf4   : > { %v2426_v52 = vadd.f32 %v2412_v4, %v6664_v25  ;;  %v1419_v25 = vld [vmem:[%s8265_s30 + $0x18] sm:$0xff] }
 0xcf5   : > { %v5596_v53 = vpop.f32.mrf.mxu1  ;;  %5634 = vmatpush3.msra.mxu0 %v1419_v25 }
 0xcf6   : > { %5661 = vmatprep.subr.mxu0 %v8203_v49  ;;  %v2828_v53 = vld [vmem:[%s8182_s14 + $0x10] sm:$0xff] }
 0xcf7   : > { %v2417_v55 = vpop.f32.mrf.mxu1 }
 0xcf8   : > { %v2427_v56 = vadd.f32 %v2417_v55, %v6667_v34  ;;  %v2827_v55 = vld [vmem:[%s8182_s14 + $0x8] sm:$0xff] }
 0xcf9   : > { %v5599_v59 = vpop.f32.mrf.mxu1 }
 0xcfa   : > { %2576 = vrot.lane.b32.xlu0 %v6454_v26, %s6133_s22 }
 0xcfb   : > { %v2422_v60 = vpop.f32.mrf.mxu1 }
 0xcfc   : > { %v6739_v0 = vadd.f32 %v2422_v60, %v6680_v57 }
 0xcfd   : > { %v5602_v1 = vpop.f32.mrf.mxu1 }
 0xd15   : > { %2564 = vadd.xlane.f32.xlu1 %v2563_v2 }
 0xd26   : > { %2572 = vrot.lane.b32.xlu1 %v6460_v29, %s6133_s22 }
 0xd69   : > { %v2559_v26 = vpop.xlane.xlu1 %2558 }
 0xd6a   : > { %5944 = vrcp.f32 %v2559_v26  ;;  %v5151_v26 = vld [vmem:[%s8186_s18] ss:$0 sm:$0xff] }
 0xd6d   : > { %v2562_v34 = vpop.xlane.xlu0 %2561  ;;  %v2575_v3 = vpop.permute.xlu1 %2574 }
 0xd6e   : > { %5946 = vrcp.f32 %v2562_v34 }
 0xd71   : > { %v2577_v57 = vpop.permute.xlu0 %2576 }
 0xd72   : > { %5619 = vmatpush3.msk.msra.mxu1 %vm1580_vm3, %v2577_v57  ;;  %v5152_v57 = vld [vmem:[%s8187_s19] ss:$0 sm:$0xff] }
 0xd73   : > { %5620 = vmatprep.subr.mxu1 %v8203_v49 }
 0xd74   : > { %5621 = vmatpush3.msra.mxu1 %v2575_v3 }
 0xd75   : > { %5622 = vmatprep.subr.mxu1 %v8203_v49 }
 0xd77   : > { %v5945_v5 = vpop.eup %5944 }
 0xd78   : > { %v2567_v6 = vmul.f32 %v5945_v5, %v5939_v47 }
 0xd7b   : > { %v5947_v8 = vpop.eup %5946 }
 0xd7c   : > { %v2569_v9 = vmul.f32 %v5947_v8, %v5941_v50 }
 0xd9e   : > { %v2565_v29 = vpop.xlane.xlu1 %2564 }
 0xd9f   : > { %5948 = vrcp.f32 %v2565_v29 }
 0xda2   : > { %v2573_v7 = vpop.permute.xlu1 %2572 }
 0xda3   : > { %5623 = vmatpush3.msra.mxu1 %v2573_v7 }
 0xda4   : > { %5625 = vmatmul.mubr.msk.f32.vlgmr.msra.gmra.mxu1 %vm1528_vm10, %v2567_v6  ;;  %5644 = vmatprep.subr.mxu1 %v8203_v49 }
 0xda5   : > { %5627 = vmatprep.mubr.msk.f32.mxu1 %vm6122_vm2, %v8203_v49 }
 0xda8   : > { %5628 = vmatmul.mubr.msk.f32.gmra.mxu1 %vm1528_vm10, %v2569_v9 }
 0xda9   : > { %5630 = vmatprep.mubr.msk.f32.mxu1 %vm6122_vm2, %v8203_v49 }
 0xdac   : > { %v5949_v10 = vpop.eup %5948 }
 0xdad   : > { %v2571_v11 = vmul.f32 %v5949_v10, %v5943_v28 }
 0xdaf   : > { %5631 = vmatmul.mubr.msk.f32.gmra.mxu1 %vm1528_vm10, %v2571_v11 }
 0xdb0   : > { %5652 = vmatprep.mubr.msk.f32.mxu1 %vm6122_vm2, %v8203_v49 }
 0xe64   : > { %v2657_v12 = vpop.f32.mrf.mxu1 }
 0xe65   : > { %5636 = vmatmul.mubr.msk.f32.vlgmr.msra.gmra.mxu0 %vm1055_vm0, %v2657_v12 }
 0xe66   : > { %v5626_v13 = vpop.f32.mrf.mxu1  ;;  %5638 = vmatprep.mubr.msk.f32.mxu0 %vm6122_vm2, %v8203_v49 }
 0xe67   : > { %v2948_v13 = vld [vmem:[%s8184_s16 + $0x38] sm:$0xff] }
 0xe68   : > { %v2662_v15 = vpop.f32.mrf.mxu1  ;;  %5662 = vmatpush3.msra.mxu0 %v2948_v13 }
 0xe69   : > { %5639 = vmatmul.mubr.msk.f32.gmra.mxu0 %vm1055_vm0, %v2662_v15  ;;  %5663 = vmatprep.subr.mxu0 %v8203_v49  ;;  %v2947_v15 = vld [vmem:[%s8184_s16 + $0x30] sm:$0xff] }
 0xe6a   : > { %v5629_v17 = vpop.f32.mrf.mxu1  ;;  %5641 = vmatprep.mubr.msk.f32.mxu0 %vm6122_vm2, %v8203_v49  ;;  %5664 = vmatpush3.msra.mxu0 %v2947_v15 }
 0xe6b   : > { %5665 = vmatprep.subr.mxu0 %v8203_v49  ;;  %v2946_v17 = vld [vmem:[%s8184_s16 + $0x28] sm:$0xff] }
 0xe6c   : > { %5666 = vmatpush3.msra.mxu0 %v2946_v17 }
 0xe6d   : > { %5667 = vmatprep.subr.mxu0 %v8203_v49 }
 0xe6f   : > { %v2667_v19 = vpop.f32.mrf.mxu1 }
 0xe70   : > { %5642 = vmatmul.mubr.msk.f32.gmra.mxu0 %vm1055_vm0, %v2667_v19  ;;  %vm2774_vm0 = vcmask 257024   ;;  %v2945_v19 = vld [vmem:[%s8184_s16 + $0x20] sm:$0xff] }
 0xe71   : > { %v5632_v20 = vpop.f32.mrf.mxu1  ;;  %5677 = vmatprep.mubr.msk.f32.mxu0 %vm6122_vm2, %v8203_v49  ;;  %5668 = vmatpush3.msra.mxu0 %v2945_v19 }
 0xe72   : > { %5669 = vmatprep.subr.mxu0 %v8203_v49  ;;  %v2944_v20 = vld [vmem:[%s8184_s16 + $0x18] sm:$0xff] }
 0xe73   : > { %5670 = vmatpush3.msra.mxu0 %v2944_v20 }
 0xe74   : > { %5671 = vmatprep.subr.mxu0 %v8203_v49 }
 0xf25   : > { %v2746_v21 = vpop.f32.mrf.mxu0 }
 0xf26   : > { %v2760_v22 = vadd.f32 %v2746_v21, %v2426_v52  ;;  %v2829_v52 = vld [vmem:[%s8182_s14 + $0x18] sm:$0xff]  ;;  %v2943_v21 = vld [vmem:[%s8184_s16 + $0x10] sm:$0xff] }
 0xf27   : > { %v5637_v23 = vpop.f32.mrf.mxu0  ;;  %5645 = vmatpush3.msra.mxu1 %v2829_v52  ;;  %5672 = vmatpush3.msra.mxu0 %v2943_v21 }
 0xf28   : > { %v2763_v24 = vadd.f32 %v2760_v22, %v6433_v14  ;;  %5646 = vmatprep.subr.mxu1 %v8203_v49  ;;  %5673 = vmatprep.subr.mxu0 %v8203_v49  ;;  %v2942_v22 = vld [vmem:[%s8184_s16 + $0x8] sm:$0xff]  ;;  %v2941_v23 = vld [vmem:[%s8184_s16] sm:$0xff] }
 0xf29   : > { %v2751_v27 = vpop.f32.mrf.mxu0  ;;  %5647 = vmatpush3.msra.mxu1 %v2828_v53  ;;  %5674 = vmatpush3.msra.mxu0 %v2942_v22 }
 0xf2a   : > { %v2761_v30 = vadd.f32 %v2751_v27, %v2427_v56  ;;  %v2768_v32 = vsel %vm1141_vm1, %v2763_v24, 0.0  ;;  %5648 = vmatprep.subr.mxu1 %v8203_v49  ;;  %v2826_v56 = vld [vmem:[%s8182_s14] sm:$0xff]  ;;  %5675 = vmatprep.subr.mxu0 %v8203_v49 }
 0xf2b   : > { %2769 = vadd.xlane.f32.xlu0 %v2768_v32  ;;  %v5640_v36 = vpop.f32.mrf.mxu0  ;;  %5649 = vmatpush3.msra.mxu1 %v2827_v55 }
 0xf2c   : > { %v2764_v37 = vadd.f32 %v2761_v30, %v6439_v16  ;;  %5650 = vmatprep.subr.mxu1 %v8203_v49  ;;  %5676 = vmatpush3.msra.mxu0 %v2941_v23 }
 0xf2d   : > { %5651 = vmatpush3.msra.mxu1 %v2826_v56  ;;  %5703 = vmatprep.subr.mxu0 %v8203_v49 }
 0xf2e   : > { %v2771_v38 = vsel %vm1141_vm1, %v2764_v37, 0.0  ;;  %5686 = vmatprep.subr.mxu1 %v8203_v49 }
 0xf2f   : > { %2772 = vadd.xlane.f32.xlu1 %v2771_v38 }
 0xf30   : > { %v2756_v39 = vpop.f32.mrf.mxu0 }
 0xf31   : > { %v2762_v40 = vadd.f32 %v2756_v39, %v6739_v0 }
 0xf32   : > { %v5643_v41 = vpop.f32.mrf.mxu0 }
 0xf33   : > { %v2765_v42 = vadd.f32 %v2762_v40, %v6445_v18 }
 0xf35   : > { %v2775_v14 = vsel %vm2774_vm0, %v2765_v42, 0.0 }
 0xf36   : > { %2776 = vadd.xlane.f32.xlu0 %v2775_v14 }
 0xfb4   : > { %v2770_v43 = vpop.xlane.xlu0 %2769 }
 0xfb5   : > { %v2778_v54 = vmul.f32 0.03125, %v2770_v43 }
 0xfb7   : > { %v2781_v44 = vsub.f32 %v2763_v24, %v2778_v54  ;;  %v5153_v24 = vld [vmem:[%s8183_s15] ss:$0 sm:$0xff] }
 0xfb8   : > { %v2773_v31 = vpop.xlane.xlu1 %2772 }
 0xfb9   : > { %v2779_v33 = vmul.f32 0.03125, %v2773_v31  ;;  %v2784_v45 = vmul.f32 %v2781_v44, %v2781_v44 }
 0xfbb   : > { %v2782_v16 = vsub.f32 %v2764_v37, %v2779_v33  ;;  %v2787_v46 = vsel %vm1141_vm1, %v2784_v45, 0.0 }
 0xfbc   : > { %2788 = vadd.xlane.f32.xlu0 %v2787_v46 }
 0xfbd   : > { %v2785_v62 = vmul.f32 %v2782_v16, %v2782_v16 }
 0xfbf   : > { %v2777_v47 = vpop.xlane.xlu0 %2776  ;;  %v2790_v48 = vsel %vm1141_vm1, %v2785_v62, 0.0 }
 0xfc0   : > { %v2780_v50 = vmul.f32 0.03125, %v2777_v47  ;;  %2791 = vadd.xlane.f32.xlu1 %v2790_v48 }
 0xfc2   : > { %v2783_v18 = vsub.f32 %v2765_v42, %v2780_v50 }
 0xfc4   : > { %v2786_v51 = vmul.f32 %v2783_v18, %v2783_v18 }
 0xfc6   : > { %v2793_v4 = vsel %vm2774_vm0, %v2786_v51, 0.0  ;;  %v5157_v51 = vld [vmem:[%s8185_s17] ss:$0 sm:$0xff] }
 0xfc7   : > { %2794 = vadd.xlane.f32.xlu0 %v2793_v4 }
0x1045   : > { %v2789_v58 = vpop.xlane.xlu0 %2788 }
0x1046   : > { %v2796_v59 = vmul.f32 0.03125, %v2789_v58 }
0x1048   : > { %v2799_v60 = vadd.f32 1e-05, %v2796_v59 }
0x1049   : > { %v2792_v63 = vpop.xlane.xlu1 %2791 }
0x104a   : > { %5950 = vrsqrt.f32 %v2799_v60  ;;  %v2797_v0 = vmul.f32 0.03125, %v2792_v63 }
0x104c   : > { %v2800_v1 = vadd.f32 1e-05, %v2797_v0 }
0x104e   : > { %5952 = vrsqrt.f32 %v2800_v1 }
0x1050   : > { %v2795_v35 = vpop.xlane.xlu0 %2794 }
0x1051   : > { %v2798_v28 = vmul.f32 0.03125, %v2795_v35 }
0x1053   : > { %v2801_v2 = vadd.f32 1e-05, %v2798_v28 }
0x1055   : > { %5954 = vrsqrt.f32 %v2801_v2 }
0x1057   : > { %v5951_v25 = vpop.eup %5950 }
0x1058   : > { %v2805_v34 = vmul.f32 %v5951_v25, %v2781_v44 }
0x105a   : > { %v2814_v3 = vmul.f32 %v5151_v26, %v2805_v34 }
0x105b   : > { %v5953_v29 = vpop.eup %5952 }
0x105c   : > { %v6801_v5 = vadd.f32 %v5152_v57, %v2814_v3  ;;  %v2806_v6 = vmul.f32 %v5953_v29, %v2782_v16 }
0x105e   : > { %5653 = vmatmul.mubr.msk.f32.vlgmr.msra.gmra.mxu1 %vm1141_vm1, %v6801_v5  ;;  %v2815_v7 = vmul.f32 %v5151_v26, %v2806_v6 }
0x105f   : > { %5655 = vmatprep.mubr.msk.f32.mxu1 %vm6122_vm2, %v8203_v49 }
0x1060   : > { %v6807_v8 = vadd.f32 %v5152_v57, %v2815_v7 }
0x1062   : > { %v5955_v9 = vpop.eup %5954  ;;  %5656 = vmatmul.mubr.msk.f32.gmra.mxu1 %vm1141_vm1, %v6807_v8 }
0x1063   : > { %5658 = vmatprep.mubr.msk.f32.mxu1 %vm6122_vm2, %v8203_v49  ;;  %v2807_v10 = vmul.f32 %v5955_v9, %v2783_v18 }
0x1065   : > { %v2816_v11 = vmul.f32 %v5151_v26, %v2807_v10 }
0x1067   : > { %v6813_v12 = vadd.f32 %v5152_v57, %v2816_v11 }
0x1069   : > { %5659 = vmatmul.mubr.msk.f32.gmra.mxu1 %vm1141_vm1, %v6813_v12 }
0x106a   : > { %5694 = vmatprep.mubr.msk.f32.mxu1 %vm6122_vm2, %v8203_v49 }
0x111e   : > { %v2912_v27 = vpop.f32.mrf.mxu1 }
0x111f   : > { %v2913_v30 = vadd.f32 %v5153_v24, %v2912_v27 }
0x1120   : > { %v5654_v32 = vpop.f32.mrf.mxu1 }
0x1121   : > { %v2929_v36 = vmul.f32 0.70710677, %v2913_v30  ;;  %v2926_v44 = vmul.f32 0.5, %v2913_v30 }
0x1122   : > { %v2917_v37 = vpop.f32.mrf.mxu1 }
0x1123   : > { %5956 = verf.f32 %v2929_v36  ;;  %v2918_v38 = vadd.f32 %v5153_v24, %v2917_v37  ;;  %v5161_v36 = vld [vmem:[%s8188_s20] ss:$0 sm:$0xff] }
0x1124   : > { %v5657_v39 = vpop.f32.mrf.mxu1 }
0x1125   : > { %v2930_v40 = vmul.f32 0.70710677, %v2918_v38  ;;  %v2927_v16 = vmul.f32 0.5, %v2918_v38  ;;  %v5162_v38 = vld [vmem:[%s8189_s21] ss:$0 sm:$0xff] }
0x1127   : > { %5958 = verf.f32 %v2930_v40 }
0x1129   : > { %v2922_v41 = vpop.f32.mrf.mxu1 }
0x112a   : > { %v2923_v42 = vadd.f32 %v5153_v24, %v2922_v41 }
0x112b   : > { %v5660_v14 = vpop.f32.mrf.mxu1 }
0x112c   : > { %v2931_v43 = vmul.f32 0.70710677, %v2923_v42  ;;  %v2928_v48 = vmul.f32 0.5, %v2923_v42 }
0x112e   : > { %5960 = verf.f32 %v2931_v43 }
0x1130   : > { %v5957_v54 = vpop.eup %5956 }
0x1131   : > { %v2935_v31 = vadd.f32 1.0, %v5957_v54 }
0x1133   : > { %v2938_v33 = vmul.f32 %v2935_v31, %v2926_v44 }
0x1134   : > { %v5959_v45 = vpop.eup %5958 }
0x1135   : > { %v2936_v46 = vadd.f32 1.0, %v5959_v45  ;;  %5678 = vmatmul.mubr.msk.f32.vlgmr.msra.gmra.mxu0 %vm2956_vm4, %v2938_v33 }
0x1136   : > { %5680 = vmatprep.mubr.msk.f32.mxu0 %vm6122_vm2, %v8203_v49 }
0x1137   : > { %v2939_v62 = vmul.f32 %v2936_v46, %v2927_v16 }
0x1139   : > { %5681 = vmatmul.mubr.msk.f32.gmra.mxu0 %vm2956_vm4, %v2939_v62 }
0x113a   : > { %5683 = vmatprep.mubr.msk.f32.mxu0 %vm6122_vm2, %v8203_v49 }
0x113b   : > { %v5961_v47 = vpop.eup %5960 }
0x113c   : > { %v2937_v50 = vadd.f32 1.0, %v5961_v47 }
0x113e   : > { %v2940_v18 = vmul.f32 %v2937_v50, %v2928_v48 }
0x1140   : > { %5684 = vmatmul.mubr.msk.f32.gmra.mxu0 %vm2956_vm4, %v2940_v18 }
0x1141   : > { %5711 = vmatprep.mubr.msk.f32.mxu0 %vm6122_vm2, %v8203_v49 }
0x11f5   : > { %v3032_v4 = vpop.f32.mrf.mxu0 }
0x11f6   : > { %v3033_v52 = vadd.f32 %v5157_v51, %v3032_v4 }
0x11f7   : > { %v5679_v53 = vpop.f32.mrf.mxu0 }
0x11f8   : > { %v3046_v55 = vadd.f32 %v3033_v52, %v6801_v5 }
0x11f9   : > { %v3037_v56 = vpop.f32.mrf.mxu0 }
0x11fa   : > { %v3038_v58 = vadd.f32 %v5157_v51, %v3037_v56  ;;  %v3051_v59 = vsel %vm1141_vm1, %v3046_v55, 0.0 }
0x11fb   : > { %3052 = vadd.xlane.f32.xlu1 %v3051_v59  ;;  %v5682_v60 = vpop.f32.mrf.mxu0 }
0x11fc   : > { %v3047_v63 = vadd.f32 %v3038_v58, %v6807_v8 }
0x11fe   : > { %v3054_v0 = vsel %vm1141_vm1, %v3047_v63, 0.0 }
0x11ff   : > { %3055 = vadd.xlane.f32.xlu0 %v3054_v0  ;;  %v6899_v0 = vld [vmem:[%s8194_s26] sm:$0xff] }
0x1200   : > { %v3042_v1 = vpop.f32.mrf.mxu0 }
0x1201   : > { %v3043_v35 = vadd.f32 %v5157_v51, %v3042_v1  ;;  %v3426_v1 = vrot.slane %v6899_v0, 7 }
0x1202   : > { %v5685_v28 = vpop.f32.mrf.mxu0 }
0x1203   : > { %v3048_v2 = vadd.f32 %v3043_v35, %v6813_v12  ;;  %v6905_v35 = vld [vmem:[%s8194_s26 + $0x8] sm:$0xf]  ;;  %v6908_v28 = vsub.s32 0, %v6387_v61 }
0x1205   : > { %v3057_v25 = vsel %vm2774_vm0, %v3048_v2, 0.0 }
0x1206   : > { %3058 = vadd.xlane.f32.xlu1 %v3057_v25  ;;  %v3696_v25 = vrot.slane %v6899_v0, 6 }
0x1284   : > { %v3053_v26 = vpop.xlane.xlu1 %3052 }
0x1285   : > { %v3060_v34 = vmul.f32 0.03125, %v3053_v26 }
0x1287   : > { %v3063_v57 = vsub.f32 %v3046_v55, %v3060_v34  ;;  %v3888_v34 = vrot.slane %v6899_v0, 5 }
0x1288   : > { %v3056_v3 = vpop.xlane.xlu0 %3055 }
0x1289   : > { %v3061_v29 = vmul.f32 0.03125, %v3056_v3  ;;  %v3066_v5 = vmul.f32 %v3063_v57, %v3063_v57  ;;  %v6923_v3 = vsub.f32 %v6905_v35, %v3696_v25 }
0x128b   : > { %v3064_v6 = vsub.f32 %v3047_v63, %v3061_v29  ;;  %v3069_v7 = vsel %vm1141_vm1, %v3066_v5, 0.0  ;;  %v6928_v29 = vsub.f32 %v6905_v35, %v3888_v34  ;;  %v3814_v5 = vrot.slane %v6923_v3, %v6908_v28 }
0x128c   : > { %3070 = vadd.xlane.f32.xlu0 %v3069_v7 }
0x128d   : > { %v3067_v8 = vmul.f32 %v3064_v6, %v3064_v6 }
0x128f   : > { %v3059_v9 = vpop.xlane.xlu1 %3058  ;;  %v3072_v10 = vsel %vm1141_vm1, %v3067_v8, 0.0 }
0x1290   : > { %v3062_v11 = vmul.f32 0.03125, %v3059_v9  ;;  %3073 = vadd.xlane.f32.xlu1 %v3072_v10  ;;  %v4063_v9 = vld [vmem:[%s8193_s25 + $0x18] sm:$0xff]  ;;  %v4062_v10 = vld [vmem:[%s8193_s25 + $0x10] sm:$0xff] }
0x1291   : > { %5687 = vmatpush3.msra.mxu1 %v4063_v9 }
0x1292   : > { %v3065_v12 = vsub.f32 %v3048_v2, %v3062_v11  ;;  %v6911_v2 = vsub.f32 %v6905_v35, %v3426_v1  ;;  %5688 = vmatprep.subr.mxu1 %v8203_v49  ;;  %v4061_v11 = vld [vmem:[%s8193_s25 + $0x8] sm:$0xff] }
0x1293   : > { %5689 = vmatpush3.msra.mxu1 %v4062_v10 }
0x1294   : > { %v3068_v13 = vmul.f32 %v3065_v12, %v3065_v12  ;;  %v3603_v26 = vrot.slane %v6911_v2, %v6908_v28  ;;  %5690 = vmatprep.subr.mxu1 %v8203_v49 }
0x1295   : > { %5691 = vmatpush3.msra.mxu1 %v4061_v11 }
0x1296   : > { %v3075_v15 = vsel %vm2774_vm0, %v3068_v13, 0.0  ;;  %5692 = vmatprep.subr.mxu1 %v8203_v49  ;;  %v3206_v13 = vld [vmem:[%s8266_s6 + $0x18] sm:$0xff] }
0x1297   : > { %3076 = vadd.xlane.f32.xlu0 %v3075_v15  ;;  %5704 = vmatpush3.msra.mxu0 %v3206_v13  ;;  %v3205_v15 = vld [vmem:[%s8266_s6 + $0x10] sm:$0xff] }
0x1298   : > { %5705 = vmatprep.subr.mxu0 %v8203_v49 }
0x1299   : > { %5706 = vmatpush3.msra.mxu0 %v3205_v15 }
0x129a   : > { %5707 = vmatprep.subr.mxu0 %v8203_v49 }
0x1315   : > { %v3071_v17 = vpop.xlane.xlu0 %3070 }
0x1316   : > { %v3078_v19 = vmul.f32 0.03125, %v3071_v17  ;;  %v3204_v17 = vld [vmem:[%s8266_s6 + $0x8] sm:$0xff] }
0x1317   : > { %5708 = vmatpush3.msra.mxu0 %v3204_v17 }
0x1318   : > { %v3081_v20 = vadd.f32 1e-05, %v3078_v19  ;;  %5709 = vmatprep.subr.mxu0 %v8203_v49  ;;  %v3203_v19 = vld [vmem:[%s8266_s6] sm:$0xff] }
0x1319   : > { %v3074_v21 = vpop.xlane.xlu1 %3073  ;;  %5710 = vmatpush3.msra.mxu0 %v3203_v19 }
0x131a   : > { %5962 = vrsqrt.f32 %v3081_v20  ;;  %v3079_v22 = vmul.f32 0.03125, %v3074_v21  ;;  %5737 = vmatprep.subr.mxu0 %v8203_v49 }
0x131c   : > { %v3082_v23 = vadd.f32 1e-05, %v3079_v22 }
0x131e   : > { %5964 = vrsqrt.f32 %v3082_v23 }
0x1320   : > { %v3077_v24 = vpop.xlane.xlu0 %3076 }
0x1321   : > { %v3080_v27 = vmul.f32 0.03125, %v3077_v24 }
0x1323   : > { %v3083_v30 = vadd.f32 1e-05, %v3080_v27 }
0x1325   : > { %5966 = vrsqrt.f32 %v3083_v30 }
0x1327   : > { %v5963_v32 = vpop.eup %5962 }
0x1328   : > { %v3087_v37 = vmul.f32 %v5963_v32, %v3063_v57  ;;  %v6918_v57 = vsub.s32 1, %v6387_v61  ;;  %v3428_v32 = vsub.f32 %v6899_v0, %v3426_v1 }
0x132a   : > { %v3096_v39 = vmul.f32 %v5161_v36, %v3087_v37  ;;  %v6972_v37 = vsub.s32 2, %v6387_v61 }
0x132b   : > { %v5965_v40 = vpop.eup %5964 }
0x132c   : > { %v3105_v41 = vadd.f32 %v5162_v38, %v3096_v39  ;;  %v3088_v42 = vmul.f32 %v5965_v40, %v3064_v6  ;;  %8267 = vst [vmem:[#allocation11_spill] sm:$0xff] %v6972_v37  ;;  %v6978_v40 = vsub.s32 4, %v6387_v61 }
0x132e   : > { %v3110_v14 = vsel %vm1141_vm1, %v3105_v41, 0.0  ;;  %v3097_v43 = vmul.f32 %v5161_v36, %v3088_v42  ;;  %v3432_v42 = vrot.slane %v3428_v32, %v6918_v57 }
0x132f   : > { %3111 = vadd.xlane.f32.xlu1 %v3110_v14  ;;  %v6985_v14 = vsub.s32 6, %v6387_v61 }
0x1330   : > { %v3106_v54 = vadd.f32 %v5162_v38, %v3097_v43  ;;  %v3446_v43 = vrot.slane %v3428_v32, %v6972_v37 }
0x1332   : > { %v5967_v44 = vpop.eup %5966  ;;  %v3113_v31 = vsel %vm1141_vm1, %v3106_v54, 0.0 }
0x1333   : > { %3114 = vadd.xlane.f32.xlu0 %v3113_v31  ;;  %v3089_v33 = vmul.f32 %v5967_v44, %v3065_v12  ;;  %v4060_v12 = vld [vmem:[%s8193_s25] sm:$0xff]  ;;  %v6990_v44 = vsub.s32 7, %v6387_v61 }
0x1334   : > { %5693 = vmatpush3.msra.mxu1 %v4060_v12  ;;  %v3890_v12 = vsub.f32 %v6899_v0, %v3888_v34 }
0x1335   : > { %v3098_v45 = vmul.f32 %v5161_v36, %v3089_v33  ;;  %5720 = vmatprep.subr.mxu1 %v8203_v49 }
0x1337   : > { %v3107_v16 = vadd.f32 %v5162_v38, %v3098_v45  ;;  %v6975_v38 = vsub.s32 3, %v6387_v61  ;;  %v5163_v45 = vld [vmem:[%s8269_s12] ss:$0 sm:$0xff]  ;;  %s5081_s12 = sshll.u32 %s6317_s5, 2 }
0x1338   : > { %s933_s2 = sadd.s32 %s5081_s12, %s8324_s24 }
0x1339   : > { %v3116_v46 = vsel %vm2774_vm0, %v3107_v16, 0.0  ;;  %8268 = vst [vmem:[#allocation12_spill] sm:$0xff] %v6975_v38  ;;  %v3472_v31 = vrot.slane %v3428_v32, %v6975_v38  ;;  %s5082_s22 = sshll.u32 %s933_s2, 3 }
0x133a   : > { %3117 = vadd.xlane.f32.xlu1 %v3116_v46  ;;  %s935_s10 = scalar_lea.vmem %s8309_s9, %s5082_s22 }
0x13b8   : > { %v3112_v62 = vpop.xlane.xlu1 %3111 }
0x13b9   : > { %v3119_v47 = vmul.f32 0.03125, %v3112_v62 }
0x13bb   : > { %v6881_v48 = vsub.f32 %v3105_v41, %v3119_v47  ;;  %v6981_v41 = vsub.s32 5, %v6387_v61  ;;  %v5164_v47 = vld [vmem:[%s8270_s3] ss:$0 sm:$0xff]  ;;  %v3550_v61 = vrot.slane %v3428_v32, %v6985_v14 }
0x13bc   : > { %v3115_v50 = vpop.xlane.xlu0 %3114 }
0x13bd   : > { %v3120_v18 = vmul.f32 0.03125, %v3115_v50  ;;  %v3125_v51 = vmul.f32 %v6881_v48, %v6881_v48  ;;  %v3524_v62 = vrot.slane %v3428_v32, %v6981_v41 }
0x13bf   : > { %v6885_v4 = vsub.f32 %v3106_v54, %v3120_v18  ;;  %v3128_v52 = vsel %vm1141_vm1, %v3125_v51, 0.0  ;;  %v3627_v54 = vrot.slane %v6905_v35, 7  ;;  %v3576_v51 = vrot.slane %v3428_v32, %v6990_v44 }
0x13c0   : > { %3129 = vadd.xlane.f32.xlu0 %v3128_v52 }
0x13c1   : > { %v3126_v53 = vmul.f32 %v6885_v4, %v6885_v4  ;;  %v7004_v50 = vsub.f32 %v6905_v35, %v3627_v54  ;;  %v3965_v54 = vrot.slane %v3890_v12, %v6990_v44 }
0x13c3   : > { %v3118_v55 = vpop.xlane.xlu1 %3117  ;;  %v3131_v56 = vsel %vm1141_vm1, %v3126_v53, 0.0  ;;  %8271 = vst [vmem:[#allocation13_spill] sm:$0xff] %v7004_v50 }
0x13c4   : > { %v3121_v58 = vmul.f32 0.03125, %v3118_v55  ;;  %3132 = vadd.xlane.f32.xlu1 %v3131_v56  ;;  %v3633_v56 = vrot.slane %v7004_v50, %v6918_v57 }
0x13c6   : > { %v6891_v59 = vsub.f32 %v3107_v16, %v3121_v58  ;;  %v3498_v16 = vrot.slane %v3428_v32, %v6978_v40 }
0x13c8   : > { %v3127_v60 = vmul.f32 %v6891_v59, %v6891_v59 }
0x13ca   : > { %v3134_v63 = vsel %vm2774_vm0, %v3127_v60, 0.0 }
0x13cb   : > { %3135 = vadd.xlane.f32.xlu0 %v3134_v63 }
0x1449   : > { %v3130_v20 = vpop.xlane.xlu0 %3129 }
0x144a   : > { %v3137_v21 = vmul.f32 0.03125, %v3130_v20  ;;  %v3894_v20 = vrot.slane %v3890_v12, %v6975_v38 }
0x144c   : > { %v3140_v22 = vadd.f32 1e-05, %v3137_v21 }
0x144d   : > { %v3133_v23 = vpop.xlane.xlu1 %3132 }
0x144e   : > { %5968 = vrsqrt.f32 %v3140_v22  ;;  %v3138_v24 = vmul.f32 0.03125, %v3133_v23  ;;  %v3905_v22 = vrot.slane %v3890_v12, %v6978_v40  ;;  %v3851_v23 = vrot.slane %v6905_v35, 6 }
0x1450   : > { %v3141_v27 = vadd.f32 1e-05, %v3138_v24  ;;  %v4043_v24 = vrot.slane %v6905_v35, 5 }
0x1452   : > { %5970 = vrsqrt.f32 %v3141_v27 }
0x1454   : > { %v3136_v30 = vpop.xlane.xlu0 %3135 }
0x1455   : > { %v3139_v36 = vmul.f32 0.03125, %v3136_v30 }
0x1457   : > { %v3142_v39 = vadd.f32 1e-05, %v3139_v36  ;;  %v3925_v36 = vrot.slane %v3890_v12, %v6981_v41 }
0x1459   : > { %5972 = vrsqrt.f32 %v3142_v39 }
0x145a   : > { %5974 = vrcp.f32 %v3432_v42  ;;  %v7056_v42 = vrot.slane %v6899_v0, %v6908_v28 }
0x145b   : > { %v5969_v33 = vpop.eup %5968  ;;  %5976 = vrcp.f32 %v3446_v43  ;;  %v3945_v43 = vrot.slane %v3890_v12, %v6985_v14  ;;  %v7132_v12 = vrot.slane %v6905_v35, %v6975_v38 }
0x145c   : > { %v3146_v46 = vmul.f32 %v5969_v33, %v6881_v48  ;;  %5978 = vrcp.f32 %v3472_v31  ;;  %v3698_v48 = vsub.f32 %v6899_v0, %v3696_v25  ;;  %v7064_v33 = vrot.slane %v6899_v0, %v6918_v57 }
0x145d   : > { %5980 = vrcp.f32 %v3498_v16  ;;  %8279 = vst [vmem:[#allocation21_spill] sm:$0xff] %v7132_v12 }
0x145e   : > { %v3155_v18 = vmul.f32 %v5163_v45, %v3146_v46  ;;  %5982 = vrcp.f32 %v3524_v62  ;;  %v3702_v63 = vrot.slane %v3698_v48, %v6972_v37  ;;  %v3713_v1 = vrot.slane %v3698_v48, %v6975_v38 }
0x145f   : > { %v5971_v52 = vpop.eup %5970  ;;  %5984 = vrcp.f32 %v3550_v61  ;;  %v3753_v11 = vrot.slane %v3698_v48, %v6981_v41  ;;  %v3793_v13 = vrot.slane %v3698_v48, %v6990_v44  ;;  %v7078_v46 = vrot.slane %v6899_v0, %v6978_v40 }
0x1460   : > { %v7010_v53 = vadd.f32 %v5164_v47, %v3155_v18  ;;  %v3147_v55 = vmul.f32 %v5971_v52, %v6885_v4  ;;  %5986 = vrcp.f32 %v3576_v51  ;;  %v3733_v4 = vrot.slane %v3698_v48, %v6978_v40 }
0x1461   : > { %5988 = vrcp.f32 %v3603_v26  ;;  %v3773_v26 = vrot.slane %v3698_v48, %v6985_v14  ;;  %v7081_v62 = vsub.f32 %v6905_v35, %v3851_v23  ;;  %v7088_v18 = vrot.slane %v6899_v0, %v6981_v41 }
0x1462   : > { %v3170_v58 = vmul.f32 0.70710677, %v7010_v53  ;;  %v3156_v60 = vmul.f32 %v5163_v45, %v3147_v55  ;;  %v7092_v51 = vrot.slane %v6899_v0, %v6985_v14  ;;  %v3167_v52 = vmul.f32 0.5, %v7010_v53 }
0x1463   : > { %8273 = vst [vmem:[#allocation15_spill] sm:$0xff] %v7081_v62  ;;  %v7107_v14 = vrot.slane %v6905_v35, %v6908_v28 }
0x1464   : > { %5990 = verf.f32 %v3170_v58  ;;  %v7021_v25 = vadd.f32 %v5164_v47, %v3156_v60  ;;  %v7111_v58 = vrot.slane %v6905_v35, %v6918_v57 }
0x1465   : > { %5992 = vrcp.f32 %v3633_v56  ;;  %v7101_v56 = vrot.slane %v6899_v0, %v6990_v44  ;;  %8276 = vst [vmem:[#allocation18_spill] sm:$0xff] %v7107_v14 }
0x1466   : > { %v5973_v9 = vpop.eup %5972  ;;  %v3171_v10 = vmul.f32 0.70710677, %v7021_v25  ;;  %5994 = vrcp.f32 %v3702_v63  ;;  %8277 = vst [vmem:[#allocation19_spill] sm:$0xff] %v7111_v58 }
0x1467   : > { %v3148_v2 = vmul.f32 %v5973_v9, %v6891_v59  ;;  %5996 = vrcp.f32 %v3713_v1  ;;  %v7032_v15 = vpop.eup %5974  ;;  %v3168_v9 = vmul.f32 0.5, %v7021_v25 }
0x1468   : > { %5998 = verf.f32 %v3171_v10  ;;  %v7034_v19 = vpop.eup %5976 }
0x1469   : > { %v3157_v17 = vmul.f32 %v5163_v45, %v3148_v2  ;;  %6000 = vrcp.f32 %v3733_v4  ;;  %v7037_v21 = vpop.eup %5978  ;;  %v7072_v45 = vrot.slane %v6899_v0, %v6975_v38 }
0x146a   : > { %6002 = vrcp.f32 %v3753_v11  ;;  %v7039_v59 = vpop.eup %5980  ;;  %v7128_v11 = vrot.slane %v6905_v35, %v6972_v37 }
0x146b   : > { %v3166_v34 = vadd.f32 %v5164_v47, %v3157_v17  ;;  %6004 = vrcp.f32 %v3773_v26  ;;  %v7044_v27 = vpop.eup %5982  ;;  %v7084_v47 = vsub.f32 %v6905_v35, %v4043_v24 }
0x146c   : > { %6006 = vrcp.f32 %v3793_v13  ;;  %v7052_v39 = vpop.eup %5984  ;;  %8278 = vst [vmem:[#allocation20_spill] sm:$0xff] %v7128_v11 }
0x146d   : > { %v3172_v30 = vmul.f32 0.70710677, %v3166_v34  ;;  %6008 = vrcp.f32 %v3814_v5  ;;  %v7060_v31 = vpop.eup %5986  ;;  %v7068_v5 = vrot.slane %v6899_v0, %v6972_v37  ;;  %8274 = vst [vmem:[#allocation16_spill] sm:$0xff] %v7084_v47  ;;  %v3169_v10 = vmul.f32 0.5, %v3166_v34 }
0x146e   : > { %6010 = vrcp.f32 %v3894_v20  ;;  %v7074_v16 = vpop.eup %5988 }
0x146f   : > { %6012 = verf.f32 %v3172_v30  ;;  %8272 = vst [vmem:[#allocation14_spill] sm:$0xff] %v7074_v16  ;;  %v4067_v16 = vld [vmem:[%s8193_s25 + $0x38] sm:$0xff] }
0x1470   : > { %6014 = vrcp.f32 %v3905_v22 }
0x1471   : > { %v5991_v61 = vpop.eup %5990  ;;  %6016 = vrcp.f32 %v3925_v36 }
0x1472   : > { %v7096_v48 = vpop.eup %5992  ;;  %v3176_v55 = vadd.f32 1.0, %v5991_v61  ;;  %6018 = vrcp.f32 %v3945_v43 }
0x1473   : > { %8275 = vst [vmem:[#allocation17_spill] sm:$0xff] %v7096_v48  ;;  %v7103_v41 = vpop.eup %5994  ;;  %6020 = vrcp.f32 %v3965_v54 }
0x1474   : > { %v7115_v60 = vpop.eup %5996  ;;  %v7117_v63 = vmul.f32 %v3176_v55, %v3167_v52 }
0x1475   : > { %v5999_v4 = vpop.eup %5998 }
0x1476   : > { %v7134_v2 = vpop.eup %6000  ;;  %v3177_v26 = vadd.f32 1.0, %v5999_v4  ;;  %vm3213_vm5 = vcmp.ge.f32.partialorder %v7117_v63, %v7056_v42  ;;  %vm3220_vm6 = vcmp.lt.f32.partialorder %v7117_v63, %v7064_v33  ;;  %vm3232_vm7 = vcmp.ge.f32.partialorder %v7117_v63, %v7064_v33 }
0x1477   : > { %v7142_v25 = vpop.eup %6002  ;;  %vm3223_vm8 = vmand %vm3213_vm5, %vm3220_vm6  ;;  %vm3239_vm9 = vcmp.lt.f32.partialorder %v7117_v63, %v7068_v5  ;;  %vm3251_vm10 = vcmp.ge.f32.partialorder %v7117_v63, %v7068_v5  ;;  %vm3258_vm11 = vcmp.lt.f32.partialorder %v7117_v63, %v7072_v45  ;;  %vm3270_vm12 = vcmp.ge.f32.partialorder %v7117_v63, %v7072_v45 }
0x1478   : > { %v7152_v35 = vpop.eup %6004  ;;  %v7154_v13 = vmul.f32 %v3177_v26, %v3168_v9  ;;  %v5168_v17 = vsel %vm3223_vm8, 1.0, %v8203_v49  ;;  %vm3242_vm13 = vmand %vm3232_vm7, %vm3239_vm9  ;;  %vm3277_vm14 = vcmp.lt.f32.partialorder %v7117_v63, %v7078_v46  ;;  %v3422_v20 = vsub.f32 %v7117_v63, %v7056_v42 }
0x1479   : > { %v7161_v34 = vpop.eup %6006  ;;  %v5171_v22 = vsel %vm3242_vm13, 1.0, %v8203_v49  ;;  %vm3261_vm15 = vmand %vm3251_vm10, %vm3258_vm11  ;;  %v3440_v23 = vsub.f32 %v7068_v5, %v7117_v63  ;;  %v7168_v24 = vsub.f32 %v7117_v63, %v7064_v33  ;;  %v3466_v30 = vsub.f32 %v7072_v45, %v7117_v63 }
0x147a   : > { %v7172_v36 = vpop.eup %6008  ;;  %v5174_v43 = vsel %vm3261_vm15, 1.0, %v8203_v49  ;;  %vm3280_vm3 = vmand %vm3270_vm12, %vm3277_vm14  ;;  %v3434_v54 = vmul.f32 %v7032_v15, %v3422_v20  ;;  %v7181_v61 = vsub.f32 %v7117_v63, %v7068_v5  ;;  %v3492_v52 = vsub.f32 %v7078_v46, %v7117_v63 }
0x147b   : > { %8280 = vst [vmem:[#allocation22_spill] sm:$0xff] %v7172_v36  ;;  %v7185_v55 = vpop.eup %6010  ;;  %v7188_v4 = vsel %vm3280_vm3, 1.0, %v8203_v49  ;;  %v3448_v9 = vmul.f32 %v7034_v19, %v3440_v23  ;;  %v3460_v26 = vmul.f32 %v7034_v19, %v7168_v24  ;;  %v3474_v1 = vmul.f32 %v7037_v21, %v3466_v30 }
0x147c   : > { %v6013_v44 = vpop.eup %6012  ;;  %v3437_v0 = vmul.f32 %v5168_v17, %v3434_v54  ;;  %v3486_v53 = vmul.f32 %v7037_v21, %v7181_v61  ;;  %v3500_v40 = vmul.f32 %v7039_v59, %v3492_v52  ;;  %v3704_v32 = vmul.f32 %v7103_v41, %v3422_v20 }
0x147d   : > { %v7198_v8 = vpop.eup %6014  ;;  %v3178_v7 = vadd.f32 1.0, %v6013_v44  ;;  %v3451_v6 = vmul.f32 %v5171_v22, %v3448_v9  ;;  %v3463_v49 = vmul.f32 %v5171_v22, %v3460_v26  ;;  %v3477_v23 = vmul.f32 %v5174_v43, %v3474_v1 }
0x147e   : > { %v7200_v12 = vpop.eup %6016  ;;  %v3489_v11 = vmul.f32 %v5174_v43, %v3486_v53  ;;  %v3503_v47 = vmul.f32 %v7188_v4, %v3500_v40  ;;  %v3715_v17 = vmul.f32 %v7115_v60, %v3466_v30  ;;  %v3724_v54 = vmul.f32 %v7115_v60, %v7168_v24 }
0x147f   : > { %v7206_v62 = vpop.eup %6018  ;;  %v7208_v38 = vmul.f32 %v3178_v7, %v3169_v10  ;;  %v3454_v37 = vadd.f32 %v3451_v6, %v3437_v0  ;;  %v3480_v50 = vadd.f32 %v3477_v23, %v3463_v49  ;;  %v3735_v44 = vmul.f32 %v7134_v2, %v3492_v52 }
0x1480   : > { %v7211_v22 = vpop.eup %6020  ;;  %v7213_v1 = vadd.f32 %v3503_v47, %v3489_v11  ;;  %v3896_v53 = vmul.f32 %v7185_v55, %v3422_v20  ;;  %v3907_v40 = vmul.f32 %v7198_v8, %v3492_v52  ;;  %vm3214_vm0 = vcmp.ge.f32.partialorder %v7154_v13, %v7056_v42 }
0x1481   : > { %v3707_v30 = vmul.f32 %v3704_v32, %v3454_v37  ;;  %v3718_v43 = vmul.f32 %v3715_v17, %v3480_v50  ;;  %v3727_v9 = vmul.f32 %v3724_v54, %v3480_v50  ;;  %vm3221_vm4 = vcmp.lt.f32.partialorder %v7154_v13, %v7064_v33 }
0x1482   : > { %v3738_v49 = vmul.f32 %v3735_v44, %v7213_v1  ;;  %vm3224_vm5 = vmand %vm3214_vm0, %vm3221_vm4  ;;  %vm3233_vm6 = vcmp.ge.f32.partialorder %v7154_v13, %v7064_v33  ;;  %vm3240_vm7 = vcmp.lt.f32.partialorder %v7154_v13, %v7068_v5  ;;  %vm3252_vm8 = vcmp.ge.f32.partialorder %v7154_v13, %v7068_v5 }
0x1483   : > { %v3721_v6 = vadd.f32 %v3718_v43, %v3707_v30  ;;  %v8281_v7 = vmov 0.0   ;;  %vm3243_vm9 = vmand %vm3233_vm6, %vm3240_vm7  ;;  %vm3259_vm10 = vcmp.lt.f32.partialorder %v7154_v13, %v7072_v45  ;;  %vm3271_vm11 = vcmp.ge.f32.partialorder %v7154_v13, %v7072_v45 }
0x1484   : > { %v5169_v37 = vsel %vm3224_vm5, 1.0, %v8281_v7  ;;  %v7233_v50 = vadd.f32 %v3738_v49, %v3727_v9  ;;  %v5172_v32 = vsel %vm3243_vm9, 1.0, %v8281_v7  ;;  %vm3262_vm12 = vmand %vm3252_vm8, %vm3259_vm10  ;;  %vm3278_vm13 = vcmp.lt.f32.partialorder %v7154_v13, %v7078_v46 }
0x1485   : > { %v3423_v47 = vsub.f32 %v7154_v13, %v7056_v42  ;;  %v3899_v0 = vmul.f32 %v3896_v53, %v3721_v6  ;;  %v5175_v10 = vsel %vm3262_vm12, 1.0, %v8281_v7  ;;  %vm3281_vm14 = vmand %vm3271_vm11, %vm3278_vm13  ;;  %v3441_v11 = vsub.f32 %v7068_v5, %v7154_v13 }
0x1486   : > { %v7245_v20 = vsub.f32 %v7154_v13, %v7064_v33  ;;  %v3910_v52 = vmul.f32 %v3907_v40, %v7233_v50  ;;  %v7249_v26 = vsel %vm3281_vm14, 1.0, %v8281_v7  ;;  %v3467_v17 = vsub.f32 %v7072_v45, %v7154_v13 }
0x1487   : > { %v3435_v23 = vmul.f32 %v7032_v15, %v3423_v47  ;;  %v3449_v54 = vmul.f32 %v7034_v19, %v3441_v11  ;;  %v7259_v53 = vsub.f32 %v7154_v13, %v7068_v5  ;;  %v3493_v40 = vsub.f32 %v7078_v46, %v7154_v13 }
0x1488   : > { %v3461_v44 = vmul.f32 %v7034_v19, %v7245_v20  ;;  %v3913_v30 = vadd.f32 %v3910_v52, %v3899_v0  ;;  %v3475_v9 = vmul.f32 %v7037_v21, %v3467_v17  ;;  %v3705_v49 = vmul.f32 %v7103_v41, %v3423_v47 }
0x1489   : > { %v3438_v43 = vmul.f32 %v5169_v37, %v3435_v23  ;;  %v3452_v6 = vmul.f32 %v5172_v32, %v3449_v54  ;;  %v3487_v11 = vmul.f32 %v7037_v21, %v7259_v53  ;;  %v3501_v48 = vmul.f32 %v7039_v59, %v3493_v40 }
0x148a   : > { %v3464_v36 = vmul.f32 %v5172_v32, %v3461_v44  ;;  %5695 = vmatmul.mubr.msk.f32.vlgmr.msra.gmra.mxu1 %vm1141_vm1, %v3913_v30  ;;  %v3478_v58 = vmul.f32 %v5175_v10, %v3475_v9  ;;  %v3716_v37 = vmul.f32 %v7115_v60, %v3467_v17  ;;  %v3725_v0 = vmul.f32 %v7115_v60, %v7245_v20  ;;  %v4066_v30 = vld [vmem:[%s8193_s25 + $0x30] sm:$0xff] }
0x148b   : > { %v3736_v52 = vmul.f32 %v7134_v2, %v3493_v40  ;;  %5697 = vmatprep.mubr.msk.f32.mxu1 %vm6122_vm2, %v8281_v7  ;;  %v3455_v32 = vadd.f32 %v3452_v6, %v3438_v43  ;;  %v3490_v23 = vmul.f32 %v5175_v10, %v3487_v11  ;;  %v3504_v54 = vmul.f32 %v7249_v26, %v3501_v48 }
0x148c   : > { %v3897_v44 = vmul.f32 %v7185_v55, %v3423_v47  ;;  %v3481_v9 = vadd.f32 %v3478_v58, %v3464_v36  ;;  %v3908_v17 = vmul.f32 %v7198_v8, %v3493_v40  ;;  %5721 = vmatpush3.msra.mxu1 %v4067_v16  ;;  %vm3215_vm15 = vcmp.ge.f32.partialorder %v7208_v38, %v7056_v42  ;;  %v4065_v16 = vld [vmem:[%s8193_s25 + $0x28] sm:$0xff] }
0x148d   : > { %vm3222_vm3 = vcmp.lt.f32.partialorder %v7208_v38, %v7064_v33  ;;  %v7288_v43 = vadd.f32 %v3504_v54, %v3490_v23  ;;  %v3708_v10 = vmul.f32 %v3705_v49, %v3455_v32  ;;  %5722 = vmatprep.subr.mxu1 %v8281_v7  ;;  %vm3234_vm4 = vcmp.ge.f32.partialorder %v7208_v38, %v7064_v33  ;;  %v4064_v49 = vld [vmem:[%s8193_s25 + $0x20] sm:$0xff] }
0x148e   : > { %vm3225_vm0 = vmand %vm3215_vm15, %vm3222_vm3  ;;  %vm3241_vm5 = vcmp.lt.f32.partialorder %v7208_v38, %v7068_v5  ;;  %v3719_v48 = vmul.f32 %v3716_v37, %v3481_v9  ;;  %v3728_v58 = vmul.f32 %v3725_v0, %v3481_v9  ;;  %5723 = vmatpush3.msra.mxu1 %v4066_v30  ;;  %vm3253_vm7 = vcmp.ge.f32.partialorder %v7208_v38, %v7068_v5 }
0x148f   : > { %v5170_v36 = vsel %vm3225_vm0, 1.0, %v8281_v7  ;;  %vm3244_vm6 = vmand %vm3234_vm4, %vm3241_vm5  ;;  %v3739_v47 = vmul.f32 %v3736_v52, %v7288_v43  ;;  %vm3260_vm8 = vcmp.lt.f32.partialorder %v7208_v38, %v7072_v45  ;;  %vm3272_vm9 = vcmp.ge.f32.partialorder %v7208_v38, %v7072_v45  ;;  %5724 = vmatprep.subr.mxu1 %v8281_v7 }
0x1490   : > { %v5173_v40 = vsel %vm3244_vm6, 1.0, %v8281_v7  ;;  %v3722_v6 = vadd.f32 %v3719_v48, %v3708_v10  ;;  %vm3263_vm10 = vmand %vm3253_vm7, %vm3260_vm8  ;;  %vm3279_vm11 = vcmp.lt.f32.partialorder %v7208_v38, %v7078_v46  ;;  %v3424_v11 = vsub.f32 %v7208_v38, %v7056_v42  ;;  %5725 = vmatpush3.msra.mxu1 %v4065_v16 }
0x1491   : > { %v3442_v37 = vsub.f32 %v7068_v5, %v7208_v38  ;;  %v7317_v0 = vadd.f32 %v3739_v47, %v3728_v58  ;;  %v5176_v52 = vsel %vm3263_vm10, 1.0, %v8281_v7  ;;  %vm3282_vm12 = vmand %vm3272_vm9, %vm3279_vm11  ;;  %v7322_v32 = vsub.f32 %v7208_v38, %v7064_v33  ;;  %5726 = vmatprep.subr.mxu1 %v8281_v7 }
0x1492   : > { %v3468_v23 = vsub.f32 %v7072_v45, %v7208_v38  ;;  %v3900_v54 = vmul.f32 %v3897_v44, %v3722_v6  ;;  %v7328_v42 = vsel %vm3282_vm12, 1.0, %v8281_v7  ;;  %v3436_v30 = vmul.f32 %v7032_v15, %v3424_v11  ;;  %5727 = vmatpush3.msra.mxu1 %v4064_v49 }
0x1493   : > { %v3450_v9 = vmul.f32 %v7034_v19, %v3442_v37  ;;  %v3911_v10 = vmul.f32 %v3908_v17, %v7317_v0  ;;  %v3462_v33 = vmul.f32 %v7034_v19, %v7322_v32  ;;  %v7338_v48 = vsub.f32 %v7208_v38, %v7068_v5  ;;  %5754 = vmatprep.subr.mxu1 %v8281_v7 }
0x1494   : > { %v3476_v16 = vmul.f32 %v7037_v21, %v3468_v23  ;;  %v3439_v44 = vmul.f32 %v5170_v36, %v3436_v30  ;;  %v3494_v15 = vsub.f32 %v7078_v46, %v7208_v38  ;;  %v3706_v47 = vmul.f32 %v7103_v41, %v3424_v11 }
0x1495   : > { %v3453_v58 = vmul.f32 %v5173_v40, %v3450_v9  ;;  %v3914_v49 = vadd.f32 %v3911_v10, %v3900_v54  ;;  %v3465_v17 = vmul.f32 %v5173_v40, %v3462_v33  ;;  %v3488_v19 = vmul.f32 %v7037_v21, %v7338_v48 }
0x1496   : > { %v3479_v6 = vmul.f32 %v5176_v52, %v3476_v16  ;;  %v3502_v14 = vmul.f32 %v7039_v59, %v3494_v15  ;;  %v3717_v5 = vmul.f32 %v7115_v60, %v3468_v23  ;;  %v3726_v36 = vmul.f32 %v7115_v60, %v7322_v32 }
0x1497   : > { %v3456_v37 = vadd.f32 %v3453_v58, %v3439_v44  ;;  %5698 = vmatmul.mubr.msk.f32.gmra.mxu1 %vm1141_vm1, %v3914_v49  ;;  %v3491_v9 = vmul.f32 %v5176_v52, %v3488_v19  ;;  %v3737_v41 = vmul.f32 %v7134_v2, %v3494_v15  ;;  %v3898_v40 = vmul.f32 %v7185_v55, %v3424_v11 }
0x1498   : > { %v3482_v30 = vadd.f32 %v3479_v6, %v3465_v17  ;;  %5700 = vmatprep.mubr.msk.f32.mxu1 %vm6122_vm2, %v8281_v7  ;;  %v3505_v21 = vmul.f32 %v7328_v42, %v3502_v14  ;;  %v3909_v10 = vmul.f32 %v7198_v8, %v3494_v15  ;;  %vm3289_vm13 = vcmp.ge.f32.partialorder %v7117_v63, %v7078_v46 }
0x1499   : > { %v3709_v54 = vmul.f32 %v3706_v47, %v3456_v37  ;;  %vm3296_vm14 = vcmp.lt.f32.partialorder %v7117_v63, %v7088_v18  ;;  %v7363_v52 = vsub.f32 %v7117_v63, %v7072_v45  ;;  %v3518_v14 = vsub.f32 %v7088_v18, %v7117_v63 }
0x149a   : > { %v3720_v60 = vmul.f32 %v3717_v5, %v3482_v30  ;;  %v3729_v23 = vmul.f32 %v3726_v36, %v3482_v30  ;;  %v3508_v55 = vadd.f32 %v3505_v21, %v3491_v9  ;;  %vm3299_vm15 = vmand %vm3289_vm13, %vm3296_vm14  ;;  %v3744_v11 = vmul.f32 %v7134_v2, %v7181_v61 }
0x149b   : > { %v3916_v33 = vmul.f32 %v7198_v8, %v7168_v24  ;;  %v7372_v44 = vsel %vm3299_vm15, 1.0, %v8281_v7  ;;  %v3512_v58 = vmul.f32 %v7039_v59, %v7363_v52  ;;  %v5165_v15 = vmul.f32 -1.442695, %v7117_v63 }
0x149c   : > { %v3723_v16 = vadd.f32 %v3720_v60, %v3709_v54  ;;  %v3740_v47 = vmul.f32 %v3737_v41, %v3508_v55  ;;  %v3526_v49 = vmul.f32 %v7044_v27, %v3518_v14  ;;  %v3747_v17 = vmul.f32 %v3744_v11, %v7213_v1 }
0x149d   : > { %v3755_v6 = vmul.f32 %v7142_v25, %v3518_v14  ;;  %v3515_v37 = vmul.f32 %v7188_v4, %v3512_v58  ;;  %v3919_v24 = vmul.f32 %v3916_v33, %v7233_v50  ;;  %v3927_v5 = vmul.f32 %v7200_v12, %v3518_v14 }
0x149e   : > { %v3901_v19 = vmul.f32 %v3898_v40, %v3723_v16  ;;  %v3743_v36 = vadd.f32 %v3740_v47, %v3729_v23  ;;  %v3529_v30 = vmul.f32 %v7372_v44, %v3526_v49  ;;  %6022 = vpow2.f32 %v5165_v15 }
0x149f   : > { %vm3290_vm3 = vcmp.ge.f32.partialorder %v7154_v13, %v7078_v46  ;;  %vm3297_vm0 = vcmp.lt.f32.partialorder %v7154_v13, %v7088_v18  ;;  %v7390_v1 = vsub.f32 %v7154_v13, %v7072_v45  ;;  %v3519_v4 = vsub.f32 %v7088_v18, %v7154_v13 }
0x14a0   : > { %v3745_v50 = vmul.f32 %v7134_v2, %v7259_v53  ;;  %v3912_v9 = vmul.f32 %v3909_v10, %v3743_v36  ;;  %v7396_v41 = vadd.f32 %v3529_v30, %v3515_v37  ;;  %vm3300_vm4 = vmand %vm3290_vm3, %vm3297_vm0  ;;  %v3917_v40 = vmul.f32 %v7198_v8, %v7245_v20 }
0x14a1   : > { %v5166_v21 = vmul.f32 -1.442695, %v7154_v13  ;;  %v7402_v54 = vsel %vm3300_vm4, 1.0, %v8281_v7  ;;  %v3513_v60 = vmul.f32 %v7039_v59, %v7390_v1  ;;  %v3527_v23 = vmul.f32 %v7044_v27, %v3519_v4 }
0x14a2   : > { %v3748_v14 = vmul.f32 %v3745_v50, %v7288_v43  ;;  %v3915_v11 = vadd.f32 %v3912_v9, %v3901_v19  ;;  %v3758_v10 = vmul.f32 %v3755_v6, %v7396_v41  ;;  %v3756_v33 = vmul.f32 %v7142_v25, %v3519_v4 }
0x14a3   : > { %v3920_v16 = vmul.f32 %v3917_v40, %v7317_v0  ;;  %v3516_v20 = vmul.f32 %v7249_v26, %v3513_v60  ;;  %v3530_v58 = vmul.f32 %v7402_v54, %v3527_v23  ;;  %v3928_v15 = vmul.f32 %v7200_v12, %v3519_v4 }
0x14a4   : > { %6024 = vpow2.f32 %v5166_v21  ;;  %5701 = vmatmul.mubr.msk.f32.gmra.mxu1 %vm1141_vm1, %v3915_v11  ;;  %v7415_v47 = vadd.f32 %v3758_v10, %v3747_v17  ;;  %vm3291_vm5 = vcmp.ge.f32.partialorder %v7208_v38, %v7078_v46  ;;  %vm3298_vm6 = vcmp.lt.f32.partialorder %v7208_v38, %v7088_v18 }
0x14a5   : > { %v7423_v43 = vsub.f32 %v7208_v38, %v7072_v45  ;;  %5728 = vmatprep.mubr.msk.f32.mxu1 %vm6122_vm2, %v8281_v7  ;;  %v7427_v26 = vadd.f32 %v3530_v58, %v3516_v20  ;;  %vm3301_vm7 = vmand %vm3291_vm5, %vm3298_vm6  ;;  %v3520_v0 = vsub.f32 %v7088_v18, %v7208_v38  ;;  %v3746_v49 = vmul.f32 %v7134_v2, %v7338_v48 }
0x14a6   : > { %v3918_v17 = vmul.f32 %v7198_v8, %v7322_v32  ;;  %v3930_v6 = vmul.f32 %v3927_v5, %v7415_v47  ;;  %v7437_v45 = vsel %vm3301_vm7, 1.0, %v8281_v7  ;;  %vm3308_vm8 = vcmp.ge.f32.partialorder %v7117_v63, %v7088_v18  ;;  %v4075_v8 = vld [vmem:[%s8193_s25 + $0x78] sm:$0xff] }
0x14a7   : > { %v3514_v19 = vmul.f32 %v7039_v59, %v7423_v43  ;;  %v3759_v37 = vmul.f32 %v3756_v33, %v7427_v26  ;;  %v3528_v30 = vmul.f32 %v7044_v27, %v3520_v0  ;;  %v3749_v4 = vmul.f32 %v3746_v49, %v3508_v55  ;;  %v4074_v55 = vld [vmem:[%s8193_s25 + $0x70] sm:$0xff]  ;;  %v4073_v49 = vld [vmem:[%s8193_s25 + $0x68] sm:$0xff] }
0x14a8   : > { %v3757_v2 = vmul.f32 %v7142_v25, %v3520_v0  ;;  %v3933_v50 = vadd.f32 %v3930_v6, %v3919_v24  ;;  %v3921_v5 = vmul.f32 %v3918_v17, %v3743_v36  ;;  %v3929_v59 = vmul.f32 %v7200_v12, %v3520_v0 }
0x14a9   : > { %v3517_v32 = vmul.f32 %v7328_v42, %v3514_v19  ;;  %v7451_v9 = vadd.f32 %v3759_v37, %v3748_v14  ;;  %v3531_v40 = vmul.f32 %v7437_v45, %v3528_v30  ;;  %vm3315_vm9 = vcmp.lt.f32.partialorder %v7117_v63, %v7092_v51 }
0x14aa   : > { %vm3327_vm10 = vcmp.ge.f32.partialorder %v7117_v63, %v7092_v51  ;;  %5729 = vmatmul.mubr.msk.f32.vlgmr.msra.gmra.mxu1 %vm1141_vm1, %v3933_v50  ;;  %vm3318_vm11 = vmand %vm3308_vm8, %vm3315_vm9  ;;  %vm3334_vm12 = vcmp.lt.f32.partialorder %v7117_v63, %v7101_v56  ;;  %v7469_v42 = vsub.f32 %v7117_v63, %v7078_v46  ;;  %v7473_v24 = vsub.f32 %v7092_v51, %v7117_v63 }
0x14ab   : > { %v7477_v36 = vsub.f32 %v7117_v63, %v7088_v18  ;;  %v6023_v21 = vpop.eup %6022  ;;  %5731 = vmatprep.mubr.msk.f32.mxu1 %vm6122_vm2, %v8281_v7  ;;  %v3931_v60 = vmul.f32 %v3928_v15, %v7451_v9  ;;  %5755 = vmatpush3.msra.mxu1 %v4075_v8  ;;  %v7482_v23 = vadd.f32 %v3531_v40, %v3517_v32  ;;  %v5183_v14 = vsel %vm3318_vm11, 1.0, %v8281_v7  ;;  %vm3337_vm13 = vmand %vm3327_vm10, %vm3334_vm12 }
0x14ac   : > { %v3570_v11 = vsub.f32 %v7101_v56, %v7117_v63  ;;  %v3191_v10 = vadd.f32 1.0, %v6023_v21  ;;  %5756 = vmatprep.subr.mxu1 %v8281_v7  ;;  %v7489_v33 = vsel %vm3337_vm13, 1.0, %v8281_v7  ;;  %v3538_v20 = vmul.f32 %v7044_v27, %v7469_v42 }
0x14ad   : > { %v3552_v58 = vmul.f32 %v7052_v39, %v7473_v24  ;;  %v3934_v15 = vadd.f32 %v3931_v60, %v3920_v16  ;;  %5757 = vmatpush3.msra.mxu1 %v4074_v55  ;;  %v3760_v0 = vmul.f32 %v3757_v2, %v7482_v23  ;;  %v3564_v17 = vmul.f32 %v7052_v39, %v7477_v36  ;;  %v4072_v2 = vld [vmem:[%s8193_s25 + $0x60] sm:$0xff] }
0x14ae   : > { %v3578_v6 = vmul.f32 %v7060_v31, %v3570_v11  ;;  %6026 = vrcp.f32 %v3191_v10  ;;  %5758 = vmatprep.subr.mxu1 %v8281_v7  ;;  %v3541_v19 = vmul.f32 %v7372_v44, %v3538_v20  ;;  %v3764_v16 = vmul.f32 %v7142_v25, %v7363_v52 }
0x14af   : > { %v3555_v37 = vmul.f32 %v5183_v14, %v3552_v58  ;;  %5732 = vmatmul.mubr.msk.f32.gmra.mxu1 %vm1141_vm1, %v3934_v15  ;;  %v7507_v30 = vadd.f32 %v3760_v0, %v3749_v4  ;;  %v3567_v50 = vmul.f32 %v5183_v14, %v3564_v17  ;;  %v3775_v32 = vmul.f32 %v7152_v35, %v7473_v24 }
0x14b0   : > { %v3581_v8 = vmul.f32 %v7489_v33, %v3578_v6  ;;  %5734 = vmatprep.mubr.msk.f32.mxu1 %vm6122_vm2, %v8281_v7  ;;  %5759 = vmatpush3.msra.mxu1 %v4073_v49  ;;  %v3767_v55 = vmul.f32 %v3764_v16, %v7396_v41  ;;  %v3784_v4 = vmul.f32 %v7152_v35, %v7469_v42  ;;  %v5167_v21 = vmul.f32 -1.442695, %v7208_v38 }
0x14b1   : > { %v6025_v40 = vpop.eup %6024  ;;  %v3558_v44 = vadd.f32 %v3555_v37, %v3541_v19  ;;  %v3932_v14 = vmul.f32 %v3929_v59, %v7507_v30  ;;  %5760 = vmatprep.subr.mxu1 %v8281_v7  ;;  %v3795_v20 = vmul.f32 %v7161_v34, %v3570_v11  ;;  %v3956_v41 = vmul.f32 %v7206_v62, %v7363_v52 }
0x14b2   : > { %v3192_v60 = vadd.f32 1.0, %v6025_v40  ;;  %v7523_v10 = vadd.f32 %v3581_v8, %v3567_v50  ;;  %5761 = vmatpush3.msra.mxu1 %v4072_v2  ;;  %v3967_v0 = vmul.f32 %v7211_v22, %v3570_v11  ;;  %vm3309_vm14 = vcmp.ge.f32.partialorder %v7154_v13, %v7088_v18 }
0x14b3   : > { %v3778_v58 = vmul.f32 %v3775_v32, %v3558_v44  ;;  %v3787_v15 = vmul.f32 %v3784_v4, %v3558_v44  ;;  %v3935_v49 = vadd.f32 %v3932_v14, %v3921_v5  ;;  %5788 = vmatprep.subr.mxu1 %v8281_v7  ;;  %vm3316_vm15 = vcmp.lt.f32.partialorder %v7154_v13, %v7092_v51 }
0x14b4   : > { %6028 = vrcp.f32 %v3192_v60  ;;  %v3798_v17 = vmul.f32 %v3795_v20, %v7523_v10  ;;  %vm3328_vm3 = vcmp.ge.f32.partialorder %v7154_v13, %v7092_v51  ;;  %vm3319_vm0 = vmand %vm3309_vm14, %vm3316_vm15  ;;  %vm3335_vm4 = vcmp.lt.f32.partialorder %v7154_v13, %v7101_v56 }
0x14b5   : > { %v3781_v59 = vadd.f32 %v3778_v58, %v3767_v55  ;;  %6030 = vpow2.f32 %v5167_v21  ;;  %5735 = vmatmul.mubr.msk.f32.gmra.mxu1 %vm1141_vm1, %v3935_v49  ;;  %v7544_v5 = vsub.f32 %v7154_v13, %v7078_v46  ;;  %v7548_v11 = vsub.f32 %v7092_v51, %v7154_v13  ;;  %vm3338_vm5 = vmand %vm3328_vm3, %vm3335_vm4  ;;  %v4083_v58 = vld [vmem:[%s8193_s25 + $0xb8] sm:$0xff] }
0x14b6   : > { %v7538_v52 = vadd.f32 %v3798_v17, %v3787_v15  ;;  %5762 = vmatprep.mubr.msk.f32.mxu1 %vm6122_vm2, %v8281_v7  ;;  %v5184_v19 = vsel %vm3319_vm0, 1.0, %v8281_v7  ;;  %v7555_v37 = vsub.f32 %v7154_v13, %v7088_v18  ;;  %v3571_v16 = vsub.f32 %v7101_v56, %v7154_v13 }
0x14b7   : > { %v3959_v6 = vmul.f32 %v3956_v41, %v3781_v59  ;;  %v7561_v50 = vsel %vm3338_vm5, 1.0, %v8281_v7  ;;  %v3539_v8 = vmul.f32 %v7044_v27, %v7544_v5  ;;  %v3553_v32 = vmul.f32 %v7052_v39, %v7548_v11 }
0x14b8   : > { %v3970_v2 = vmul.f32 %v3967_v0, %v7538_v52  ;;  %v3565_v40 = vmul.f32 %v7052_v39, %v7555_v37  ;;  %v3579_v44 = vmul.f32 %v7060_v31, %v3571_v16  ;;  %v3765_v55 = vmul.f32 %v7142_v25, %v7390_v1 }
0x14b9   : > { %v3776_v4 = vmul.f32 %v7152_v35, %v7548_v11  ;;  %v3542_v60 = vmul.f32 %v7402_v54, %v3539_v8  ;;  %v3556_v14 = vmul.f32 %v5184_v19, %v3553_v32  ;;  %v3785_v20 = vmul.f32 %v7152_v35, %v7544_v5 }
0x14ba   : > { %v3973_v21 = vadd.f32 %v3970_v2, %v3959_v6  ;;  %v3568_v15 = vmul.f32 %v5184_v19, %v3565_v40  ;;  %v3582_v41 = vmul.f32 %v7561_v50, %v3579_v44  ;;  %v3768_v0 = vmul.f32 %v3765_v55, %v7427_v26  ;;  %v4082_v19 = vld [vmem:[%s8193_s25 + $0xb0] sm:$0xff]  ;;  %v4071_v40 = vld [vmem:[%s8193_s25 + $0x58] sm:$0xff] }
0x14bb   : > { %v3796_v49 = vmul.f32 %v7161_v34, %v3571_v16  ;;  %v6027_v17 = vpop.eup %6026  ;;  %v3559_v6 = vadd.f32 %v3556_v14, %v3542_v60  ;;  %v3957_v54 = vmul.f32 %v7206_v62, %v7390_v1  ;;  %v3968_v2 = vmul.f32 %v7211_v22, %v3571_v16 }
0x14bc   : > { %5763 = vmatmul.mubr.msk.f32.vlgmr.msra.gmra.mxu1 %vm1141_vm1, %v3973_v21  ;;  %v3936_v8 = vmul.f32 %v7200_v12, %v7181_v61  ;;  %v8282_v26 = vrot.slane %v6923_v3, %v6918_v57  ;;  %v3200_v32 = vmul.f32 %v6027_v17, %v7117_v63  ;;  %v7601_v1 = vadd.f32 %v3582_v41, %v3568_v15  ;;  %v4070_v21 = vld [vmem:[%s8193_s25 + $0x50] sm:$0xff] }
0x14bd   : > { %5765 = vmatprep.mubr.msk.f32.mxu1 %vm6122_vm2, %v8281_v7  ;;  %5789 = vmatpush3.msra.mxu1 %v4083_v58  ;;  %v3947_v61 = vmul.f32 %v7206_v62, %v7473_v24  ;;  %v3779_v16 = vmul.f32 %v3776_v4, %v3559_v6  ;;  %v3788_v44 = vmul.f32 %v3785_v20, %v3559_v6 }
0x14be   : > { %6032 = vrcp.f32 %v8282_v26  ;;  %v3939_v3 = vmul.f32 %v3936_v8, %v7415_v47  ;;  %5790 = vmatprep.subr.mxu1 %v8281_v7  ;;  %vm3310_vm6 = vcmp.ge.f32.partialorder %v7208_v38, %v7088_v18  ;;  %v8283_v55 = vrot.slane %v6928_v29, %v6908_v28  ;;  %5712 = vmatmul.mubr.msk.f32.vlgmr.msra.gmra.mxu0 %vm1141_vm1, %v3200_v32  ;;  %v4081_v47 = vld [vmem:[%s8193_s25 + $0xa8] sm:$0xff] }
0x14bf   : > { %v3799_v24 = vmul.f32 %v3796_v49, %v7601_v1  ;;  %v3950_v4 = vmul.f32 %v3947_v61, %v3781_v59  ;;  %5791 = vmatpush3.msra.mxu1 %v4082_v19  ;;  %vm3317_vm7 = vcmp.lt.f32.partialorder %v7208_v38, %v7092_v51  ;;  %v8284_v28 = vrot.slane %v6928_v29, %v6918_v57 }
0x14c0   : > { %6034 = vrcp.f32 %v8283_v55  ;;  %5714 = vmatprep.mubr.msk.f32.mxu0 %vm6122_vm2, %v8281_v7  ;;  %5738 = vmatpush3.msra.mxu0 %v4071_v40  ;;  %v7627_v60 = vadd.f32 %v3779_v16, %v3768_v0  ;;  %vm3320_vm8 = vmand %vm3310_vm6, %vm3317_vm7  ;;  %vm3329_vm9 = vcmp.ge.f32.partialorder %v7208_v38, %v7092_v51  ;;  %vm3336_vm10 = vcmp.lt.f32.partialorder %v7208_v38, %v7101_v56  ;;  %v4069_v0 = vld [vmem:[%s8193_s25 + $0x48] sm:$0xff] }
0x14c1   : > { %6036 = vrcp.f32 %v8284_v28  ;;  %v6029_v59 = vpop.eup %6028  ;;  %5739 = vmatprep.subr.mxu0 %v8281_v7  ;;  %v7634_v14 = vadd.f32 %v3799_v24, %v3788_v44  ;;  %v7636_v57 = vadd.f32 %v3950_v4, %v3939_v3  ;;  %v5185_v20 = vsel %vm3320_vm8, 1.0, %v8281_v7  ;;  %vm3339_vm11 = vmand %vm3329_vm9, %vm3336_vm10  ;;  %5792 = vmatprep.subr.mxu1 %v8281_v7 }
0x14c2   : > { %v7641_v58 = vsub.f32 %v7208_v38, %v7078_v46  ;;  %v6031_v15 = vpop.eup %6030  ;;  %v3201_v41 = vmul.f32 %v6029_v59, %v7154_v13  ;;  %5740 = vmatpush3.msra.mxu0 %v4070_v21  ;;  %v3960_v49 = vmul.f32 %v3957_v54, %v7627_v60  ;;  %v7650_v17 = vsel %vm3339_vm11, 1.0, %v8281_v7  ;;  %5793 = vmatpush3.msra.mxu1 %v4081_v47  ;;  %v4068_v54 = vld [vmem:[%s8193_s25 + $0x40] sm:$0xff] }
0x14c3   : > { %8285 = vst [vmem:[#allocation23_spill] sm:$0xff] %v7634_v14  ;;  %v7654_v6 = vsub.f32 %v7092_v51, %v7208_v38  ;;  %5741 = vmatprep.subr.mxu0 %v8281_v7  ;;  %v3193_v46 = vadd.f32 1.0, %v6031_v15  ;;  %v3971_v8 = vmul.f32 %v3968_v2, %v7634_v14  ;;  %v7662_v26 = vsub.f32 %v7208_v38, %v7088_v18  ;;  %v4080_v21 = vld [vmem:[%s8193_s25 + $0xa0] sm:$0xff] }
0x14c4   : > { %8286 = vst [vmem:[#allocation24_spill] sm:$0xff] %v7641_v58  ;;  %v3540_v19 = vmul.f32 %v7044_v27, %v7641_v58  ;;  %5794 = vmatprep.subr.mxu1 %v8281_v7  ;;  %5715 = vmatmul.mubr.msk.f32.gmra.mxu0 %vm1141_vm1, %v3201_v41  ;;  %v3572_v2 = vsub.f32 %v7101_v56, %v7208_v38 }
0x14c5   : > { %v3554_v32 = vmul.f32 %v7052_v39, %v7654_v6  ;;  %v3766_v27 = vmul.f32 %v7142_v25, %v7423_v43  ;;  %v3777_v18 = vmul.f32 %v7152_v35, %v7654_v6  ;;  %5717 = vmatprep.mubr.msk.f32.mxu0 %vm6122_vm2, %v8281_v7  ;;  %5742 = vmatpush3.msra.mxu0 %v4069_v0  ;;  %6038 = vrcp.f32 %v3193_v46 }
0x14c6   : > { %v3974_v40 = vadd.f32 %v3971_v8, %v3960_v49  ;;  %v3543_v61 = vmul.f32 %v7437_v45, %v3540_v19  ;;  %v3566_v16 = vmul.f32 %v7052_v39, %v7662_v26  ;;  %5743 = vmatprep.subr.mxu0 %v8281_v7  ;;  %v3580_v3 = vmul.f32 %v7060_v31, %v3572_v2  ;;  %v8288_v49 = vld [vmem:[#allocation19_spill] sm:$0xff] }
0x14c7   : > { %v3557_v44 = vmul.f32 %v5185_v20, %v3554_v32  ;;  %v3769_v25 = vmul.f32 %v3766_v27, %v7482_v23  ;;  %v3786_v55 = vmul.f32 %v7152_v35, %v7641_v58  ;;  %5744 = vmatpush3.msra.mxu0 %v4068_v54  ;;  %v3797_v39 = vmul.f32 %v7161_v34, %v3572_v2 }
0x14c8   : > { %5766 = vmatmul.mubr.msk.f32.gmra.mxu1 %vm1141_vm1, %v3974_v40  ;;  %v3569_v45 = vmul.f32 %v5185_v20, %v3566_v16  ;;  %v3958_v24 = vmul.f32 %v7206_v62, %v7423_v43  ;;  %5771 = vmatprep.subr.mxu0 %v8281_v7  ;;  %v3583_v35 = vmul.f32 %v7650_v17, %v3580_v3  ;;  %v8287_v43 = vld [vmem:[#allocation18_spill] sm:$0xff] }
0x14c9   : > { %5768 = vmatprep.mubr.msk.f32.mxu1 %vm6122_vm2, %v8281_v7  ;;  %v3560_v23 = vadd.f32 %v3557_v44, %v3543_v61  ;;  %v3969_v4 = vmul.f32 %v7211_v22, %v3572_v2  ;;  %v3937_v47 = vmul.f32 %v7200_v12, %v7259_v53  ;;  %v3948_v28 = vmul.f32 %v7206_v62, %v7548_v11  ;;  %v8290_v44 = vld [vmem:[#allocation14_spill] sm:$0xff] }
0x14ca   : > { %5795 = vmatpush3.msra.mxu1 %v4080_v21  ;;  %vm3346_vm12 = vcmp.ge.f32.partialorder %v7117_v63, %v7101_v56  ;;  %vm3353_vm13 = vcmp.lt.f32.partialorder %v7117_v63, %v8287_v43  ;;  %v7709_v20 = vadd.f32 %v3583_v35, %v3569_v45  ;;  %vm3365_vm15 = vcmp.ge.f32.partialorder %v7117_v63, %v8287_v43 }
0x14cb   : > { %v7707_v59 = vpop.eup %6032  ;;  %v3780_v15 = vmul.f32 %v3777_v18, %v3560_v23  ;;  %v3789_v41 = vmul.f32 %v3786_v55, %v3560_v23  ;;  %vm3356_vm14 = vmand %vm3346_vm12, %vm3353_vm13  ;;  %5822 = vmatprep.subr.mxu1 %v8281_v7  ;;  %v3940_v53 = vmul.f32 %v3937_v47, %v7451_v9  ;;  %v3951_v11 = vmul.f32 %v3948_v28, %v7627_v60  ;;  %v8291_v55 = vld [vmem:[#allocation17_spill] sm:$0xff] }
0x14cc   : > { %v5189_v0 = vsel %vm3356_vm14, 1.0, %v8281_v7  ;;  %vm3372_vm3 = vcmp.lt.f32.partialorder %v7117_v63, %v8288_v49  ;;  %v3800_v19 = vmul.f32 %v3797_v39, %v7709_v20  ;;  %v7724_v54 = vsub.f32 %v7117_v63, %v7092_v51  ;;  %v8292_v39 = vld [vmem:[#allocation22_spill] sm:$0xff] }
0x14cd   : > { %v7719_v46 = vpop.eup %6034  ;;  %v3783_v8 = vadd.f32 %v3780_v15, %v3769_v25  ;;  %vm3375_vm0 = vmand %vm3365_vm15, %vm3372_vm3  ;;  %v7728_v9 = vsub.f32 %v8287_v43, %v7117_v63  ;;  %v7732_v32 = vadd.f32 %v3951_v11, %v3940_v53  ;;  %v7739_v27 = vsub.f32 %v7117_v63, %v7101_v56 }
0x14ce   : > { %v7730_v60 = vpop.eup %6036  ;;  %v7735_v2 = vsel %vm3375_vm0, 1.0, %v8281_v7  ;;  %v3623_v18 = vsub.f32 %v8288_v49, %v7117_v63  ;;  %v7743_v40 = vadd.f32 %v3800_v19, %v3789_v41  ;;  %v3590_v16 = vmul.f32 %v7060_v31, %v7724_v54 }
0x14cf   : > { %8289 = vst [vmem:[#allocation18_spill] sm:$0xff] %v7739_v27  ;;  %v3961_v61 = vmul.f32 %v3958_v24, %v3783_v8  ;;  %v3605_v3 = vmul.f32 %v8290_v44, %v7728_v9  ;;  %v3617_v25 = vmul.f32 %v8290_v44, %v7739_v27  ;;  %v3804_v45 = vmul.f32 %v7161_v34, %v7477_v36 }
0x14d0   : > { %v3635_v21 = vmul.f32 %v8291_v55, %v3623_v18  ;;  %v3816_v23 = vmul.f32 %v8292_v39, %v7728_v9  ;;  %v3972_v35 = vmul.f32 %v3969_v4, %v7743_v40  ;;  %v3593_v24 = vmul.f32 %v7489_v33, %v3590_v16 }
0x14d1   : > { %v3608_v47 = vmul.f32 %v5189_v0, %v3605_v3  ;;  %v3825_v28 = vmul.f32 %v8292_v39, %v7724_v54  ;;  %v3620_v15 = vmul.f32 %v5189_v0, %v3617_v25  ;;  %v3807_v53 = vmul.f32 %v3804_v45, %v7523_v10 }
0x14d2   : > { %v3638_v41 = vmul.f32 %v7735_v2, %v3635_v21  ;;  %v3836_v11 = vmul.f32 %v7707_v59, %v3623_v18  ;;  %v6039_v19 = vpop.eup %6038  ;;  %v3975_v58 = vadd.f32 %v3972_v35, %v3961_v61  ;;  %v3997_v14 = vmul.f32 %v7719_v46, %v7477_v36  ;;  %v4078_v35 = vld [vmem:[%s8193_s25 + $0x90] sm:$0xff] }
0x14d3   : > { %v3611_v27 = vadd.f32 %v3608_v47, %v3593_v24  ;;  %v4008_v4 = vmul.f32 %v7730_v60, %v3623_v18  ;;  %v3202_v33 = vmul.f32 %v6039_v19, %v7208_v38  ;;  %v3938_v0 = vmul.f32 %v7200_v12, %v7338_v48 }
0x14d4   : > { %v7767_v16 = vadd.f32 %v3638_v41, %v3620_v15  ;;  %v3949_v10 = vmul.f32 %v7206_v62, %v7654_v6  ;;  %5769 = vmatmul.mubr.msk.f32.gmra.mxu1 %vm1141_vm1, %v3975_v58  ;;  %vm3347_vm4 = vcmp.ge.f32.partialorder %v7154_v13, %v7101_v56  ;;  %vm3354_vm5 = vcmp.lt.f32.partialorder %v7154_v13, %v8287_v43  ;;  %v4079_v6 = vld [vmem:[%s8193_s25 + $0x98] sm:$0xff] }
0x14d5   : > { %v3819_v3 = vmul.f32 %v3816_v23, %v3611_v27  ;;  %v3828_v61 = vmul.f32 %v3825_v28, %v3611_v27  ;;  %5718 = vmatmul.mubr.msk.f32.gmra.mxu0 %vm1141_vm1, %v3202_v33  ;;  %5796 = vmatprep.mubr.msk.f32.mxu1 %vm6122_vm2, %v8281_v7  ;;  %v3941_v48 = vmul.f32 %v3938_v0, %v7507_v30  ;;  %vm3357_vm6 = vmand %vm3347_vm4, %vm3354_vm5  ;;  %v4077_v33 = vld [vmem:[%s8193_s25 + $0x88] sm:$0xff] }
0x14d6   : > { %v3839_v12 = vmul.f32 %v3836_v11, %v7767_v16  ;;  %v3952_v62 = vmul.f32 %v3949_v10, %v3783_v8  ;;  %5745 = vmatprep.mubr.msk.f32.mxu0 %vm6122_vm2, %v8281_v7  ;;  %v5190_v58 = vsel %vm3357_vm6, 1.0, %v8281_v7  ;;  %vm3366_vm7 = vcmp.ge.f32.partialorder %v7154_v13, %v8287_v43 }
0x14d7   : > { %v3822_v36 = vadd.f32 %v3819_v3, %v3807_v53  ;;  %vm3373_vm8 = vcmp.lt.f32.partialorder %v7154_v13, %v8288_v49  ;;  %v7797_v8 = vsub.f32 %v7154_v13, %v7092_v51  ;;  %v7801_v18 = vsub.f32 %v8287_v43, %v7154_v13 }
0x14d8   : > { %v7793_v27 = vadd.f32 %v3839_v12, %v3828_v61  ;;  %v3955_v30 = vadd.f32 %v3952_v62, %v3941_v48  ;;  %vm3376_vm9 = vmand %vm3366_vm7, %vm3373_vm8  ;;  %v7808_v45 = vsub.f32 %v7154_v13, %v7101_v56  ;;  %v3624_v23 = vsub.f32 %v8288_v49, %v7154_v13  ;;  %v8293_v12 = vld [vmem:[#allocation13_spill] sm:$0xff]  ;;  %v8294_v48 = vld [vmem:[#allocation11_spill] sm:$0xff] }
0x14d9   : > { %v4000_v25 = vmul.f32 %v3997_v14, %v3822_v36  ;;  %v7804_v21 = vsel %vm3376_vm9, 1.0, %v8281_v7  ;;  %5746 = vmatmul.mubr.msk.f32.vlgmr.msra.gmra.mxu0 %vm1141_vm1, %v7636_v57  ;;  %v3591_v14 = vmul.f32 %v7060_v31, %v7797_v8  ;;  %v3606_v47 = vmul.f32 %v8290_v44, %v7801_v18 }
0x14da   : > { %v4011_v24 = vmul.f32 %v4008_v4, %v7793_v27  ;;  %v3805_v28 = vmul.f32 %v7161_v34, %v7555_v37  ;;  %5772 = vmatpush3.msra.mxu0 %v4079_v6  ;;  %5748 = vmatprep.mubr.msk.f32.mxu0 %vm6122_vm2, %v8281_v7  ;;  %v3618_v57 = vmul.f32 %v8290_v44, %v7808_v45  ;;  %v4091_v6 = vld [vmem:[%s8193_s25 + $0xf8] sm:$0xff] }
0x14db   : > { %v3636_v15 = vmul.f32 %v8291_v55, %v3624_v23  ;;  %v3817_v41 = vmul.f32 %v8292_v39, %v7801_v18  ;;  %5773 = vmatprep.subr.mxu0 %v8281_v7  ;;  %v3594_v11 = vmul.f32 %v7561_v50, %v3591_v14  ;;  %v3609_v19 = vmul.f32 %v5190_v58, %v3606_v47  ;;  %v8297_v14 = vld [vmem:[#allocation12_spill] sm:$0xff] }
0x14dc   : > { %v4014_v53 = vadd.f32 %v4011_v24, %v4000_v25  ;;  %v3808_v4 = vmul.f32 %v3805_v28, %v7601_v1  ;;  %5774 = vmatpush3.msra.mxu0 %v4078_v35  ;;  %v3621_v0 = vmul.f32 %v5190_v58, %v3618_v57  ;;  %v3826_v3 = vmul.f32 %v8292_v39, %v7797_v8  ;;  %v4090_v57 = vld [vmem:[%s8193_s25 + $0xf0] sm:$0xff] }
0x14dd   : > { %v3639_v10 = vmul.f32 %v7804_v21, %v3636_v15  ;;  %v3837_v61 = vmul.f32 %v7707_v59, %v3624_v23  ;;  %v8295_v62 = vrot.slane %v8293_v12, %v8294_v48  ;;  %5749 = vmatmul.mubr.msk.f32.gmra.mxu0 %vm1141_vm1, %v7732_v32  ;;  %5775 = vmatprep.subr.mxu0 %v8281_v7  ;;  %v8299_v15 = vld [vmem:[#allocation15_spill] sm:$0xff] }
0x14de   : > { %v3612_v50 = vadd.f32 %v3609_v19, %v3594_v11  ;;  %v3998_v1 = vmul.f32 %v7719_v46, %v7555_v37  ;;  %v4009_v58 = vmul.f32 %v7730_v60, %v3624_v23  ;;  %v8296_v25 = vrot.slane %v6928_v29, %v8294_v48  ;;  %5797 = vmatmul.mubr.msk.f32.vlgmr.msra.gmra.mxu1 %vm1141_vm1, %v4014_v53  ;;  %v4076_v29 = vld [vmem:[%s8193_s25 + $0x80] sm:$0xff]  ;;  %v8302_v11 = vld [vmem:[#allocation16_spill] sm:$0xff] }
0x14df   : > { %6040 = vrcp.f32 %v8295_v62  ;;  %5751 = vmatprep.mubr.msk.f32.mxu0 %vm6122_vm2, %v8281_v7  ;;  %v7859_v32 = vadd.f32 %v3639_v10, %v3621_v0  ;;  %v3976_v37 = vmul.f32 %v7211_v22, %v7469_v42  ;;  %v3988_v23 = vmul.f32 %v7719_v46, %v7728_v9  ;;  %5776 = vmatpush3.msra.mxu0 %v4077_v33  ;;  %v4087_v33 = vld [vmem:[%s8193_s25 + $0xd8] sm:$0xff] }
0x14e0   : > { %6042 = vrcp.f32 %v8296_v25  ;;  %5799 = vmatprep.mubr.msk.f32.mxu1 %vm6122_vm2, %v8281_v7  ;;  %v3820_v35 = vmul.f32 %v3817_v41, %v3612_v50  ;;  %v3829_v24 = vmul.f32 %v3826_v3, %v3612_v50  ;;  %vm3348_vm10 = vcmp.ge.f32.partialorder %v7208_v38, %v7101_v56  ;;  %5777 = vmatprep.subr.mxu0 %v8281_v7 }
0x14e1   : > { %v8298_v47 = vrot.slane %v8293_v12, %v8297_v14  ;;  %v3840_v42 = vmul.f32 %v3837_v61, %v7859_v32  ;;  %5823 = vmatpush3.msra.mxu1 %v4091_v6  ;;  %v3979_v9 = vmul.f32 %v3976_v37, %v7538_v52  ;;  %v3991_v28 = vmul.f32 %v3988_v23, %v3822_v36 }
0x14e2   : > { %v8300_v41 = vrot.slane %v8299_v15, %v8294_v48  ;;  %5752 = vmatmul.mubr.msk.f32.gmra.mxu0 %vm1141_vm1, %v3955_v30  ;;  %v7885_v53 = vadd.f32 %v3820_v35, %v3808_v4  ;;  %5824 = vmatprep.subr.mxu1 %v8281_v7  ;;  %vm3355_vm11 = vcmp.lt.f32.partialorder %v7208_v38, %v8287_v43  ;;  %v4089_v35 = vld [vmem:[%s8193_s25 + $0xe8] sm:$0xff] }
0x14e3   : > { %6044 = vrcp.f32 %v8298_v47  ;;  %vm3367_vm12 = vcmp.ge.f32.partialorder %v7208_v38, %v8287_v43  ;;  %v8301_v52 = vrot.slane %v8299_v15, %v8297_v14  ;;  %5778 = vmatpush3.msra.mxu0 %v4076_v29  ;;  %v7895_v36 = vadd.f32 %v3840_v42, %v3829_v24  ;;  %5779 = vmatprep.mubr.msk.f32.mxu0 %vm6122_vm2, %v8281_v7  ;;  %vm3358_vm13 = vmand %vm3348_vm10, %vm3355_vm11 }
0x14e4   : > { %6046 = vrcp.f32 %v8300_v41  ;;  %v3994_v30 = vadd.f32 %v3991_v28, %v3979_v9  ;;  %vm3374_vm14 = vcmp.lt.f32.partialorder %v7208_v38, %v8288_v49  ;;  %v8303_v19 = vrot.slane %v8302_v11, %v8297_v14  ;;  %5805 = vmatprep.subr.mxu0 %v8281_v7  ;;  %5825 = vmatpush3.msra.mxu1 %v4090_v57  ;;  %v4088_v9 = vld [vmem:[%s8193_s25 + $0xe0] sm:$0xff]  ;;  %v8304_v57 = vld [vmem:[#allocation20_spill] sm:$0xff] }
0x14e5   : > { %6048 = vrcp.f32 %v8301_v52  ;;  %v4001_v4 = vmul.f32 %v3998_v1, %v7885_v53  ;;  %v5191_v0 = vsel %vm3358_vm13, 1.0, %v8281_v7  ;;  %vm3377_vm15 = vmand %vm3367_vm12, %vm3374_vm14  ;;  %v7915_v10 = vsub.f32 %v7208_v38, %v7092_v51  ;;  %5826 = vmatprep.subr.mxu1 %v8281_v7  ;;  %v8305_v52 = vld [vmem:[#allocation23_spill] sm:$0xff] }
0x14e6   : > { %6050 = vrcp.f32 %v8303_v19  ;;  %v7919_v3 = vsub.f32 %v8287_v43, %v7208_v38  ;;  %v4012_v61 = vmul.f32 %v4009_v58, %v7895_v36  ;;  %v7923_v12 = vsel %vm3377_vm15, 1.0, %v8281_v7  ;;  %5780 = vmatmul.mubr.msk.f32.vlgmr.msra.gmra.mxu0 %vm1141_vm1, %v3994_v30  ;;  %5827 = vmatpush3.msra.mxu1 %v4089_v35  ;;  %v8307_v35 = vld [vmem:[#allocation18_spill] sm:$0xff] }
0x14e7   : > { %v7927_v48 = vsub.f32 %v7208_v38, %v7101_v56  ;;  %v3625_v62 = vsub.f32 %v8288_v49, %v7208_v38  ;;  %v3592_v51 = vmul.f32 %v7060_v31, %v7915_v10  ;;  %v3806_v1 = vmul.f32 %v7161_v34, %v7662_v26  ;;  %5806 = vmatpush3.msra.mxu0 %v4087_v33 }
0x14e8   : > { %v3607_v50 = vmul.f32 %v8290_v44, %v7919_v3  ;;  %v3818_v56 = vmul.f32 %v8292_v39, %v7919_v3  ;;  %v4015_v58 = vadd.f32 %v4012_v61, %v4001_v4  ;;  %v3827_v37 = vmul.f32 %v8292_v39, %v7915_v10  ;;  %5782 = vmatprep.mubr.msk.f32.mxu0 %vm6122_vm2, %v8281_v7 }
0x14e9   : > { %v3619_v6 = vmul.f32 %v8290_v44, %v7927_v48  ;;  %v3637_v25 = vmul.f32 %v8291_v55, %v3625_v62  ;;  %v3595_v31 = vmul.f32 %v7650_v17, %v3592_v51  ;;  %v3809_v29 = vmul.f32 %v3806_v1, %v7709_v20  ;;  %v4086_v44 = vld [vmem:[%s8193_s25 + $0xd0] sm:$0xff]  ;;  %5807 = vmatprep.subr.mxu0 %v8281_v7 }
0x14ea   : > { %v3610_v23 = vmul.f32 %v5191_v0, %v3607_v50  ;;  %v3838_v34 = vmul.f32 %v7707_v59, %v3625_v62  ;;  %5800 = vmatmul.mubr.msk.f32.gmra.mxu1 %vm1141_vm1, %v4015_v58  ;;  %v3999_v20 = vmul.f32 %v7719_v46, %v7662_v26  ;;  %v4010_v24 = vmul.f32 %v7730_v60, %v3625_v62 }
0x14eb   : > { %v3622_v39 = vmul.f32 %v5191_v0, %v3619_v6  ;;  %v3640_v17 = vmul.f32 %v7923_v12, %v3637_v25  ;;  %5802 = vmatprep.mubr.msk.f32.mxu1 %vm6122_vm2, %v8281_v7  ;;  %v3977_v47 = vmul.f32 %v7211_v22, %v7544_v5  ;;  %v3989_v42 = vmul.f32 %v7719_v46, %v7801_v18  ;;  %v4085_v5 = vld [vmem:[%s8193_s25 + $0xc8] sm:$0xff]  ;;  %v8306_v0 = vld [vmem:[#allocation21_spill] sm:$0xff] }
0x14ec   : > { %v3613_v14 = vadd.f32 %v3610_v23, %v3595_v31  ;;  %v7972_v28 = vpop.eup %6040  ;;  %5808 = vmatpush3.msra.mxu0 %v4086_v44  ;;  %vm3384_vm3 = vcmp.ge.f32.partialorder %v7117_v63, %v8288_v49  ;;  %vm3391_vm0 = vcmp.lt.f32.partialorder %v7117_v63, %v8304_v57  ;;  %5828 = vmatprep.subr.mxu1 %v8281_v7 }
0x14ed   : > { %v7974_v26 = vadd.f32 %v3640_v17, %v3622_v39  ;;  %v7983_v18 = vpop.eup %6042  ;;  %v3980_v30 = vmul.f32 %v3977_v47, %v8305_v52  ;;  %v3992_v11 = vmul.f32 %v3989_v42, %v7885_v53  ;;  %vm3394_vm4 = vmand %vm3384_vm3, %vm3391_vm0  ;;  %5829 = vmatpush3.msra.mxu1 %v4088_v9  ;;  %5809 = vmatprep.subr.mxu0 %v8281_v7 }
0x14ee   : > { %v3821_v15 = vmul.f32 %v3818_v56, %v3613_v14  ;;  %v3830_v41 = vmul.f32 %v3827_v37, %v3613_v14  ;;  %v5195_v33 = vsel %vm3394_vm4, 1.0, %v8281_v7  ;;  %vm3403_vm5 = vcmp.ge.f32.partialorder %v7117_v63, %v8304_v57  ;;  %5810 = vmatpush3.msra.mxu0 %v4085_v5  ;;  %v4084_v37 = vld [vmem:[%s8193_s25 + $0xc0] sm:$0xff] }
0x14ef   : > { %v3841_v4 = vmul.f32 %v3838_v34, %v7974_v26  ;;  %vm3410_vm6 = vcmp.lt.f32.partialorder %v7117_v63, %v8306_v0  ;;  %v3995_v62 = vadd.f32 %v3992_v11, %v3980_v30  ;;  %v3644_v51 = vsub.f32 %v7117_v63, %v8287_v43  ;;  %5811 = vmatprep.subr.mxu0 %v8281_v7 }
0x14f0   : > { %v7988_v19 = vpop.eup %6044  ;;  %v3824_v53 = vadd.f32 %v3821_v15, %v3809_v29  ;;  %vm3413_vm7 = vmand %vm3403_vm5, %vm3410_vm6  ;;  %v8003_v50 = vsub.f32 %v8304_v57, %v7117_v63  ;;  %v3670_v6 = vsub.f32 %v7117_v63, %v8288_v49  ;;  %v3679_v25 = vsub.f32 %v8306_v0, %v7117_v63  ;;  %5812 = vmatpush3.msra.mxu0 %v4084_v37 }
0x14f1   : > { %v7997_v61 = vpop.eup %6046  ;;  %v8007_v56 = vadd.f32 %v3841_v4, %v3830_v41  ;;  %v5198_v58 = vsel %vm3413_vm7, 1.0, %v8281_v7  ;;  %5783 = vmatmul.mubr.msk.f32.gmra.mxu0 %vm1141_vm1, %v3995_v62  ;;  %v3647_v29 = vmul.f32 %v8291_v55, %v3644_v51  ;;  %v3845_v44 = vmul.f32 %v7707_v59, %v8307_v35  ;;  %v8308_v4 = vld [vmem:[#allocation24_spill] sm:$0xff] }
0x14f2   : > { %v8005_v1 = vpop.eup %6048  ;;  %v4002_v23 = vmul.f32 %v3999_v20, %v3824_v53  ;;  %v3661_v34 = vmul.f32 %v7972_v28, %v8003_v50  ;;  %v3673_v39 = vmul.f32 %v7972_v28, %v3670_v6  ;;  %v3687_v17 = vmul.f32 %v7988_v19, %v3679_v25  ;;  %5785 = vmatprep.mubr.msk.f32.mxu0 %vm6122_vm2, %v8281_v7 }
0x14f3   : > { %v8018_v31 = vpop.eup %6050  ;;  %v4013_v63 = vmul.f32 %v4010_v24, %v8007_v56  ;;  %v3859_v14 = vmul.f32 %v7997_v61, %v8003_v50  ;;  %v3650_v20 = vmul.f32 %v7735_v2, %v3647_v29  ;;  %v3848_v42 = vmul.f32 %v3845_v44, %v7767_v16 }
0x14f4   : > { %v3664_v47 = vmul.f32 %v5195_v33, %v3661_v34  ;;  %v3868_v9 = vmul.f32 %v7997_v61, %v3644_v51  ;;  %v3676_v24 = vmul.f32 %v5195_v33, %v3673_v39  ;;  %v3690_v15 = vmul.f32 %v5198_v58, %v3687_v17 }
0x14f5   : > { %v4016_v5 = vadd.f32 %v4013_v63, %v4002_v23  ;;  %v3879_v41 = vmul.f32 %v8005_v1, %v3679_v25  ;;  %v4037_v30 = vmul.f32 %v7983_v18, %v8307_v35  ;;  %v4051_v11 = vmul.f32 %v8018_v31, %v3679_v25 }
0x14f6   : > { %v3667_v52 = vadd.f32 %v3664_v47, %v3650_v20  ;;  %v3978_v2 = vmul.f32 %v7211_v22, %v8308_v4  ;;  %v3693_v16 = vadd.f32 %v3690_v15, %v3676_v24  ;;  %v3990_v62 = vmul.f32 %v7719_v46, %v7919_v3 }
0x14f7   : > { %5803 = vmatmul.mubr.msk.f32.gmra.mxu1 %vm1141_vm1, %v4016_v5  ;;  %vm3385_vm8 = vcmp.ge.f32.partialorder %v7154_v13, %v8288_v49  ;;  %vm3392_vm9 = vcmp.lt.f32.partialorder %v7154_v13, %v8304_v57  ;;  %vm3404_vm11 = vcmp.ge.f32.partialorder %v7154_v13, %v8304_v57  ;;  %vm3411_vm12 = vcmp.lt.f32.partialorder %v7154_v13, %v8306_v0 }
0x14f8   : > { %5830 = vmatprep.mubr.msk.f32.mxu1 %vm6122_vm2, %v8281_v7  ;;  %v3862_v33 = vmul.f32 %v3859_v14, %v3667_v52  ;;  %v3871_v51 = vmul.f32 %v3868_v9, %v3667_v52  ;;  %v3981_v58 = vmul.f32 %v3978_v2, %v7743_v40  ;;  %vm3395_vm10 = vmand %vm3385_vm8, %vm3392_vm9  ;;  %v3882_v22 = vmul.f32 %v3879_v41, %v3693_v16 }
0x14f9   : > { %v3993_v6 = vmul.f32 %v3990_v62, %v3824_v53  ;;  %v5196_v46 = vsel %vm3395_vm10, 1.0, %v8281_v7  ;;  %vm3414_vm13 = vmand %vm3404_vm11, %vm3411_vm12  ;;  %v3645_v25 = vsub.f32 %v7154_v13, %v8287_v43  ;;  %v8061_v37 = vsub.f32 %v8304_v57, %v7154_v13 }
0x14fa   : > { %v3865_v3 = vadd.f32 %v3862_v33, %v3848_v42  ;;  %v3671_v40 = vsub.f32 %v7154_v13, %v8288_v49  ;;  %v3885_v23 = vadd.f32 %v3882_v22, %v3871_v51  ;;  %v5199_v53 = vsel %vm3414_vm13, 1.0, %v8281_v7 }
0x14fb   : > { %v3996_v29 = vadd.f32 %v3993_v6, %v3981_v58  ;;  %v3680_v34 = vsub.f32 %v8306_v0, %v7154_v13  ;;  %v3648_v44 = vmul.f32 %v8291_v55, %v3645_v25  ;;  %v3662_v63 = vmul.f32 %v7972_v28, %v8061_v37 }
0x14fc   : > { %v4040_v35 = vmul.f32 %v4037_v30, %v3865_v3  ;;  %v3674_v39 = vmul.f32 %v7972_v28, %v3671_v40  ;;  %v4054_v17 = vmul.f32 %v4051_v11, %v3885_v23  ;;  %v3846_v20 = vmul.f32 %v7707_v59, %v7808_v45 }
0x14fd   : > { %5786 = vmatmul.mubr.msk.f32.gmra.mxu0 %vm1141_vm1, %v3996_v29  ;;  %v3688_v14 = vmul.f32 %v7988_v19, %v3680_v34  ;;  %v3860_v47 = vmul.f32 %v7997_v61, %v8061_v37  ;;  %v3651_v13 = vmul.f32 %v7804_v21, %v3648_v44  ;;  %v3665_v42 = vmul.f32 %v5196_v46, %v3662_v63 }
0x14fe   : > { %v3677_v9 = vmul.f32 %v5196_v46, %v3674_v39  ;;  %v3869_v5 = vmul.f32 %v7997_v61, %v3645_v25  ;;  %5813 = vmatprep.mubr.msk.f32.mxu0 %vm6122_vm2, %v8281_v7  ;;  %v4057_v24 = vadd.f32 %v4054_v17, %v4040_v35  ;;  %v3849_v41 = vmul.f32 %v3846_v20, %v7859_v32 }
0x14ff   : > { %v3691_v15 = vmul.f32 %v5199_v53, %v3688_v14  ;;  %v3880_v52 = vmul.f32 %v8005_v1, %v3680_v34  ;;  %v3668_v30 = vadd.f32 %v3665_v42, %v3651_v13  ;;  %v4038_v11 = vmul.f32 %v7983_v18, %v7808_v45 }
0x1500   : > { %v4052_v4 = vmul.f32 %v8018_v31, %v3680_v34  ;;  %v4017_v21 = vmul.f32 %v7730_v60, %v7724_v54  ;;  %5831 = vmatmul.mubr.msk.f32.vlgmr.msra.gmra.mxu1 %vm1141_vm1, %v4057_v24  ;;  %v4028_v16 = vmul.f32 %v7983_v18, %v8003_v50  ;;  %vm3386_vm14 = vcmp.ge.f32.partialorder %v7208_v38, %v8288_v49 }
0x1501   : > { %v3694_v2 = vadd.f32 %v3691_v15, %v3677_v9  ;;  %vm3393_vm15 = vcmp.lt.f32.partialorder %v7208_v38, %v8304_v57  ;;  %5833 = vmatprep.mubr.msk.f32.mxu1 %vm6122_vm2, %v8281_v7  ;;  %v3863_v45 = vmul.f32 %v3860_v47, %v3668_v30  ;;  %v3872_v32 = vmul.f32 %v3869_v5, %v3668_v30 }
0x1502   : > { %v4020_v62 = vmul.f32 %v4017_v21, %v7793_v27  ;;  %vm3396_vm3 = vmand %vm3386_vm14, %vm3393_vm15  ;;  %vm3405_vm0 = vcmp.ge.f32.partialorder %v7208_v38, %v8304_v57  ;;  %v4031_v33 = vmul.f32 %v4028_v16, %v3865_v3  ;;  %vm3412_vm4 = vcmp.lt.f32.partialorder %v7208_v38, %v8306_v0 }
0x1503   : > { %v3883_v54 = vmul.f32 %v3880_v52, %v3694_v2  ;;  %v5197_v50 = vsel %vm3396_vm3, 1.0, %v8281_v7  ;;  %v3866_v51 = vadd.f32 %v3863_v45, %v3849_v41  ;;  %vm3415_vm5 = vmand %vm3405_vm0, %vm3412_vm4  ;;  %v3646_v58 = vsub.f32 %v7208_v38, %v8287_v43 }
0x1504   : > { %v3655_v22 = vsub.f32 %v8304_v57, %v7208_v38  ;;  %v3672_v27 = vsub.f32 %v7208_v38, %v8288_v49  ;;  %v4034_v46 = vadd.f32 %v4031_v33, %v4020_v62  ;;  %v5200_v3 = vsel %vm3415_vm5, 1.0, %v8281_v7 }
0x1505   : > { %v3886_v6 = vadd.f32 %v3883_v54, %v3872_v32  ;;  %v3681_v25 = vsub.f32 %v8306_v0, %v7208_v38  ;;  %v4041_v40 = vmul.f32 %v4038_v11, %v3866_v51  ;;  %v3649_v23 = vmul.f32 %v8291_v55, %v3646_v58 }
0x1506   : > { %v3663_v29 = vmul.f32 %v7972_v28, %v3655_v22  ;;  %v3675_v43 = vmul.f32 %v7972_v28, %v3672_v27  ;;  %5814 = vmatmul.mubr.msk.f32.vlgmr.msra.gmra.mxu0 %vm1141_vm1, %v4034_v46  ;;  %v3847_v49 = vmul.f32 %v7707_v59, %v7927_v48  ;;  %v3861_v28 = vmul.f32 %v7997_v61, %v3655_v22 }
0x1507   : > { %v4055_v53 = vmul.f32 %v4052_v4, %v3886_v6  ;;  %v3689_v57 = vmul.f32 %v7988_v19, %v3681_v25  ;;  %v3652_v34 = vmul.f32 %v7923_v12, %v3649_v23  ;;  %5816 = vmatprep.mubr.msk.f32.mxu0 %vm6122_vm2, %v8281_v7  ;;  %v3870_v39 = vmul.f32 %v7997_v61, %v3646_v58 }
0x1508   : > { %v3666_v35 = vmul.f32 %v5197_v50, %v3663_v29  ;;  %v3678_v44 = vmul.f32 %v5197_v50, %v3675_v43  ;;  %v3850_v0 = vmul.f32 %v3847_v49, %v7974_v26  ;;  %v4039_v19 = vmul.f32 %v7983_v18, %v7927_v48 }
0x1509   : > { %v4058_v38 = vadd.f32 %v4055_v53, %v4041_v40  ;;  %v3692_v55 = vmul.f32 %v5200_v3, %v3689_v57  ;;  %v4018_v59 = vmul.f32 %v7730_v60, %v7797_v8  ;;  %v3881_v17 = vmul.f32 %v8005_v1, %v3681_v25 }
0x150a   : > { %v3669_v63 = vadd.f32 %v3666_v35, %v3652_v34  ;;  %v4029_v14 = vmul.f32 %v7983_v18, %v8061_v37  ;;  %v4019_v26 = vmul.f32 %v7730_v60, %v7915_v10  ;;  %v4030_v1 = vmul.f32 %v7983_v18, %v3655_v22 }
0x150b   : > { %5834 = vmatmul.mubr.msk.f32.gmra.mxu1 %vm1141_vm1, %v4058_v38  ;;  %v3695_v12 = vadd.f32 %v3692_v55, %v3678_v44  ;;  %v4021_v48 = vmul.f32 %v4018_v59, %v7895_v36  ;;  %v4053_v37 = vmul.f32 %v8018_v31, %v3681_v25 }
0x150c   : > { %5836 = vmatprep.mubr.msk.f32.mxu1 %vm6122_vm2, %v8281_v7  ;;  %v3864_v61 = vmul.f32 %v3861_v28, %v3669_v63  ;;  %v3873_v20 = vmul.f32 %v3870_v39, %v3669_v63  ;;  %v4032_v8 = vmul.f32 %v4029_v14, %v3866_v51  ;;  %v4022_v13 = vmul.f32 %v4019_v26, %v8007_v56 }
0x150d   : > { %v3884_v47 = vmul.f32 %v3881_v17, %v3695_v12 }
0x150e   : > { %v3867_v42 = vadd.f32 %v3864_v61, %v3850_v0  ;;  %v4035_v5 = vadd.f32 %v4032_v8, %v4021_v48 }
0x150f   : > { %v3887_v9 = vadd.f32 %v3884_v47, %v3873_v20 }
0x1510   : > { %v4042_v24 = vmul.f32 %v4039_v19, %v3867_v42  ;;  %v4033_v60 = vmul.f32 %v4030_v1, %v3867_v42  ;;  %5817 = vmatmul.mubr.msk.f32.gmra.mxu0 %vm1141_vm1, %v4035_v5 }
0x1511   : > { %v4056_v10 = vmul.f32 %v4053_v37, %v3887_v9  ;;  %5819 = vmatprep.mubr.msk.f32.mxu0 %vm6122_vm2, %v8281_v7 }
0x1512   : > { %v4036_v36 = vadd.f32 %v4033_v60, %v4022_v13 }
0x1513   : > { %v4059_v15 = vadd.f32 %v4056_v10, %v4042_v24 }
0x1514   : > { %5820 = vmatmul.mubr.msk.f32.gmra.mxu0 %vm1141_vm1, %v4036_v36 }
0x1515   : > { %5837 = vmatmul.mubr.msk.f32.gmra.mxu1 %vm1141_vm1, %v4059_v15 }
0x154a   : > { %v4167_v56 = vpop.f32.mrf.mxu1 }
0x154c   : > { %v5696_v18 = vpop.f32.mrf.mxu1 }
0x1557   : > { %v4172_v41 = vpop.f32.mrf.mxu1 }
0x1559   : > { %v5699_v52 = vpop.f32.mrf.mxu1 }
0x1564   : > { %v4177_v31 = vpop.f32.mrf.mxu1 }
0x1566   : > { %v5702_v30 = vpop.f32.mrf.mxu1 }
0x156a   : > { %v4343_v11 = vpop.f32.mrf.mxu1 }
0x156c   : > { %v5730_v4 = vpop.f32.mrf.mxu1 }
0x156f   : > { %v4348_v21 = vpop.f32.mrf.mxu1 }
0x1571   : > { %v5733_v2 = vpop.f32.mrf.mxu1 }
0x1575   : > { %v4353_v16 = vpop.f32.mrf.mxu1 }
0x1577   : > { %v5736_v45 = vpop.f32.mrf.mxu1 }
0x157c   : > { %v4523_v32 = vpop.f32.mrf.mxu1 }
0x157e   : > { %v5764_v7 = vpop.f32.mrf.mxu1  ;;  %v4255_v62 = vpop.f32.mrf.mxu0 }
0x157f   : > { %v4256_v54 = vadd.f32 %v4255_v62, %v4167_v56 }
0x1580   : > { %v5713_v33 = vpop.f32.mrf.mxu0 }
0x1581   : > { %v4356_v50 = vadd.f32 %v4343_v11, %v4256_v54 }
0x1584   : > { %v4260_v51 = vpop.f32.mrf.mxu0 }
0x1585   : > { %v4261_v58 = vadd.f32 %v4260_v51, %v4172_v41 }
0x1586   : > { %v5716_v22 = vpop.f32.mrf.mxu0 }
0x1587   : > { %v4357_v6 = vadd.f32 %v4348_v21, %v4261_v58 }
0x1588   : > { %v4528_v27 = vpop.f32.mrf.mxu1 }
0x158a   : > { %v5767_v46 = vpop.f32.mrf.mxu1 }
0x1594   : > { %v4533_v3 = vpop.f32.mrf.mxu1 }
0x1595   : > { %v4265_v25 = vpop.f32.mrf.mxu0 }
0x1596   : > { %v5770_v40 = vpop.f32.mrf.mxu1 }
0x1597   : > { %v5719_v23 = vpop.f32.mrf.mxu0 }
0x1599   : > { %v4433_v29 = vpop.f32.mrf.mxu0 }
0x159a   : > { %v4446_v43 = vadd.f32 %v4433_v29, %v4356_v50 }
0x159b   : > { %v5747_v53 = vpop.f32.mrf.mxu0 }
0x159c   : > { %v4536_v57 = vadd.f32 %v4523_v32, %v4446_v43 }
0x159d   : > { %v4438_v49 = vpop.f32.mrf.mxu0 }
0x159e   : > { %v4447_v34 = vadd.f32 %v4438_v49, %v4357_v6  ;;  %v4703_v35 = vpop.f32.mrf.mxu1 }
0x159f   : > { %v5750_v44 = vpop.f32.mrf.mxu0 }
0x15a0   : > { %v5798_v38 = vpop.f32.mrf.mxu1  ;;  %v4537_v55 = vadd.f32 %v4528_v27, %v4447_v34 }
0x15a2   : > { %v4443_v0 = vpop.f32.mrf.mxu0 }
0x15a4   : > { %v5753_v28 = vpop.f32.mrf.mxu0 }
0x15a6   : > { %v4613_v63 = vpop.f32.mrf.mxu0 }
0x15a7   : > { %v4626_v47 = vadd.f32 %v4613_v63, %v4536_v57 }
0x15a8   : > { %v5781_v39 = vpop.f32.mrf.mxu0 }
0x15a9   : > { %v4716_v13 = vadd.f32 %v4703_v35, %v4626_v47 }
0x15aa   : > { %v4708_v19 = vpop.f32.mrf.mxu1 }
0x15ac   : > { %v5801_v59 = vpop.f32.mrf.mxu1 }
0x15b1   : > { %v4618_v12 = vpop.f32.mrf.mxu0 }
0x15b2   : > { %v4627_v24 = vadd.f32 %v4618_v12, %v4537_v55 }
0x15b3   : > { %v5784_v17 = vpop.f32.mrf.mxu0 }
0x15b4   : > { %v4717_v10 = vadd.f32 %v4708_v19, %v4627_v24 }
0x15b7   : > { %v4713_v14 = vpop.f32.mrf.mxu1 }
0x15b9   : > { %v5804_v26 = vpop.f32.mrf.mxu1 }
0x15bd   : > { %v4623_v61 = vpop.f32.mrf.mxu0 }
0x15bf   : > { %v5787_v20 = vpop.f32.mrf.mxu0 }
0x15c0   : > { %v4883_v48 = vpop.f32.mrf.mxu1 }
0x15c2   : > { %v5832_v8 = vpop.f32.mrf.mxu1 }
0x15c6   : > { %v4793_v42 = vpop.f32.mrf.mxu0 }
0x15c7   : > { %v4806_v1 = vadd.f32 %v4793_v42, %v4716_v13 }
0x15c8   : > { %v5815_v9 = vpop.f32.mrf.mxu0 }
0x15c9   : > { %v4896_v37 = vadd.f32 %v4883_v48, %v4806_v1 }
0x15cb   : > { %v4888_v5 = vpop.f32.mrf.mxu1  ;;  %4898 = vst.msk [vmem:[%s935_s10] sm:$0xff] %vm1141_vm1, %v4896_v37 }
0x15cd   : > { %v5835_v60 = vpop.f32.mrf.mxu1 }
0x15d0   : > { %v4798_v36 = vpop.f32.mrf.mxu0 }
0x15d1   : > { %v4807_v15 = vadd.f32 %v4798_v36, %v4717_v10 }
0x15d2   : > { %v5818_v56 = vpop.f32.mrf.mxu0 }
0x15d3   : > { %v4897_v18 = vadd.f32 %v4888_v5, %v4807_v15 }
0x15d4   : > { %v4803_v52 = vpop.f32.mrf.mxu0 }
0x15d5   : > { %v4893_v41 = vpop.f32.mrf.mxu1  ;;  %4899 = vst.msk [vmem:[%s935_s10 + $0x8] sm:$0xff] %vm1141_vm1, %v4897_v18 }
0x15d6   : > { %v5821_v30 = vpop.f32.mrf.mxu0 }
0x15d7   : > { %v5838_v31 = vpop.f32.mrf.mxu1 }
0x15d8 PF: > { %s8310_s5 = sld [smem:[#allocation8_spill]] }
0x15d9   : > { %s8311_s1 = sld [smem:[#allocation6_spill]] }
0x15da   : > { %s8312_s2 = sld [smem:[#allocation7_spill]] }
0x15db   : > { %s8313_s7 = sld [smem:[#allocation9_spill]] }
0x15dc   : > { %s8314_s12 = sld [smem:[#allocation10_spill]] }
0x15de   : > { %s47_s22 = sadd.s32 1, %s8310_s5  }
0x15df   : > { %p44_p4 = scmp.ge.s32.totalorder %s47_s22, 6  }
0x15e1   :  { %46 = sbr.rel (!%p44_p4) target bundleno = 50 (0x32), region = 171 }

</bundles_post_ra>
